<compile_context>
chip_gen: v6e
topology: v6e:2x2x1
jax: 0.10.0
libtpu: 0.0.40
codegen_flags: <defaults>
</compile_context>

<pallas_src>
import functools

import jax
import jax.numpy as jnp
from jax.experimental import pallas as pl
from jax.experimental.pallas import tpu as pltpu

BN_EPS = 1e-5            # torch.nn.BatchNorm2d default
USE_BF16_MXU = False     # set True on v6e/v7x for bf16 MXU inputs (f32 accum);
                         # kept False here to hold tight f32 parity w/ reference.


# ----------------------------- Pallas kernels ----------------------------- #

def _conv3x3_fused_kernel(x_ref, w_ref, b_ref, y_ref, psum_ref, pssq_ref,
                          xp_scr, *, H, W, Cin):
    """3x3 conv (padding=1) for one batch element + partial BN statistics.

    x_ref   : (1, H, W, Cin)   unpadded input tile
    w_ref   : (9*Cin, Cout)    3x3 taps flattened along the contraction axis
    b_ref   : (1, Cout)
    y_ref   : (1, H, W, Cout)
    psum_ref: (1, 1, Cout)     per-channel sum over this batch element
    pssq_ref: (1, 1, Cout)     per-channel sum of squares over this element
    xp_scr  : VMEM (H+2, W+2, Cin) scratch for the zero-padded tile
    """
    Cout = y_ref.shape[-1]

    # Build the zero-padded tile in VMEM (no HBM-level jnp.pad in the wrapper).
    xp_scr[...] = jnp.zeros_like(xp_scr)
    xp_scr[1:H + 1, 1:W + 1, :] = x_ref[0]

    # im2col: concatenate the 9 shifted taps along the contraction axis so the
    # whole conv is a single K=9*Cin matmul instead of 9 tiny K=Cin matmuls.
    taps = []
    for kh in range(3):
        for kw in range(3):
            taps.append(xp_scr[kh:kh + H, kw:kw + W, :].reshape(H * W, Cin))
    patches = jnp.concatenate(taps, axis=-1)          # (H*W, 9*Cin)

    w = w_ref[...]
    if USE_BF16_MXU:
        patches = patches.astype(jnp.bfloat16)
        w = w.astype(jnp.bfloat16)

    acc = jnp.dot(patches, w, preferred_element_type=jnp.float32)  # (H*W, Cout)
    acc = acc + b_ref[...]                            # (1, Cout) broadcast
    y_ref[...] = acc.reshape(1, H, W, Cout)

    # Partial BatchNorm statistics for this batch element (reduced over N in
    # the wrapper) -- removes the separate full-read stats pass over y.
    psum_ref[...] = jnp.sum(acc, axis=0, keepdims=True).reshape(1, 1, Cout)
    pssq_ref[...] = jnp.sum(acc * acc, axis=0, keepdims=True).reshape(1, 1, Cout)


def _bn_elu_kernel(y_ref, scale_ref, shift_ref, o_ref):
    """Apply y*scale + shift (folded BatchNorm) then ELU(alpha=1), in place."""
    z = y_ref[...] * scale_ref[...] + shift_ref[...]
    # ELU(alpha=1): x if x > 0 else exp(x) - 1 (clamp arg so exp stays finite)
    o_ref[...] = jnp.where(z > 0, z, jnp.exp(jnp.minimum(z, 0.0)) - 1.0)


# ------------------------------ pallas_call glue --------------------------- #

def conv3x3_pallas(x_nhwc, w_hwio, bias):
    """Fused 3x3 SAME conv + per-batch-element channel sum / sum-of-squares."""
    N, H, W, Cin = x_nhwc.shape
    Cout = w_hwio.shape[-1]
    # HWIO -> (9*Cin, Cout); row-major flatten gives K index (kh*3+kw)*Cin + c,
    # which matches the tap-concatenation order inside the kernel.
    w2d = w_hwio.reshape(9 * Cin, Cout)
    b = bias.reshape(1, Cout)
    kernel = functools.partial(_conv3x3_fused_kernel, H=H, W=W, Cin=Cin)
    # TODO(synk): at real UNet resolutions, additionally tile over H (halo
    # blocks) so the per-block footprint fits v7x's 64 MiB VMEM; full-H
    # blocks are comfortable at these shapes.
    return pl.pallas_call(
        kernel,
        out_shape=(
            jax.ShapeDtypeStruct((N, H, W, Cout), jnp.float32),
            jax.ShapeDtypeStruct((N, 1, Cout), jnp.float32),
            jax.ShapeDtypeStruct((N, 1, Cout), jnp.float32),
        ),
        grid=(N,),
        in_specs=[
            pl.BlockSpec((1, H, W, Cin), lambda n: (n, 0, 0, 0)),
            pl.BlockSpec((9 * Cin, Cout), lambda n: (0, 0)),
            pl.BlockSpec((1, Cout), lambda n: (0, 0)),
        ],
        out_specs=(
            pl.BlockSpec((1, H, W, Cout), lambda n: (n, 0, 0, 0)),
            pl.BlockSpec((1, 1, Cout), lambda n: (n, 0, 0)),
            pl.BlockSpec((1, 1, Cout), lambda n: (n, 0, 0)),
        ),
        scratch_shapes=[pltpu.VMEM((H + 2, W + 2, Cin), jnp.float32)],
        compiler_params=pltpu.CompilerParams(
            dimension_semantics=("parallel",)),
    )(x_nhwc, w2d, b)


def bn_elu_pallas(y, scale, shift):
    """Folded BatchNorm + ELU, written in place over y (aliased output)."""
    N, H, W, C = y.shape
    return pl.pallas_call(
        _bn_elu_kernel,
        out_shape=jax.ShapeDtypeStruct((N, H, W, C), jnp.float32),
        grid=(N,),
        in_specs=[
            pl.BlockSpec((1, H, W, C), lambda n: (n, 0, 0, 0)),
            pl.BlockSpec((1, C), lambda n: (0, 0)),
            pl.BlockSpec((1, C), lambda n: (0, 0)),
        ],
        out_specs=pl.BlockSpec((1, H, W, C), lambda n: (n, 0, 0, 0)),
        input_output_aliases={0: 0},   # in-place over y
        compiler_params=pltpu.CompilerParams(
            dimension_semantics=("parallel",)),
    )(y, scale, shift)


def conv3bn_forward(x_nhwc, p):
    """Conv3BN: conv3x3 (+ fused stats) -> BatchNorm2d (batch stats) -> ELU."""
    y, psum, pssq = conv3x3_pallas(x_nhwc, p["w"], p["b"])
    N, H, W, C = y.shape
    cnt = jnp.float32(N * H * W)
    # Tiny (C,)-sized reduction/fold of the per-n partial stats; done in XLA so
    # the conv grid axis can stay "parallel".
    mean = jnp.sum(psum, axis=0) / cnt                              # (1, C)
    # NOTE: E[x^2]-mean^2 matches the reference; clamp guards tiny negative
    # values from cancellation.
    var = jnp.maximum(jnp.sum(pssq, axis=0) / cnt - mean * mean, 0.0)
    inv = jax.lax.rsqrt(var + BN_EPS)
    scale = p["gamma"].reshape(1, C) * inv
    shift = p["beta"].reshape(1, C) - mean * scale
    return bn_elu_pallas(y, scale, shift)


def unet_module_forward(x_nchw, params):
    """UNetModule.forward: l1 (Conv3BN) then l2 (Conv3BN)."""
    # Boundary transposes exist only for NCHW (PyTorch) API parity; all
    # internal activations stay NHWC end-to-end (no transposes between layers).
    x = jnp.transpose(x_nchw, (0, 2, 3, 1))          # NCHW -> NHWC
    x = conv3bn_forward(x, params["l1"])
    x = conv3bn_forward(x, params["l2"])
    return jnp.transpose(x, (0, 3, 1, 2))            # NHWC -> NCHW


# --------------------------- deterministic params -------------------------- #

def init_conv3bn(key, cin, cout):
    k1, k2, k3, k4 = jax.random.split(key, 4)
    fan_in = 9 * cin
    w = jax.random.normal(k1, (3, 3, cin, cout), jnp.float32) / jnp.sqrt(
        jnp.float32(fan_in))
    b = 0.1 * jax.random.normal(k2, (cout,), jnp.float32)
    gamma = 1.0 + 0.1 * jax.random.normal(k3, (cout,), jnp.float32)
    beta = 0.1 * jax.random.normal(k4, (cout,), jnp.float32)
    # TODO(synk): BatchNorm running_mean/running_var buffer updates (momentum)
    # are not modeled; forward math in training mode only needs batch stats.
    return dict(w=w, b=b, gamma=gamma, beta=beta)


# ------------------------------ pure-JAX reference -------------------------- #

def _ref_layer(x_nhwc, p):
    y = jax.lax.conv_general_dilated(
        x_nhwc, p["w"], window_strides=(1, 1), padding="SAME",
        dimension_numbers=("NHWC", "HWIO", "NHWC")) + p["b"]
    mean = jnp.mean(y, axis=(0, 1, 2))
    var = jnp.mean(y * y, axis=(0, 1, 2)) - mean * mean
    z = (y - mean) * p["gamma"] * jax.lax.rsqrt(var + BN_EPS) + p["beta"]
    return jnp.where(z > 0, z, jnp.exp(jnp.minimum(z, 0.0)) - 1.0)


def reference_forward(x_nchw, params):
    x = jnp.transpose(x_nchw, (0, 2, 3, 1))
    x = _ref_layer(x, params["l1"])
    x = _ref_layer(x, params["l2"])
    return jnp.transpose(x, (0, 3, 1, 2))


# ----------------------------------- main ----------------------------------- #

if __name__ == "__main__":
    N, C_IN, C_OUT, H, W = 2, 4, 8, 16, 16

    key = jax.random.PRNGKey(0)
    kx, k1, k2 = jax.random.split(key, 3)
    x = jax.random.normal(kx, (N, C_IN, H, W), jnp.float32)
    params = {
        "l1": init_conv3bn(k1, C_IN, C_OUT),
        "l2": init_conv3bn(k2, C_OUT, C_OUT),
    }

    out = jax.jit(unet_module_forward)(x, params)
    out = jax.block_until_ready(out)

    ref = reference_forward(x, params)
    assert out.shape == (N, C_OUT, H, W), out.shape
    assert jnp.allclose(out, ref, atol=1e-4, rtol=1e-4), (
        float(jnp.max(jnp.abs(out - ref))))

    print("KERNEL_OK")
</pallas_src>

<mosaic_0001>
module attributes {stable_mosaic.version = 11 : i64} {
  func.func @_conv3x3_fused_kernel(%arg0: i32, %arg1: memref<1x16x16x4xf32, #tpu.memory_space<vmem>>, %arg2: memref<36x8xf32, #tpu.memory_space<vmem>>, %arg3: memref<1x8xf32, #tpu.memory_space<vmem>>, %arg4: memref<1x16x16x8xf32, #tpu.memory_space<vmem>>, %arg5: memref<1x1x8xf32, #tpu.memory_space<vmem>>, %arg6: memref<1x1x8xf32, #tpu.memory_space<vmem>>, %arg7: memref<18x18x4xf32, #tpu.memory_space<vmem>>) attributes {dimension_semantics = [#tpu.dimension_semantics<parallel>], iteration_bounds = array<i64: 2>, scalar_prefetch = 0 : i64, scratch_operands = 1 : i64, tpu.core_type = #tpu.core_type<tc>, window_params = [{transform_indices = @transform_0, window_bounds = array<i64: 1, 16, 16, 4>}, {pipeline_mode = #tpu.pipeline_mode<synchronous>, transform_indices = @transform_1, window_bounds = array<i64: 36, 8>}, {pipeline_mode = #tpu.pipeline_mode<synchronous>, transform_indices = @transform_2, window_bounds = array<i64: 1, 8>}, {transform_indices = @transform_3, window_bounds = array<i64: 1, 16, 16, 8>}, {transform_indices = @transform_4, window_bounds = array<i64: 1, 1, 8>}, {transform_indices = @transform_5, window_bounds = array<i64: 1, 1, 8>}]} {
    %cst = arith.constant 0.000000e+00 : f32
    %0 = vector.broadcast %cst : f32 to vector<18x18x4xf32>
    %c0 = arith.constant 0 : index
    %c0_0 = arith.constant 0 : index
    %c0_1 = arith.constant 0 : index
    %1 = vector.load %arg7[%c0, %c0_0, %c0_1] : memref<18x18x4xf32, #tpu.memory_space<vmem>>, vector<18x18x4xf32>
    tpu.vector_store %arg7[%c0, %c0_0, %c0_1], %0 {strides = array<i32>} : memref<18x18x4xf32, #tpu.memory_space<vmem>>, vector<18x18x4xf32>,
    %c0_2 = arith.constant 0 : index
    %c0_3 = arith.constant 0 : index
    %c0_4 = arith.constant 0 : index
    %c0_5 = arith.constant 0 : index
    %2 = vector.load %arg1[%c0_2, %c0_3, %c0_4, %c0_5] : memref<1x16x16x4xf32, #tpu.memory_space<vmem>>, vector<1x16x16x4xf32>
    %3 = vector.shape_cast %2 : vector<1x16x16x4xf32> to vector<16x16x4xf32>
    %c1 = arith.constant 1 : index
    %c1_6 = arith.constant 1 : index
    %c0_7 = arith.constant 0 : index
    %4 = vector.load %arg7[%c1, %c1_6, %c0_7] : memref<18x18x4xf32, #tpu.memory_space<vmem>>, vector<16x16x4xf32>
    tpu.vector_store %arg7[%c1, %c1_6, %c0_7], %3 {strides = array<i32>} : memref<18x18x4xf32, #tpu.memory_space<vmem>>, vector<16x16x4xf32>,
    %c0_8 = arith.constant 0 : index
    %c0_9 = arith.constant 0 : index
    %c0_10 = arith.constant 0 : index
    %5 = vector.load %arg7[%c0_8, %c0_9, %c0_10] : memref<18x18x4xf32, #tpu.memory_space<vmem>>, vector<16x16x4xf32>
    %6 = vector.shape_cast %5 : vector<16x16x4xf32> to vector<256x4xf32>
    %c0_11 = arith.constant 0 : index
    %c1_12 = arith.constant 1 : index
    %c0_13 = arith.constant 0 : index
    %7 = vector.load %arg7[%c0_11, %c1_12, %c0_13] : memref<18x18x4xf32, #tpu.memory_space<vmem>>, vector<16x16x4xf32>
    %8 = vector.shape_cast %7 : vector<16x16x4xf32> to vector<256x4xf32>
    %c0_14 = arith.constant 0 : index
    %c2 = arith.constant 2 : index
    %c0_15 = arith.constant 0 : index
    %9 = vector.load %arg7[%c0_14, %c2, %c0_15] : memref<18x18x4xf32, #tpu.memory_space<vmem>>, vector<16x16x4xf32>
    %10 = vector.shape_cast %9 : vector<16x16x4xf32> to vector<256x4xf32>
    %c1_16 = arith.constant 1 : index
    %c0_17 = arith.constant 0 : index
    %c0_18 = arith.constant 0 : index
    %11 = vector.load %arg7[%c1_16, %c0_17, %c0_18] : memref<18x18x4xf32, #tpu.memory_space<vmem>>, vector<16x16x4xf32>
    %12 = vector.shape_cast %11 : vector<16x16x4xf32> to vector<256x4xf32>
    %c1_19 = arith.constant 1 : index
    %c1_20 = arith.constant 1 : index
    %c0_21 = arith.constant 0 : index
    %13 = vector.load %arg7[%c1_19, %c1_20, %c0_21] : memref<18x18x4xf32, #tpu.memory_space<vmem>>, vector<16x16x4xf32>
    %14 = vector.shape_cast %13 : vector<16x16x4xf32> to vector<256x4xf32>
    %c1_22 = arith.constant 1 : index
    %c2_23 = arith.constant 2 : index
    %c0_24 = arith.constant 0 : index
    %15 = vector.load %arg7[%c1_22, %c2_23, %c0_24] : memref<18x18x4xf32, #tpu.memory_space<vmem>>, vector<16x16x4xf32>
    %16 = vector.shape_cast %15 : vector<16x16x4xf32> to vector<256x4xf32>
    %c2_25 = arith.constant 2 : index
    %c0_26 = arith.constant 0 : index
    %c0_27 = arith.constant 0 : index
    %17 = vector.load %arg7[%c2_25, %c0_26, %c0_27] : memref<18x18x4xf32, #tpu.memory_space<vmem>>, vector<16x16x4xf32>
    %18 = vector.shape_cast %17 : vector<16x16x4xf32> to vector<256x4xf32>
    %c2_28 = arith.constant 2 : index
    %c1_29 = arith.constant 1 : index
    %c0_30 = arith.constant 0 : index
    %19 = vector.load %arg7[%c2_28, %c1_29, %c0_30] : memref<18x18x4xf32, #tpu.memory_space<vmem>>, vector<16x16x4xf32>
    %20 = vector.shape_cast %19 : vector<16x16x4xf32> to vector<256x4xf32>
    %c2_31 = arith.constant 2 : index
    %c2_32 = arith.constant 2 : index
    %c0_33 = arith.constant 0 : index
    %21 = vector.load %arg7[%c2_31, %c2_32, %c0_33] : memref<18x18x4xf32, #tpu.memory_space<vmem>>, vector<16x16x4xf32>
    %22 = vector.shape_cast %21 : vector<16x16x4xf32> to vector<256x4xf32>
    %23 = tpu.concatenate %6, %8, %10, %12, %14, %16, %18, %20, %22 in 1 : vector<256x4xf32>, vector<256x4xf32>, vector<256x4xf32>, vector<256x4xf32>, vector<256x4xf32>, vector<256x4xf32>, vector<256x4xf32>, vector<256x4xf32>, vector<256x4xf32> -> vector<256x36xf32>
    %c0_34 = arith.constant 0 : index
    %c0_35 = arith.constant 0 : index
    %24 = vector.load %arg2[%c0_34, %c0_35] : memref<36x8xf32, #tpu.memory_space<vmem>>, vector<36x8xf32>
    %cst_36 = arith.constant dense<0.000000e+00> : vector<256x8xf32>
    %25 = tpu.matmul %23, %24, %cst_36 {dimension_numbers = #tpu.dot_dimension_numbers<[1], [0], [0], [1], [0, 0, 1, 1], [], []>} : vector<256x36xf32>, vector<36x8xf32>, vector<256x8xf32> -> vector<256x8xf32>
    %c0_37 = arith.constant 0 : index
    %c0_38 = arith.constant 0 : index
    %26 = vector.load %arg3[%c0_37, %c0_38] : memref<1x8xf32, #tpu.memory_space<vmem>>, vector<1x8xf32>
    %27 = vector.broadcast %26 : vector<1x8xf32> to vector<256x8xf32>
    %28 = arith.addf %25, %27 : vector<256x8xf32>
    %29 = vector.shape_cast %28 : vector<256x8xf32> to vector<1x16x16x8xf32>
    %c0_39 = arith.constant 0 : index
    %c0_40 = arith.constant 0 : index
    %c0_41 = arith.constant 0 : index
    %c0_42 = arith.constant 0 : index
    %30 = vector.load %arg4[%c0_39, %c0_40, %c0_41, %c0_42] : memref<1x16x16x8xf32, #tpu.memory_space<vmem>>, vector<1x16x16x8xf32>
    tpu.vector_store %arg4[%c0_39, %c0_40, %c0_41, %c0_42], %29 {strides = array<i32>} : memref<1x16x16x8xf32, #tpu.memory_space<vmem>>, vector<1x16x16x8xf32>,
    %cst_43 = arith.constant dense<0.000000e+00> : vector<8xf32>
    %31 = vector.multi_reduction <add>, %28, %cst_43 [0] : vector<256x8xf32> to vector<8xf32>
    %32 = vector.shape_cast %31 : vector<8xf32> to vector<1x8xf32>
    %33 = vector.shape_cast %32 : vector<1x8xf32> to vector<1x1x8xf32>
    %c0_44 = arith.constant 0 : index
    %c0_45 = arith.constant 0 : index
    %c0_46 = arith.constant 0 : index
    %34 = vector.load %arg5[%c0_44, %c0_45, %c0_46] : memref<1x1x8xf32, #tpu.memory_space<vmem>>, vector<1x1x8xf32>
    tpu.vector_store %arg5[%c0_44, %c0_45, %c0_46], %33 {strides = array<i32>} : memref<1x1x8xf32, #tpu.memory_space<vmem>>, vector<1x1x8xf32>,
    %35 = arith.mulf %28, %28 : vector<256x8xf32>
    %cst_47 = arith.constant dense<0.000000e+00> : vector<8xf32>
    %36 = vector.multi_reduction <add>, %35, %cst_47 [0] : vector<256x8xf32> to vector<8xf32>
    %37 = vector.shape_cast %36 : vector<8xf32> to vector<1x8xf32>
    %38 = vector.shape_cast %37 : vector<1x8xf32> to vector<1x1x8xf32>
    %c0_48 = arith.constant 0 : index
    %c0_49 = arith.constant 0 : index
    %c0_50 = arith.constant 0 : index
    %39 = vector.load %arg6[%c0_48, %c0_49, %c0_50] : memref<1x1x8xf32, #tpu.memory_space<vmem>>, vector<1x1x8xf32>
    tpu.vector_store %arg6[%c0_48, %c0_49, %c0_50], %38 {strides = array<i32>} : memref<1x1x8xf32, #tpu.memory_space<vmem>>, vector<1x1x8xf32>,
    return
  }
  func.func @transform_0(%arg0: i32) -> (i32, i32, i32, i32) {
    %c0_i32 = arith.constant 0 : i32
    %c0_i32_0 = arith.constant 0 : i32
    %c0_i32_1 = arith.constant 0 : i32
    %c0_i32_2 = arith.constant 0 : i32
    return %arg0, %c0_i32, %c0_i32_0, %c0_i32_1 : i32, i32, i32, i32
  }
  func.func @transform_1(%arg0: i32) -> (i32, i32) {
    %c0_i32 = arith.constant 0 : i32
    %c0_i32_0 = arith.constant 0 : i32
    %c0_i32_1 = arith.constant 0 : i32
    return %c0_i32, %c0_i32_0 : i32, i32
  }
  func.func @transform_2(%arg0: i32) -> (i32, i32) {
    %c0_i32 = arith.constant 0 : i32
    %c0_i32_0 = arith.constant 0 : i32
    %c0_i32_1 = arith.constant 0 : i32
    return %c0_i32, %c0_i32_0 : i32, i32
  }
  func.func @transform_3(%arg0: i32) -> (i32, i32, i32, i32) {
    %c0_i32 = arith.constant 0 : i32
    %c0_i32_0 = arith.constant 0 : i32
    %c0_i32_1 = arith.constant 0 : i32
    %c0_i32_2 = arith.constant 0 : i32
    return %arg0, %c0_i32, %c0_i32_0, %c0_i32_1 : i32, i32, i32, i32
  }
  func.func @transform_4(%arg0: i32) -> (i32, i32, i32) {
    %c0_i32 = arith.constant 0 : i32
    %c0_i32_0 = arith.constant 0 : i32
    %c0_i32_1 = arith.constant 0 : i32
    return %arg0, %c0_i32, %c0_i32_0 : i32, i32, i32
  }
  func.func @transform_5(%arg0: i32) -> (i32, i32, i32) {
    %c0_i32 = arith.constant 0 : i32
    %c0_i32_0 = arith.constant 0 : i32
    %c0_i32_1 = arith.constant 0 : i32
    return %arg0, %c0_i32, %c0_i32_0 : i32, i32, i32
  }
}

module attributes {stable_mosaic.version = 11 : i64} {
  func.func @_bn_elu_kernel(%arg0: i32, %arg1: memref<1x16x16x8xf32, #tpu.memory_space<vmem>>, %arg2: memref<1x8xf32, #tpu.memory_space<vmem>>, %arg3: memref<1x8xf32, #tpu.memory_space<vmem>>, %arg4: memref<1x16x16x8xf32, #tpu.memory_space<vmem>>) attributes {dimension_semantics = [#tpu.dimension_semantics<parallel>], iteration_bounds = array<i64: 2>, scalar_prefetch = 0 : i64, scratch_operands = 0 : i64, tpu.core_type = #tpu.core_type<tc>, window_params = [{transform_indices = @transform_0, window_bounds = array<i64: 1, 16, 16, 8>}, {pipeline_mode = #tpu.pipeline_mode<synchronous>, transform_indices = @transform_1, window_bounds = array<i64: 1, 8>}, {pipeline_mode = #tpu.pipeline_mode<synchronous>, transform_indices = @transform_2, window_bounds = array<i64: 1, 8>}, {transform_indices = @transform_3, window_bounds = array<i64: 1, 16, 16, 8>}]} {
    %c0 = arith.constant 0 : index
    %c0_0 = arith.constant 0 : index
    %c0_1 = arith.constant 0 : index
    %c0_2 = arith.constant 0 : index
    %0 = vector.load %arg1[%c0, %c0_0, %c0_1, %c0_2] : memref<1x16x16x8xf32, #tpu.memory_space<vmem>>, vector<1x16x16x8xf32>
    %c0_3 = arith.constant 0 : index
    %c0_4 = arith.constant 0 : index
    %1 = vector.load %arg2[%c0_3, %c0_4] : memref<1x8xf32, #tpu.memory_space<vmem>>, vector<1x8xf32>
    %2 = vector.shape_cast %1 : vector<1x8xf32> to vector<1x1x1x8xf32>
    %3 = vector.broadcast %2 : vector<1x1x1x8xf32> to vector<1x16x16x8xf32>
    %4 = arith.mulf %0, %3 : vector<1x16x16x8xf32>
    %c0_5 = arith.constant 0 : index
    %c0_6 = arith.constant 0 : index
    %5 = vector.load %arg3[%c0_5, %c0_6] : memref<1x8xf32, #tpu.memory_space<vmem>>, vector<1x8xf32>
    %6 = vector.shape_cast %5 : vector<1x8xf32> to vector<1x1x1x8xf32>
    %7 = vector.broadcast %6 : vector<1x1x1x8xf32> to vector<1x16x16x8xf32>
    %8 = arith.addf %4, %7 : vector<1x16x16x8xf32>
    %cst = arith.constant 0.000000e+00 : f32
    %9 = vector.broadcast %cst : f32 to vector<1x16x16x8xf32>
    %10 = arith.cmpf ogt, %8, %9 : vector<1x16x16x8xf32>
    %cst_7 = arith.constant 0.000000e+00 : f32
    %11 = vector.broadcast %cst_7 : f32 to vector<1x16x16x8xf32>
    %12 = arith.minimumf %8, %11 : vector<1x16x16x8xf32>
    %13 = math.exp %12 : vector<1x16x16x8xf32>
    %cst_8 = arith.constant 1.000000e+00 : f32
    %14 = vector.broadcast %cst_8 : f32 to vector<1x16x16x8xf32>
    %15 = arith.subf %13, %14 : vector<1x16x16x8xf32>
    %16 = arith.select %10, %8, %15 : vector<1x16x16x8xi1>, vector<1x16x16x8xf32>
    %c0_9 = arith.constant 0 : index
    %c0_10 = arith.constant 0 : index
    %c0_11 = arith.constant 0 : index
    %c0_12 = arith.constant 0 : index
    %17 = vector.load %arg4[%c0_9, %c0_10, %c0_11, %c0_12] : memref<1x16x16x8xf32, #tpu.memory_space<vmem>>, vector<1x16x16x8xf32>
    tpu.vector_store %arg4[%c0_9, %c0_10, %c0_11, %c0_12], %16 {strides = array<i32>} : memref<1x16x16x8xf32, #tpu.memory_space<vmem>>, vector<1x16x16x8xf32>,
    return
  }
  func.func @transform_0(%arg0: i32) -> (i32, i32, i32, i32) {
    %c0_i32 = arith.constant 0 : i32
    %c0_i32_0 = arith.constant 0 : i32
    %c0_i32_1 = arith.constant 0 : i32
    %c0_i32_2 = arith.constant 0 : i32
    return %arg0, %c0_i32, %c0_i32_0, %c0_i32_1 : i32, i32, i32, i32
  }
  func.func @transform_1(%arg0: i32) -> (i32, i32) {
    %c0_i32 = arith.constant 0 : i32
    %c0_i32_0 = arith.constant 0 : i32
    %c0_i32_1 = arith.constant 0 : i32
    return %c0_i32, %c0_i32_0 : i32, i32
  }
  func.func @transform_2(%arg0: i32) -> (i32, i32) {
    %c0_i32 = arith.constant 0 : i32
    %c0_i32_0 = arith.constant 0 : i32
    %c0_i32_1 = arith.constant 0 : i32
    return %c0_i32, %c0_i32_0 : i32, i32
  }
  func.func @transform_3(%arg0: i32) -> (i32, i32, i32, i32) {
    %c0_i32 = arith.constant 0 : i32
    %c0_i32_0 = arith.constant 0 : i32
    %c0_i32_1 = arith.constant 0 : i32
    %c0_i32_2 = arith.constant 0 : i32
    return %arg0, %c0_i32, %c0_i32_0, %c0_i32_1 : i32, i32, i32, i32
  }
}

module attributes {stable_mosaic.version = 11 : i64} {
  func.func @_conv3x3_fused_kernel(%arg0: i32, %arg1: memref<1x16x16x8xf32, #tpu.memory_space<vmem>>, %arg2: memref<72x8xf32, #tpu.memory_space<vmem>>, %arg3: memref<1x8xf32, #tpu.memory_space<vmem>>, %arg4: memref<1x16x16x8xf32, #tpu.memory_space<vmem>>, %arg5: memref<1x1x8xf32, #tpu.memory_space<vmem>>, %arg6: memref<1x1x8xf32, #tpu.memory_space<vmem>>, %arg7: memref<18x18x8xf32, #tpu.memory_space<vmem>>) attributes {dimension_semantics = [#tpu.dimension_semantics<parallel>], iteration_bounds = array<i64: 2>, scalar_prefetch = 0 : i64, scratch_operands = 1 : i64, tpu.core_type = #tpu.core_type<tc>, window_params = [{transform_indices = @transform_0, window_bounds = array<i64: 1, 16, 16, 8>}, {pipeline_mode = #tpu.pipeline_mode<synchronous>, transform_indices = @transform_1, window_bounds = array<i64: 72, 8>}, {pipeline_mode = #tpu.pipeline_mode<synchronous>, transform_indices = @transform_2, window_bounds = array<i64: 1, 8>}, {transform_indices = @transform_3, window_bounds = array<i64: 1, 16, 16, 8>}, {transform_indices = @transform_4, window_bounds = array<i64: 1, 1, 8>}, {transform_indices = @transform_5, window_bounds = array<i64: 1, 1, 8>}]} {
    %cst = arith.constant 0.000000e+00 : f32
    %0 = vector.broadcast %cst : f32 to vector<18x18x8xf32>
    %c0 = arith.constant 0 : index
    %c0_0 = arith.constant 0 : index
    %c0_1 = arith.constant 0 : index
    %1 = vector.load %arg7[%c0, %c0_0, %c0_1] : memref<18x18x8xf32, #tpu.memory_space<vmem>>, vector<18x18x8xf32>
    tpu.vector_store %arg7[%c0, %c0_0, %c0_1], %0 {strides = array<i32>} : memref<18x18x8xf32, #tpu.memory_space<vmem>>, vector<18x18x8xf32>,
    %c0_2 = arith.constant 0 : index
    %c0_3 = arith.constant 0 : index
    %c0_4 = arith.constant 0 : index
    %c0_5 = arith.constant 0 : index
    %2 = vector.load %arg1[%c0_2, %c0_3, %c0_4, %c0_5] : memref<1x16x16x8xf32, #tpu.memory_space<vmem>>, vector<1x16x16x8xf32>
    %3 = vector.shape_cast %2 : vector<1x16x16x8xf32> to vector<16x16x8xf32>
    %c1 = arith.constant 1 : index
    %c1_6 = arith.constant 1 : index
    %c0_7 = arith.constant 0 : index
    %4 = vector.load %arg7[%c1, %c1_6, %c0_7] : memref<18x18x8xf32, #tpu.memory_space<vmem>>, vector<16x16x8xf32>
    tpu.vector_store %arg7[%c1, %c1_6, %c0_7], %3 {strides = array<i32>} : memref<18x18x8xf32, #tpu.memory_space<vmem>>, vector<16x16x8xf32>,
    %c0_8 = arith.constant 0 : index
    %c0_9 = arith.constant 0 : index
    %c0_10 = arith.constant 0 : index
    %5 = vector.load %arg7[%c0_8, %c0_9, %c0_10] : memref<18x18x8xf32, #tpu.memory_space<vmem>>, vector<16x16x8xf32>
    %6 = vector.shape_cast %5 : vector<16x16x8xf32> to vector<256x8xf32>
    %c0_11 = arith.constant 0 : index
    %c1_12 = arith.constant 1 : index
    %c0_13 = arith.constant 0 : index
    %7 = vector.load %arg7[%c0_11, %c1_12, %c0_13] : memref<18x18x8xf32, #tpu.memory_space<vmem>>, vector<16x16x8xf32>
    %8 = vector.shape_cast %7 : vector<16x16x8xf32> to vector<256x8xf32>
    %c0_14 = arith.constant 0 : index
    %c2 = arith.constant 2 : index
    %c0_15 = arith.constant 0 : index
    %9 = vector.load %arg7[%c0_14, %c2, %c0_15] : memref<18x18x8xf32, #tpu.memory_space<vmem>>, vector<16x16x8xf32>
    %10 = vector.shape_cast %9 : vector<16x16x8xf32> to vector<256x8xf32>
    %c1_16 = arith.constant 1 : index
    %c0_17 = arith.constant 0 : index
    %c0_18 = arith.constant 0 : index
    %11 = vector.load %arg7[%c1_16, %c0_17, %c0_18] : memref<18x18x8xf32, #tpu.memory_space<vmem>>, vector<16x16x8xf32>
    %12 = vector.shape_cast %11 : vector<16x16x8xf32> to vector<256x8xf32>
    %c1_19 = arith.constant 1 : index
    %c1_20 = arith.constant 1 : index
    %c0_21 = arith.constant 0 : index
    %13 = vector.load %arg7[%c1_19, %c1_20, %c0_21] : memref<18x18x8xf32, #tpu.memory_space<vmem>>, vector<16x16x8xf32>
    %14 = vector.shape_cast %13 : vector<16x16x8xf32> to vector<256x8xf32>
    %c1_22 = arith.constant 1 : index
    %c2_23 = arith.constant 2 : index
    %c0_24 = arith.constant 0 : index
    %15 = vector.load %arg7[%c1_22, %c2_23, %c0_24] : memref<18x18x8xf32, #tpu.memory_space<vmem>>, vector<16x16x8xf32>
    %16 = vector.shape_cast %15 : vector<16x16x8xf32> to vector<256x8xf32>
    %c2_25 = arith.constant 2 : index
    %c0_26 = arith.constant 0 : index
    %c0_27 = arith.constant 0 : index
    %17 = vector.load %arg7[%c2_25, %c0_26, %c0_27] : memref<18x18x8xf32, #tpu.memory_space<vmem>>, vector<16x16x8xf32>
    %18 = vector.shape_cast %17 : vector<16x16x8xf32> to vector<256x8xf32>
    %c2_28 = arith.constant 2 : index
    %c1_29 = arith.constant 1 : index
    %c0_30 = arith.constant 0 : index
    %19 = vector.load %arg7[%c2_28, %c1_29, %c0_30] : memref<18x18x8xf32, #tpu.memory_space<vmem>>, vector<16x16x8xf32>
    %20 = vector.shape_cast %19 : vector<16x16x8xf32> to vector<256x8xf32>
    %c2_31 = arith.constant 2 : index
    %c2_32 = arith.constant 2 : index
    %c0_33 = arith.constant 0 : index
    %21 = vector.load %arg7[%c2_31, %c2_32, %c0_33] : memref<18x18x8xf32, #tpu.memory_space<vmem>>, vector<16x16x8xf32>
    %22 = vector.shape_cast %21 : vector<16x16x8xf32> to vector<256x8xf32>
    %23 = tpu.concatenate %6, %8, %10, %12, %14, %16, %18, %20, %22 in 1 : vector<256x8xf32>, vector<256x8xf32>, vector<256x8xf32>, vector<256x8xf32>, vector<256x8xf32>, vector<256x8xf32>, vector<256x8xf32>, vector<256x8xf32>, vector<256x8xf32> -> vector<256x72xf32>
    %c0_34 = arith.constant 0 : index
    %c0_35 = arith.constant 0 : index
    %24 = vector.load %arg2[%c0_34, %c0_35] : memref<72x8xf32, #tpu.memory_space<vmem>>, vector<72x8xf32>
    %cst_36 = arith.constant dense<0.000000e+00> : vector<256x8xf32>
    %25 = tpu.matmul %23, %24, %cst_36 {dimension_numbers = #tpu.dot_dimension_numbers<[1], [0], [0], [1], [0, 0, 1, 1], [], []>} : vector<256x72xf32>, vector<72x8xf32>, vector<256x8xf32> -> vector<256x8xf32>
    %c0_37 = arith.constant 0 : index
    %c0_38 = arith.constant 0 : index
    %26 = vector.load %arg3[%c0_37, %c0_38] : memref<1x8xf32, #tpu.memory_space<vmem>>, vector<1x8xf32>
    %27 = vector.broadcast %26 : vector<1x8xf32> to vector<256x8xf32>
    %28 = arith.addf %25, %27 : vector<256x8xf32>
    %29 = vector.shape_cast %28 : vector<256x8xf32> to vector<1x16x16x8xf32>
    %c0_39 = arith.constant 0 : index
    %c0_40 = arith.constant 0 : index
    %c0_41 = arith.constant 0 : index
    %c0_42 = arith.constant 0 : index
    %30 = vector.load %arg4[%c0_39, %c0_40, %c0_41, %c0_42] : memref<1x16x16x8xf32, #tpu.memory_space<vmem>>, vector<1x16x16x8xf32>
    tpu.vector_store %arg4[%c0_39, %c0_40, %c0_41, %c0_42], %29 {strides = array<i32>} : memref<1x16x16x8xf32, #tpu.memory_space<vmem>>, vector<1x16x16x8xf32>,
    %cst_43 = arith.constant dense<0.000000e+00> : vector<8xf32>
    %31 = vector.multi_reduction <add>, %28, %cst_43 [0] : vector<256x8xf32> to vector<8xf32>
    %32 = vector.shape_cast %31 : vector<8xf32> to vector<1x8xf32>
    %33 = vector.shape_cast %32 : vector<1x8xf32> to vector<1x1x8xf32>
    %c0_44 = arith.constant 0 : index
    %c0_45 = arith.constant 0 : index
    %c0_46 = arith.constant 0 : index
    %34 = vector.load %arg5[%c0_44, %c0_45, %c0_46] : memref<1x1x8xf32, #tpu.memory_space<vmem>>, vector<1x1x8xf32>
    tpu.vector_store %arg5[%c0_44, %c0_45, %c0_46], %33 {strides = array<i32>} : memref<1x1x8xf32, #tpu.memory_space<vmem>>, vector<1x1x8xf32>,
    %35 = arith.mulf %28, %28 : vector<256x8xf32>
    %cst_47 = arith.constant dense<0.000000e+00> : vector<8xf32>
    %36 = vector.multi_reduction <add>, %35, %cst_47 [0] : vector<256x8xf32> to vector<8xf32>
    %37 = vector.shape_cast %36 : vector<8xf32> to vector<1x8xf32>
    %38 = vector.shape_cast %37 : vector<1x8xf32> to vector<1x1x8xf32>
    %c0_48 = arith.constant 0 : index
    %c0_49 = arith.constant 0 : index
    %c0_50 = arith.constant 0 : index
    %39 = vector.load %arg6[%c0_48, %c0_49, %c0_50] : memref<1x1x8xf32, #tpu.memory_space<vmem>>, vector<1x1x8xf32>
    tpu.vector_store %arg6[%c0_48, %c0_49, %c0_50], %38 {strides = array<i32>} : memref<1x1x8xf32, #tpu.memory_space<vmem>>, vector<1x1x8xf32>,
    return
  }
  func.func @transform_0(%arg0: i32) -> (i32, i32, i32, i32) {
    %c0_i32 = arith.constant 0 : i32
    %c0_i32_0 = arith.constant 0 : i32
    %c0_i32_1 = arith.constant 0 : i32
    %c0_i32_2 = arith.constant 0 : i32
    return %arg0, %c0_i32, %c0_i32_0, %c0_i32_1 : i32, i32, i32, i32
  }
  func.func @transform_1(%arg0: i32) -> (i32, i32) {
    %c0_i32 = arith.constant 0 : i32
    %c0_i32_0 = arith.constant 0 : i32
    %c0_i32_1 = arith.constant 0 : i32
    return %c0_i32, %c0_i32_0 : i32, i32
  }
  func.func @transform_2(%arg0: i32) -> (i32, i32) {
    %c0_i32 = arith.constant 0 : i32
    %c0_i32_0 = arith.constant 0 : i32
    %c0_i32_1 = arith.constant 0 : i32
    return %c0_i32, %c0_i32_0 : i32, i32
  }
  func.func @transform_3(%arg0: i32) -> (i32, i32, i32, i32) {
    %c0_i32 = arith.constant 0 : i32
    %c0_i32_0 = arith.constant 0 : i32
    %c0_i32_1 = arith.constant 0 : i32
    %c0_i32_2 = arith.constant 0 : i32
    return %arg0, %c0_i32, %c0_i32_0, %c0_i32_1 : i32, i32, i32, i32
  }
  func.func @transform_4(%arg0: i32) -> (i32, i32, i32) {
    %c0_i32 = arith.constant 0 : i32
    %c0_i32_0 = arith.constant 0 : i32
    %c0_i32_1 = arith.constant 0 : i32
    return %arg0, %c0_i32, %c0_i32_0 : i32, i32, i32
  }
  func.func @transform_5(%arg0: i32) -> (i32, i32, i32) {
    %c0_i32 = arith.constant 0 : i32
    %c0_i32_0 = arith.constant 0 : i32
    %c0_i32_1 = arith.constant 0 : i32
    return %arg0, %c0_i32, %c0_i32_0 : i32, i32, i32
  }
}

</mosaic_0001>

<bundles_post_ra>
// kernel: unet_module_forward.5
= control target key start
LH: loop header
LB: loop body
LE: loop exit
PB: predicated region body
PF: predicated region fallthrough
CT: control target
= control target key end

     0   :  { %s708_s12 = smov 0   ;;  %s1128_s0 = inlined_call_operand.vmem [shape: f32[2,16,16,8], index: 0, kind: input, shape index: {}, may-alias: {0,3}]   ;;  %s1129_s1 = inlined_call_operand.vmem [shape: f32[1,8], index: 1, kind: input, shape index: {}]   ;;  %s1130_s2 = inlined_call_operand.vmem [shape: f32[1,8], index: 2, kind: input, shape index: {}]   ;;  %s1131_s3 = inlined_call_operand.vmem [shape: f32[2,16,16,8], index: 3, kind: output, shape index: {}, may-alias: {0,3}]  }
   0x1 LB: > { %s561_s13 = sadd.s32 4294967295, %s686_s12   ;;  %p565_p0 = scmp.ge.s32.totalorder %s686_s12, 1  ;;  %s686_s12 = sphi %s708_s12, %s13_s12  }
   0x2   : > { %p137_p1 = scmp.lt.s32.totalorder %s686_s12, 3 }
   0x4   : > { %p138_p2 = pnand %p565_p0, %p137_p1 }
   0x5   : > { %p161_p3 = scmp.lt.s32.totalorder (!%p138_p2), %s561_s13, 1 }
   0x6   : > { %141 = sbr.rel (%p138_p2) target bundleno = 93 (0x5d), region = 32 }
   0xb   : > { %s1133_s13 = smov (!%p161_p3, %s561_s13), 1  ;;  %v722_v0 = vld [vmem:[%s1129_s1] ss:$0 sm:$0xff]  ;;  %vm473_vm1 = vcmask 64512  }
   0xc   : > { %s606_s14 = sshll.u32 %s1133_s13, 8  ;;  %v734_v1 = vld [vmem:[%s1130_s2] ss:$0 sm:$0xff] }
   0xd   : > { %s729_s19 = scalar_lea.vmem %s1128_s0, %s606_s14  ;;  %s844_s24 = scalar_lea.vmem %s1131_s3, %s606_s14 }
   0xe   : > { %v171_v2 = vld [vmem:[%s729_s19] sm:$0xff]  ;;  %v172_v3 = vld [vmem:[%s729_s19 + $0x8] sm:$0xff]  ;;  %v173_v4 = vld [vmem:[%s729_s19 + $0x10] sm:$0xff] }
   0xf   : > { %v174_v5 = vld [vmem:[%s729_s19 + $0x18] sm:$0xff]  ;;  %v175_v6 = vld [vmem:[%s729_s19 + $0x20] sm:$0xff]  ;;  %v176_v7 = vld [vmem:[%s729_s19 + $0x28] sm:$0xff]  ;;  %v210_v8 = vmul.f32 %v722_v0, %v171_v2  ;;  %v211_v9 = vmul.f32 %v722_v0, %v172_v3  ;;  %v212_v10 = vmul.f32 %v722_v0, %v173_v4 }
  0x10   : > { %v177_v11 = vld [vmem:[%s729_s19 + $0x30] sm:$0xff]  ;;  %v178_v12 = vld [vmem:[%s729_s19 + $0x38] sm:$0xff]  ;;  %v213_v13 = vmul.f32 %v722_v0, %v174_v5  ;;  %v214_v14 = vmul.f32 %v722_v0, %v175_v6  ;;  %v215_v15 = vmul.f32 %v722_v0, %v176_v7  ;;  %v179_v20 = vld [vmem:[%s729_s19 + $0x40] sm:$0xff] }
  0x11   : > { %v751_v16 = vadd.f32 %v734_v1, %v210_v8  ;;  %v754_v17 = vadd.f32 %v734_v1, %v211_v9  ;;  %v757_v18 = vadd.f32 %v734_v1, %v212_v10  ;;  %v216_v19 = vmul.f32 %v722_v0, %v177_v11  ;;  %v180_v24 = vld [vmem:[%s729_s19 + $0x48] sm:$0xff]  ;;  %v181_v28 = vld [vmem:[%s729_s19 + $0x50] sm:$0xff]  ;;  %v182_v33 = vld [vmem:[%s729_s19 + $0x58] sm:$0xff] }
  0x12   : > { %v762_v21 = vadd.f32 %v734_v1, %v213_v13  ;;  %v217_v22 = vmul.f32 %v722_v0, %v178_v12  ;;  %v770_v27 = vadd.f32 %v734_v1, %v214_v14  ;;  %v774_v30 = vadd.f32 %v734_v1, %v215_v15  ;;  %v183_v46 = vld [vmem:[%s729_s19 + $0x60] sm:$0xff]  ;;  %v184_v55 = vld [vmem:[%s729_s19 + $0x68] sm:$0xff]  ;;  %v185_v59 = vld [vmem:[%s729_s19 + $0x70] sm:$0xff] }
  0x13   : > { %v313_v23 = vmin.f32 %v751_v16, 0.0  ;;  %v314_v25 = vmin.f32 %v754_v17, 0.0  ;;  %v315_v26 = vmin.f32 %v757_v18, 0.0  ;;  %v777_v31 = vadd.f32 %v734_v1, %v216_v19  ;;  %v186_v60 = vld [vmem:[%s729_s19 + $0x78] sm:$0xff]  ;;  %v187_v2 = vld [vmem:[%s729_s19 + $0x80] sm:$0xff] }
  0x14   : > { %v218_v32 = vmul.f32 %v722_v0, %v179_v20  ;;  %v316_v35 = vmin.f32 %v762_v21, 0.0  ;;  %v783_v36 = vadd.f32 %v734_v1, %v217_v22  ;;  %v219_v39 = vmul.f32 %v722_v0, %v180_v24  ;;  %v189_v24 = vld [vmem:[%s729_s19 + $0x90] sm:$0xff] }
  0x15   : > { %v345_v29 = vmul.f32 1.442695, %v313_v23  ;;  %v347_v34 = vmul.f32 1.442695, %v314_v25  ;;  %v349_v37 = vmul.f32 1.442695, %v315_v26  ;;  %v220_v42 = vmul.f32 %v722_v0, %v181_v28 }
  0x16   : > { %v786_v38 = vadd.f32 %v734_v1, %v218_v32  ;;  %v351_v40 = vmul.f32 1.442695, %v316_v35  ;;  %v317_v41 = vmin.f32 %v770_v27, 0.0  ;;  %v318_v43 = vmin.f32 %v774_v30, 0.0  ;;  %v188_v23 = vld [vmem:[%s729_s19 + $0x88] sm:$0xff]  ;;  %v190_v25 = vld [vmem:[%s729_s19 + $0x98] sm:$0xff] }
  0x17   : > { %616 = vpow2.f32 %v345_v29  ;;  %v319_v44 = vmin.f32 %v777_v31, 0.0  ;;  %v221_v45 = vmul.f32 %v722_v0, %v182_v33  ;;  %v320_v48 = vmin.f32 %v783_v36, 0.0  ;;  %v191_v26 = vld [vmem:[%s729_s19 + $0xa0] sm:$0xff]  ;;  %v851_v28 = vld [vmem:[%s729_s19 + $0xa8] sm:$0xff]  ;;  %v854_v29 = vld [vmem:[%s729_s19 + $0xb0] sm:$0xff] }
  0x18   : > { %618 = vpow2.f32 %v347_v34  ;;  %v353_v47 = vmul.f32 1.442695, %v317_v41  ;;  %v355_v49 = vmul.f32 1.442695, %v318_v43  ;;  %v321_v51 = vmin.f32 %v786_v38, 0.0  ;;  %v857_v32 = vld [vmem:[%s729_s19 + $0xb8] sm:$0xff] }
  0x19   : > { %620 = vpow2.f32 %v349_v37  ;;  %v357_v50 = vmul.f32 1.442695, %v319_v44  ;;  %vm281_vm0 = vcmp.gt.f32.partialorder %v751_v16, 0.0  ;;  %v359_v52 = vmul.f32 1.442695, %v320_v48  ;;  %v860_v33 = vld [vmem:[%s729_s19 + $0xc0] sm:$0xff] }
  0x1a   : > { %622 = vpow2.f32 %v351_v40  ;;  %v799_v53 = vadd.f32 %v734_v1, %v219_v39  ;;  %v802_v54 = vadd.f32 %v734_v1, %v220_v42  ;;  %v361_v56 = vmul.f32 1.442695, %v321_v51  ;;  %v863_v34 = vld [vmem:[%s729_s19 + $0xc8] sm:$0xff]  ;;  %v866_v35 = vld [vmem:[%s729_s19 + $0xd0] sm:$0xff]  ;;  %v872_v41 = vld [vmem:[%s729_s19 + $0xd8] sm:$0xff] }
  0x1b   : > { %624 = vpow2.f32 %v353_v47  ;;  %v806_v57 = vadd.f32 %v734_v1, %v221_v45  ;;  %v222_v58 = vmul.f32 %v722_v0, %v183_v46  ;;  %vm282_vm2 = vcmp.gt.f32.partialorder %v754_v17, 0.0  ;;  %v875_v42 = vld [vmem:[%s729_s19 + $0xe0] sm:$0xff]  ;;  %v879_v47 = vld [vmem:[%s729_s19 + $0xe8] sm:$0xff]  ;;  %v882_v48 = vld [vmem:[%s729_s19 + $0xf0] sm:$0xff] }
  0x1c   : > { %626 = vpow2.f32 %v355_v49  ;;  %vm283_vm3 = vcmp.gt.f32.partialorder %v757_v18, 0.0  ;;  %v322_v61 = vmin.f32 %v799_v53, 0.0  ;;  %vm284_vm4 = vcmp.gt.f32.partialorder %v762_v21, 0.0  ;;  %v885_v49 = vld [vmem:[%s729_s19 + $0xf8] sm:$0xff] }
  0x1d   : > { %628 = vpow2.f32 %v357_v50  ;;  %v323_v62 = vmin.f32 %v802_v54, 0.0  ;;  %v324_v63 = vmin.f32 %v806_v57, 0.0  ;;  %v819_v4 = vadd.f32 %v734_v1, %v222_v58 }
  0x1e   : > { %630 = vpow2.f32 %v359_v52  ;;  %v363_v3 = vmul.f32 1.442695, %v322_v61  ;;  %v223_v5 = vmul.f32 %v722_v0, %v184_v55  ;;  %vm285_vm5 = vcmp.gt.f32.partialorder %v770_v27, 0.0 }
  0x1f   : > { %632 = vpow2.f32 %v361_v56  ;;  %v365_v6 = vmul.f32 1.442695, %v323_v62  ;;  %v367_v7 = vmul.f32 1.442695, %v324_v63  ;;  %v224_v8 = vmul.f32 %v722_v0, %v185_v59 }
  0x20   : > { %v225_v9 = vmul.f32 %v722_v0, %v186_v60  ;;  %vm286_vm6 = vcmp.gt.f32.partialorder %v774_v30, 0.0  ;;  %634 = vpow2.f32 %v363_v3  ;;  %v325_v10 = vmin.f32 %v819_v4, 0.0 }
  0x21   : > { %v828_v11 = vadd.f32 %v734_v1, %v223_v5  ;;  %636 = vpow2.f32 %v365_v6  ;;  %v831_v12 = vadd.f32 %v734_v1, %v224_v8  ;;  %v226_v14 = vmul.f32 %v722_v0, %v187_v2 }
  0x22   : > { %v834_v13 = vadd.f32 %v734_v1, %v225_v9  ;;  %vm287_vm7 = vcmp.gt.f32.partialorder %v777_v31, 0.0  ;;  %638 = vpow2.f32 %v367_v7  ;;  %v369_v19 = vmul.f32 1.442695, %v325_v10 }
  0x23   : > { %v326_v20 = vmin.f32 %v828_v11, 0.0  ;;  %vm288_vm8 = vcmp.gt.f32.partialorder %v783_v36, 0.0  ;;  %vm289_vm9 = vcmp.gt.f32.partialorder %v786_v38, 0.0  ;;  %v327_v39 = vmin.f32 %v831_v12, 0.0 }
  0x24   : > { %v617_v15 = vpop.eup %616  ;;  %640 = vpow2.f32 %v369_v19  ;;  %v328_v45 = vmin.f32 %v834_v13, 0.0  ;;  %vm290_vm10 = vcmp.gt.f32.partialorder %v799_v53, 0.0  ;;  %v892_v55 = vadd.f32 %v734_v1, %v226_v14 }
  0x25   : > { %v619_v22 = vpop.eup %618  ;;  %v572_v37 = vadd.f32 -1.0, %v617_v15  ;;  %v371_v44 = vmul.f32 1.442695, %v326_v20  ;;  %v373_v52 = vmul.f32 1.442695, %v327_v39  ;;  %vm291_vm11 = vcmp.gt.f32.partialorder %v802_v54, 0.0 }
  0x26   : > { %v621_v40 = vpop.eup %620  ;;  %v573_v43 = vadd.f32 -1.0, %v619_v22  ;;  %vm292_vm12 = vcmp.gt.f32.partialorder %v806_v57, 0.0  ;;  %v329_v61 = vmin.f32 %v892_v55, 0.0  ;;  %v227_v2 = vmul.f32 %v722_v0, %v188_v23 }
  0x27   : > { %v623_v46 = vpop.eup %622  ;;  %v441_v50 = vsel %vm281_vm0, %v751_v16, %v572_v37  ;;  %v574_v51 = vadd.f32 -1.0, %v621_v40  ;;  %642 = vpow2.f32 %v371_v44  ;;  %v375_v16 = vmul.f32 1.442695, %v328_v45 }
  0x28   : > { %474 = vst.msk [vmem:[%s844_s24] sm:$0xff] %vm473_vm1, %v441_v50  ;;  %v442_v56 = vsel %vm282_vm2, %v754_v17, %v573_v43  ;;  %v575_v58 = vadd.f32 -1.0, %v623_v46  ;;  %v625_v59 = vpop.eup %624  ;;  %644 = vpow2.f32 %v373_v52  ;;  %v377_v5 = vmul.f32 1.442695, %v329_v61 }
  0x29   : > { %475 = vst.msk [vmem:[%s844_s24 + $0x8] sm:$0xff] %vm473_vm1, %v442_v56  ;;  %v443_v60 = vsel %vm283_vm3, %v757_v18, %v574_v51  ;;  %v627_v62 = vpop.eup %626  ;;  %v576_v63 = vadd.f32 -1.0, %v625_v59  ;;  %646 = vpow2.f32 %v375_v16  ;;  %v228_v6 = vmul.f32 %v722_v0, %v189_v24 }
  0x2a   : > { %476 = vst.msk [vmem:[%s844_s24 + $0x10] sm:$0xff] %vm473_vm1, %v443_v60  ;;  %v444_v17 = vsel %vm284_vm4, %v762_v21, %v575_v58  ;;  %v629_v3 = vpop.eup %628  ;;  %v577_v18 = vadd.f32 -1.0, %v627_v62  ;;  %v229_v7 = vmul.f32 %v722_v0, %v190_v25  ;;  %v921_v10 = vadd.f32 %v734_v1, %v227_v2 }
  0x2b   : > { %477 = vst.msk [vmem:[%s844_s24 + $0x18] sm:$0xff] %vm473_vm1, %v444_v17  ;;  %v631_v8 = vpop.eup %630  ;;  %v445_v21 = vsel %vm285_vm5, %v770_v27, %v576_v63  ;;  %v578_v9 = vadd.f32 -1.0, %v629_v3  ;;  %v230_v14 = vmul.f32 %v722_v0, %v191_v26  ;;  %648 = vpow2.f32 %v377_v5 }
  0x2c   : > { %v633_v15 = vpop.eup %632  ;;  %478 = vst.msk [vmem:[%s844_s24 + $0x20] sm:$0xff] %vm473_vm1, %v445_v21  ;;  %v446_v19 = vsel %vm286_vm6, %v774_v30, %v577_v18  ;;  %v579_v20 = vadd.f32 -1.0, %v631_v8  ;;  %v930_v22 = vadd.f32 %v734_v1, %v228_v6  ;;  %vm293_vm13 = vcmp.gt.f32.partialorder %v819_v4, 0.0 }
  0x2d   : > { %479 = vst.msk [vmem:[%s844_s24 + $0x28] sm:$0xff] %vm473_vm1, %v446_v19  ;;  %v447_v27 = vsel %vm287_vm7, %v777_v31, %v578_v9  ;;  %v580_v23 = vadd.f32 -1.0, %v633_v15  ;;  %v330_v24 = vmin.f32 %v921_v10, 0.0  ;;  %v635_v25 = vpop.eup %634  ;;  %vm294_vm14 = vcmp.gt.f32.partialorder %v828_v11, 0.0 }
  0x2e   : > { %480 = vst.msk [vmem:[%s844_s24 + $0x30] sm:$0xff] %vm473_vm1, %v447_v27  ;;  %v448_v30 = vsel %vm288_vm8, %v783_v36, %v579_v20  ;;  %v331_v26 = vmin.f32 %v930_v22, 0.0  ;;  %v947_v37 = vadd.f32 %v734_v1, %v229_v7  ;;  %v637_v31 = vpop.eup %636  ;;  %v581_v40 = vadd.f32 -1.0, %v635_v25 }
  0x2f   : > { %481 = vst.msk [vmem:[%s844_s24 + $0x38] sm:$0xff] %vm473_vm1, %v448_v30  ;;  %v449_v39 = vsel %vm289_vm9, %v786_v38, %v580_v23  ;;  %v379_v43 = vmul.f32 1.442695, %v330_v24  ;;  %v955_v44 = vadd.f32 %v734_v1, %v230_v14  ;;  %v639_v36 = vpop.eup %638  ;;  %v582_v45 = vadd.f32 -1.0, %v637_v31 }
  0x30   : > { %482 = vst.msk [vmem:[%s844_s24 + $0x40] sm:$0xff] %vm473_vm1, %v449_v39  ;;  %vm295_vm15 = vcmp.gt.f32.partialorder %v831_v12, 0.0  ;;  %v381_v46 = vmul.f32 1.442695, %v331_v26  ;;  %v332_v50 = vmin.f32 %v947_v37, 0.0  ;;  %v450_v51 = vsel %vm290_vm10, %v799_v53, %v581_v40 }
  0x31   : > { %v583_v38 = vadd.f32 -1.0, %v639_v36  ;;  %vm296_vm0 = vcmp.gt.f32.partialorder %v834_v13, 0.0  ;;  %650 = vpow2.f32 %v379_v43  ;;  %v641_v52 = vpop.eup %640  ;;  %483 = vst.msk [vmem:[%s844_s24 + $0x48] sm:$0xff] %vm473_vm1, %v450_v51  ;;  %v451_v56 = vsel %vm291_vm11, %v802_v54, %v582_v45 }
  0x32   : > { %652 = vpow2.f32 %v381_v46  ;;  %v383_v58 = vmul.f32 1.442695, %v332_v50  ;;  %v333_v16 = vmin.f32 %v955_v44, 0.0  ;;  %484 = vst.msk [vmem:[%s844_s24 + $0x50] sm:$0xff] %vm473_vm1, %v451_v56  ;;  %v584_v59 = vadd.f32 -1.0, %v641_v52 }
  0x33   : > { %v452_v53 = vsel %vm292_vm12, %v806_v57, %v583_v38  ;;  %v231_v60 = vmul.f32 %v722_v0, %v851_v28  ;;  %v232_v61 = vmul.f32 %v722_v0, %v854_v29  ;;  %v233_v17 = vmul.f32 %v722_v0, %v857_v32 }
  0x34   : > { %v643_v62 = vpop.eup %642  ;;  %485 = vst.msk [vmem:[%s844_s24 + $0x58] sm:$0xff] %vm473_vm1, %v452_v53  ;;  %654 = vpow2.f32 %v383_v58  ;;  %v385_v54 = vmul.f32 1.442695, %v333_v16  ;;  %v234_v57 = vmul.f32 %v722_v0, %v860_v33  ;;  %v453_v28 = vsel %vm293_vm13, %v819_v4, %v584_v59 }
  0x35   : > { %v645_v63 = vpop.eup %644  ;;  %v585_v2 = vadd.f32 -1.0, %v643_v62  ;;  %v990_v29 = vadd.f32 %v734_v1, %v231_v60  ;;  %v993_v3 = vadd.f32 %v734_v1, %v232_v61  ;;  %486 = vst.msk [vmem:[%s844_s24 + $0x60] sm:$0xff] %vm473_vm1, %v453_v28  ;;  %v998_v33 = vadd.f32 %v734_v1, %v233_v17 }
  0x36   : > { %v647_v18 = vpop.eup %646  ;;  %v586_v32 = vadd.f32 -1.0, %v645_v63  ;;  %656 = vpow2.f32 %v385_v54  ;;  %v1001_v5 = vadd.f32 %v734_v1, %v234_v57  ;;  %vm297_vm2 = vcmp.gt.f32.partialorder %v892_v55, 0.0 }
  0x37   : > { %v454_v4 = vsel %vm294_vm14, %v828_v11, %v585_v2  ;;  %v587_v6 = vadd.f32 -1.0, %v647_v18  ;;  %v334_v7 = vmin.f32 %v990_v29, 0.0  ;;  %v335_v21 = vmin.f32 %v993_v3, 0.0 }
  0x38   : > { %487 = vst.msk [vmem:[%s844_s24 + $0x68] sm:$0xff] %vm473_vm1, %v454_v4  ;;  %v455_v8 = vsel %vm295_vm15, %v831_v12, %v586_v32  ;;  %v649_v9 = vpop.eup %648  ;;  %v336_v15 = vmin.f32 %v998_v33, 0.0  ;;  %v337_v12 = vmin.f32 %v1001_v5, 0.0  ;;  %v235_v27 = vmul.f32 %v722_v0, %v863_v34 }
  0x39   : > { %488 = vst.msk [vmem:[%s844_s24 + $0x70] sm:$0xff] %vm473_vm1, %v455_v8  ;;  %v456_v14 = vsel %vm296_vm0, %v834_v13, %v587_v6  ;;  %v387_v11 = vmul.f32 1.442695, %v334_v7  ;;  %v588_v19 = vadd.f32 -1.0, %v649_v9  ;;  %v389_v20 = vmul.f32 1.442695, %v335_v21 }
  0x3a   : > { %489 = vst.msk [vmem:[%s844_s24 + $0x78] sm:$0xff] %vm473_vm1, %v456_v14  ;;  %v391_v23 = vmul.f32 1.442695, %v336_v15  ;;  %v236_v13 = vmul.f32 %v722_v0, %v866_v35  ;;  %v237_v24 = vmul.f32 %v722_v0, %v872_v41  ;;  %v393_v30 = vmul.f32 1.442695, %v337_v12 }
  0x3b   : > { %658 = vpow2.f32 %v387_v11  ;;  %v457_v25 = vsel %vm297_vm2, %v892_v55, %v588_v19  ;;  %v1031_v26 = vadd.f32 %v734_v1, %v235_v27  ;;  %v238_v35 = vmul.f32 %v722_v0, %v875_v42 }
  0x3c   : > { %660 = vpow2.f32 %v389_v20  ;;  %490 = vst.msk [vmem:[%s844_s24 + $0x80] sm:$0xff] %vm473_vm1, %v457_v25  ;;  %v1036_v34 = vadd.f32 %v734_v1, %v236_v13  ;;  %v1039_v31 = vadd.f32 %v734_v1, %v237_v24  ;;  %vm298_vm3 = vcmp.gt.f32.partialorder %v921_v10, 0.0 }
  0x3d   : > { %662 = vpow2.f32 %v391_v23  ;;  %v338_v55 = vmin.f32 %v1031_v26, 0.0  ;;  %v239_v39 = vmul.f32 %v722_v0, %v879_v47  ;;  %vm299_vm4 = vcmp.gt.f32.partialorder %v930_v22, 0.0 }
  0x3e   : > { %v651_v41 = vpop.eup %650  ;;  %664 = vpow2.f32 %v393_v30  ;;  %vm300_vm5 = vcmp.gt.f32.partialorder %v947_v37, 0.0  ;;  %v339_v36 = vmin.f32 %v1036_v34, 0.0  ;;  %v340_v46 = vmin.f32 %v1039_v31, 0.0 }
  0x3f   : > { %v653_v40 = vpop.eup %652  ;;  %v589_v43 = vadd.f32 -1.0, %v651_v41  ;;  %v395_v45 = vmul.f32 1.442695, %v338_v55  ;;  %v1052_v50 = vadd.f32 %v734_v1, %v238_v35  ;;  %v1056_v52 = vadd.f32 %v734_v1, %v239_v39 }
  0x40   : > { %v590_v42 = vadd.f32 -1.0, %v653_v40  ;;  %v397_v47 = vmul.f32 1.442695, %v339_v36  ;;  %v240_v56 = vmul.f32 %v722_v0, %v882_v48  ;;  %v399_v53 = vmul.f32 1.442695, %v340_v46 }
  0x41   : > { %v655_v51 = vpop.eup %654  ;;  %v458_v38 = vsel %vm298_vm3, %v921_v10, %v589_v43  ;;  %666 = vpow2.f32 %v395_v45  ;;  %vm301_vm6 = vcmp.gt.f32.partialorder %v955_v44, 0.0  ;;  %v341_v10 = vmin.f32 %v1052_v50, 0.0 }
  0x42   : > { %491 = vst.msk [vmem:[%s844_s24 + $0x88] sm:$0xff] %vm473_vm1, %v458_v38  ;;  %v459_v58 = vsel %vm299_vm4, %v930_v22, %v590_v42  ;;  %v591_v16 = vadd.f32 -1.0, %v655_v51  ;;  %668 = vpow2.f32 %v397_v47  ;;  %v342_v22 = vmin.f32 %v1056_v52, 0.0 }
  0x43   : > { %v657_v59 = vpop.eup %656  ;;  %492 = vst.msk [vmem:[%s844_s24 + $0x90] sm:$0xff] %vm473_vm1, %v459_v58  ;;  %670 = vpow2.f32 %v399_v53  ;;  %v401_v61 = vmul.f32 1.442695, %v341_v10  ;;  %v1074_v62 = vadd.f32 %v734_v1, %v240_v56  ;;  %v241_v54 = vmul.f32 %v722_v0, %v885_v49 }
  0x44   : > { %v460_v48 = vsel %vm300_vm5, %v947_v37, %v591_v16  ;;  %v592_v60 = vadd.f32 -1.0, %v657_v59  ;;  %v403_v57 = vmul.f32 1.442695, %v342_v22  ;;  %vm302_vm7 = vcmp.gt.f32.partialorder %v990_v29, 0.0 }
  0x45   : > { %493 = vst.msk [vmem:[%s844_s24 + $0x98] sm:$0xff] %vm473_vm1, %v460_v48  ;;  %672 = vpow2.f32 %v401_v61  ;;  %v343_v37 = vmin.f32 %v1074_v62, 0.0  ;;  %v280_v63 = vadd.f32 %v734_v1, %v241_v54  ;;  %vm303_vm8 = vcmp.gt.f32.partialorder %v993_v3, 0.0 }
  0x46   : > { %v461_v17 = vsel %vm301_vm6, %v955_v44, %v592_v60  ;;  %674 = vpow2.f32 %v403_v57  ;;  %vm304_vm9 = vcmp.gt.f32.partialorder %v998_v33, 0.0  ;;  %vm305_vm10 = vcmp.gt.f32.partialorder %v1001_v5, 0.0 }
  0x47   : > { %494 = vst.msk [vmem:[%s844_s24 + $0xa0] sm:$0xff] %vm473_vm1, %v461_v17  ;;  %v405_v0 = vmul.f32 1.442695, %v343_v37  ;;  %v344_v49 = vmin.f32 %v280_v63, 0.0  ;;  %vm306_vm11 = vcmp.gt.f32.partialorder %v1031_v26, 0.0  ;;  %vm307_vm12 = vcmp.gt.f32.partialorder %v1036_v34, 0.0 }
  0x48   : > { %v659_v28 = vpop.eup %658  ;;  %vm308_vm13 = vcmp.gt.f32.partialorder %v1039_v31, 0.0  ;;  %vm309_vm14 = vcmp.gt.f32.partialorder %v1052_v50, 0.0  ;;  %vm310_vm15 = vcmp.gt.f32.partialorder %v1056_v52, 0.0  ;;  %vm311_vm0 = vcmp.gt.f32.partialorder %v1074_v62, 0.0 }
  0x49   : > { %v661_v2 = vpop.eup %660  ;;  %v593_v18 = vadd.f32 -1.0, %v659_v28  ;;  %676 = vpow2.f32 %v405_v0  ;;  %v407_v7 = vmul.f32 1.442695, %v344_v49  ;;  %vm312_vm2 = vcmp.gt.f32.partialorder %v280_v63, 0.0 }
  0x4a   : > { %v663_v44 = vpop.eup %662  ;;  %v594_v32 = vadd.f32 -1.0, %v661_v2 }
  0x4b   : > { %v665_v1 = vpop.eup %664  ;;  %v462_v4 = vsel %vm302_vm7, %v990_v29, %v593_v18  ;;  %v595_v6 = vadd.f32 -1.0, %v663_v44  ;;  %678 = vpow2.f32 %v407_v7 }
  0x4c   : > { %495 = vst.msk [vmem:[%s844_s24 + $0xa8] sm:$0xff] %vm473_vm1, %v462_v4  ;;  %v463_v8 = vsel %vm303_vm8, %v993_v3, %v594_v32  ;;  %v596_v21 = vadd.f32 -1.0, %v665_v1 }
  0x4d   : > { %496 = vst.msk [vmem:[%s844_s24 + $0xb0] sm:$0xff] %vm473_vm1, %v463_v8  ;;  %v464_v9 = vsel %vm304_vm9, %v998_v33, %v595_v6 }
  0x4e   : > { %497 = vst.msk [vmem:[%s844_s24 + $0xb8] sm:$0xff] %vm473_vm1, %v464_v9  ;;  %v465_v14 = vsel %vm305_vm10, %v1001_v5, %v596_v21  ;;  %v667_v29 = vpop.eup %666 }
  0x4f   : > { %498 = vst.msk [vmem:[%s844_s24 + $0xc0] sm:$0xff] %vm473_vm1, %v465_v14  ;;  %v669_v11 = vpop.eup %668  ;;  %v597_v3 = vadd.f32 -1.0, %v667_v29 }
  0x50   : > { %v671_v15 = vpop.eup %670  ;;  %v598_v19 = vadd.f32 -1.0, %v669_v11 }
  0x51   : > { %v466_v33 = vsel %vm306_vm11, %v1031_v26, %v597_v3  ;;  %v599_v20 = vadd.f32 -1.0, %v671_v15 }
  0x52   : > { %499 = vst.msk [vmem:[%s844_s24 + $0xc8] sm:$0xff] %vm473_vm1, %v466_v33  ;;  %v467_v5 = vsel %vm307_vm12, %v1036_v34, %v598_v19  ;;  %v673_v12 = vpop.eup %672 }
  0x53   : > { %500 = vst.msk [vmem:[%s844_s24 + $0xd0] sm:$0xff] %vm473_vm1, %v467_v5  ;;  %v468_v27 = vsel %vm308_vm13, %v1039_v31, %v599_v20  ;;  %v675_v23 = vpop.eup %674  ;;  %v600_v13 = vadd.f32 -1.0, %v673_v12 }
  0x54   : > { %501 = vst.msk [vmem:[%s844_s24 + $0xd8] sm:$0xff] %vm473_vm1, %v468_v27  ;;  %v601_v24 = vadd.f32 -1.0, %v675_v23 }
  0x55   : > { %v469_v25 = vsel %vm309_vm14, %v1052_v50, %v600_v13 }
  0x56   : > { %v677_v30 = vpop.eup %676  ;;  %502 = vst.msk [vmem:[%s844_s24 + $0xe0] sm:$0xff] %vm473_vm1, %v469_v25  ;;  %v470_v26 = vsel %vm310_vm15, %v1056_v52, %v601_v24 }
  0x57   : > { %503 = vst.msk [vmem:[%s844_s24 + $0xe8] sm:$0xff] %vm473_vm1, %v470_v26  ;;  %v602_v34 = vadd.f32 -1.0, %v677_v30 }
  0x58   : > { %v679_v31 = vpop.eup %678 }
  0x59   : > { %v471_v35 = vsel %vm311_vm0, %v1074_v62, %v602_v34  ;;  %v603_v41 = vadd.f32 -1.0, %v679_v31 }
  0x5a   : > { %504 = vst.msk [vmem:[%s844_s24 + $0xf0] sm:$0xff] %vm473_vm1, %v471_v35 }
  0x5b   : > { %v472_v55 = vsel %vm312_vm2, %v280_v63, %v603_v41 }
  0x5c   : > { %505 = vst.msk [vmem:[%s844_s24 + $0xf8] sm:$0xff] %vm473_vm1, %v472_v55 }
  0x5d PF: > { %s13_s12 = sadd.s32 1, %s686_s12  }
  0x5e   : > { %p10_p4 = scmp.ge.s32.totalorder %s13_s12, 4  }
  0x60   :  { %12 = sbr.rel (!%p10_p4) target bundleno = 1 (0x1), region = 62 }

// kernel: unet_module_forward.6
= control target key start
LH: loop header
LB: loop body
LE: loop exit
PB: predicated region body
PF: predicated region fallthrough
CT: control target
= control target key end

     0   :  { %s2832_s18 = smov 0   ;;  %s4261_s0 = inlined_call_operand.vmem [shape: f32[2,16,16,8], index: 0, kind: input, shape index: {}]   ;;  %s4262_s1 = inlined_call_operand.vmem [shape: f32[72,8], index: 1, kind: input, shape index: {}]   ;;  %s4263_s2 = inlined_call_operand.vmem [shape: f32[1,8], index: 2, kind: input, shape index: {}]   ;;  %s4264_s3 = inlined_call_operand.vmem [shape: f32[2,16,16,8], index: 3, kind: output, shape index: {0}]   ;;  %s4265_s4 = inlined_call_operand.vmem [shape: f32[2,1,8], index: 4, kind: output, shape index: {1}]   ;;  %s4266_s5 = inlined_call_operand.vmem [shape: f32[2,1,8], index: 5, kind: output, shape index: {2}]  }
   0x1 LB: > { %s2587_s19 = sadd.s32 4294967295, %s2791_s18   ;;  %p2591_p0 = scmp.ge.s32.totalorder %s2791_s18, 1  ;;  %s2791_s18 = sphi %s2832_s18, %s16_s18  }
   0x2   : > { %p192_p1 = scmp.lt.s32.totalorder %s2791_s18, 3 }
   0x4   : > { %p193_p2 = pnand %p2591_p0, %p192_p1 }
   0x6   : > { %196 = sbr.rel (%p193_p2) target bundleno = 888 (0x378), region = 32 }
   0xb   : > { %vm242_vm0 = vcmask 64512   ;;  %vm245_vm1 = vcmask 58368   ;;  %p2842_p3 = scmp.lt.s32.totalorder %s2587_s19, 1  ;;  %v2793_v0 = vmov 0.0   ;;  %s2794_s25 = smov 8   ;;  %vm1708_vm2 = vcmask 130048  }
   0xc   : > { %243 = vst.msk [vmem:[#allocation2] sm:$0xff] %vm242_vm0, %v2793_v0  ;;  %244 = vst.msk [vmem:[#allocation2 + $0x8] sm:$0xff] %vm242_vm0, %v2793_v0  ;;  %s2795_s26 = smov 16   ;;  %s2796_s27 = smov 24   ;;  %vm1741_vm3 = vcmask 195584   ;;  %vm1774_vm4 = vcmask 261120  }
   0xd   : > { %247 = vst.msk [vmem:[#allocation2 + $0x18] sm:$0xff] %vm242_vm0, %v2793_v0  ;;  %248 = vst.msk [vmem:[#allocation2 + $0x20] sm:$0xff] %vm242_vm0, %v2793_v0  ;;  %s4392_s19 = smov (!%p2842_p3, %s2587_s19), 1  ;;  %s2797_s11 = smov 32   ;;  %vm1807_vm5 = vcmask 326656   ;;  %vm1840_vm6 = vcmask 392192  }
   0xe   : > { %250 = vst.msk [vmem:[#allocation2 + $0x30] sm:$0xff] %vm242_vm0, %v2793_v0  ;;  %251 = vst.msk [vmem:[#allocation2 + $0x38] sm:$0xff] %vm242_vm0, %v2793_v0  ;;  %s2631_s21 = sshll.u32 %s4392_s19, 8  ;;  %s2798_s16 = smov 40   ;;  %vm1873_vm7 = vcmask 457728   ;;  %vm1906_vm8 = vcmask 523264  }
   0xf   : > { %253 = vst.msk [vmem:[#allocation2 + $0x48] sm:$0xff] %vm242_vm0, %v2793_v0  ;;  %254 = vst.msk [vmem:[#allocation2 + $0x50] sm:$0xff] %vm242_vm0, %v2793_v0  ;;  %s2912_s24 = scalar_lea.vmem %s4261_s0, %s2631_s21  ;;  %s2800_s29 = smov 56   ;;  %vm1955_vm9 = vcmask 588800   ;;  %vm2378_vm10 = vcmask 57344  }
  0x10   : > { %256 = vst.msk [vmem:[#allocation2 + $0x60] sm:$0xff] %vm242_vm0, %v2793_v0  ;;  %257 = vst.msk [vmem:[#allocation2 + $0x68] sm:$0xff] %vm242_vm0, %v2793_v0  ;;  %v298_v1 = vld [vmem:[%s2912_s24] sm:$0xff]  ;;  %v300_v2 = vld [vmem:[%s2912_s24 + $0x10] sm:$0xff]  ;;  %s2801_s30 = smov 64   ;;  %s3936_s8 = scalar_lea.vmem %s4264_s3, %s2631_s21 }
  0x11   : > { %259 = vst.msk [vmem:[#allocation2 + $0x78] sm:$0xff] %vm242_vm0, %v2793_v0  ;;  %260 = vst.msk [vmem:[#allocation2 + $0x80] sm:$0xff] %vm242_vm0, %v2793_v0  ;;  %v299_v3 = vld [vmem:[%s2912_s24 + $0x8] sm:$0xff]  ;;  %v302_v4 = vld [vmem:[%s2912_s24 + $0x20] sm:$0xff]  ;;  %s238_s10 = scalar_lea.vmem %s4265_s4, %s4392_s19  ;;  %s241_s13 = scalar_lea.vmem %s4266_s5, %s4392_s19 }
  0x12   : > { %262 = vst.msk [vmem:[#allocation2 + $0x90] sm:$0xff] %vm242_vm0, %v2793_v0  ;;  %263 = vst.msk [vmem:[#allocation2 + $0x98] sm:$0xff] %vm242_vm0, %v2793_v0  ;;  %v301_v5 = vld [vmem:[%s2912_s24 + $0x18] sm:$0xff]  ;;  %v304_v6 = vld [vmem:[%s2912_s24 + $0x30] sm:$0xff] }
  0x13   : > { %265 = vst.msk [vmem:[#allocation2 + $0xa8] sm:$0xff] %vm242_vm0, %v2793_v0  ;;  %266 = vst.msk [vmem:[#allocation2 + $0xb0] sm:$0xff] %vm242_vm0, %v2793_v0  ;;  %v395_v7 = vld [vmem:[#allocation2 + $0x1] sm:$0xff]  ;;  %v305_v11 = vld [vmem:[%s2912_s24 + $0x38] sm:$0xff] }
  0x14   : > { %268 = vst.msk [vmem:[#allocation2 + $0xc0] sm:$0xff] %vm242_vm0, %v2793_v0  ;;  %269 = vst.msk [vmem:[#allocation2 + $0xc8] sm:$0xff] %vm242_vm0, %v2793_v0  ;;  %v303_v9 = vld [vmem:[%s2912_s24 + $0x28] sm:$0xff]  ;;  %684 = vrot.lane.b32.xlu0 %v395_v7, %s2794_s25  ;;  %v306_v10 = vld [vmem:[%s2912_s24 + $0x40] sm:$0xff] }
  0x15   : > { %271 = vst.msk [vmem:[#allocation2 + $0xd8] sm:$0xff] %vm242_vm0, %v2793_v0  ;;  %272 = vst.msk [vmem:[#allocation2 + $0xe0] sm:$0xff] %vm242_vm0, %v2793_v0  ;;  %v308_v12 = vld [vmem:[%s2912_s24 + $0x50] sm:$0xff]  ;;  %v307_v13 = vld [vmem:[%s2912_s24 + $0x48] sm:$0xff] }
  0x16   : > { %274 = vst.msk [vmem:[#allocation2 + $0xf0] sm:$0xff] %vm242_vm0, %v2793_v0  ;;  %275 = vst.msk [vmem:[#allocation2 + $0xf8] sm:$0xff] %vm242_vm0, %v2793_v0  ;;  %v310_v14 = vld [vmem:[%s2912_s24 + $0x60] sm:$0xff]  ;;  %v309_v15 = vld [vmem:[%s2912_s24 + $0x58] sm:$0xff] }
  0x17   : > { %277 = vst.msk [vmem:[#allocation2 + $0x108] sm:$0xff] %vm242_vm0, %v2793_v0  ;;  %278 = vst.msk [vmem:[#allocation2 + $0x110] sm:$0xff] %vm242_vm0, %v2793_v0  ;;  %v312_v16 = vld [vmem:[%s2912_s24 + $0x70] sm:$0xff]  ;;  %v311_v17 = vld [vmem:[%s2912_s24 + $0x68] sm:$0xff] }
  0x18   : > { %280 = vst.msk [vmem:[#allocation2 + $0x120] sm:$0xff] %vm242_vm0, %v2793_v0  ;;  %281 = vst.msk [vmem:[#allocation2 + $0x128] sm:$0xff] %vm242_vm0, %v2793_v0  ;;  %v314_v18 = vld [vmem:[%s2912_s24 + $0x80] sm:$0xff]  ;;  %v313_v19 = vld [vmem:[%s2912_s24 + $0x78] sm:$0xff] }
  0x19   : > { %283 = vst.msk [vmem:[#allocation2 + $0x138] sm:$0xff] %vm242_vm0, %v2793_v0  ;;  %284 = vst.msk [vmem:[#allocation2 + $0x140] sm:$0xff] %vm242_vm0, %v2793_v0  ;;  %v316_v20 = vld [vmem:[%s2912_s24 + $0x90] sm:$0xff]  ;;  %v315_v21 = vld [vmem:[%s2912_s24 + $0x88] sm:$0xff] }
  0x1a   : > { %286 = vst.msk [vmem:[#allocation2 + $0x150] sm:$0xff] %vm242_vm0, %v2793_v0  ;;  %287 = vst.msk [vmem:[#allocation2 + $0x158] sm:$0xff] %vm242_vm0, %v2793_v0  ;;  %v318_v22 = vld [vmem:[%s2912_s24 + $0xa0] sm:$0xff]  ;;  %v317_v23 = vld [vmem:[%s2912_s24 + $0x98] sm:$0xff] }
  0x1b   : > { %289 = vst.msk [vmem:[#allocation2 + $0x168] sm:$0xff] %vm242_vm0, %v2793_v0  ;;  %290 = vst.msk [vmem:[#allocation2 + $0x170] sm:$0xff] %vm242_vm0, %v2793_v0  ;;  %v320_v24 = vld [vmem:[%s2912_s24 + $0xb0] sm:$0xff]  ;;  %v319_v28 = vld [vmem:[%s2912_s24 + $0xa8] sm:$0xff] }
  0x1c   : > { %292 = vst.msk [vmem:[#allocation2 + $0x180] sm:$0xff] %vm242_vm0, %v2793_v0  ;;  %293 = vst.msk [vmem:[#allocation2 + $0x188] sm:$0xff] %vm242_vm0, %v2793_v0  ;;  %v322_v29 = vld [vmem:[%s2912_s24 + $0xc0] sm:$0xff]  ;;  %v321_v33 = vld [vmem:[%s2912_s24 + $0xb8] sm:$0xff] }
  0x1d   : > { %295 = vst.msk [vmem:[#allocation2 + $0x198] sm:$0xff] %vm242_vm0, %v2793_v0  ;;  %296 = vst.msk [vmem:[#allocation2 + $0x1a0] sm:$0xff] %vm242_vm0, %v2793_v0  ;;  %v324_v34 = vld [vmem:[%s2912_s24 + $0xd0] sm:$0xff]  ;;  %v323_v35 = vld [vmem:[%s2912_s24 + $0xc8] sm:$0xff] }
  0x1e   : > { %246 = vst.msk [vmem:[#allocation2 + $0x10] sm:$0x3] %vm245_vm1, %v2793_v0  ;;  %249 = vst.msk [vmem:[#allocation2 + $0x28] sm:$0x3] %vm245_vm1, %v2793_v0  ;;  %v326_v36 = vld [vmem:[%s2912_s24 + $0xe0] sm:$0xff]  ;;  %v325_v37 = vld [vmem:[%s2912_s24 + $0xd8] sm:$0xff] }
  0x1f   : > { %252 = vst.msk [vmem:[#allocation2 + $0x40] sm:$0x3] %vm245_vm1, %v2793_v0  ;;  %255 = vst.msk [vmem:[#allocation2 + $0x58] sm:$0x3] %vm245_vm1, %v2793_v0  ;;  %v327_v39 = vld [vmem:[%s2912_s24 + $0xe8] sm:$0xff] }
  0x20   : > { %258 = vst.msk [vmem:[#allocation2 + $0x70] sm:$0x3] %vm245_vm1, %v2793_v0  ;;  %261 = vst.msk [vmem:[#allocation2 + $0x88] sm:$0x3] %vm245_vm1, %v2793_v0  ;;  %v427_v62 = vld [vmem:[#allocation2 + $0x2] sm:$0xff] }
  0x21   : > { %264 = vst.msk [vmem:[#allocation2 + $0xa0] sm:$0x3] %vm245_vm1, %v2793_v0  ;;  %267 = vst.msk [vmem:[#allocation2 + $0xb8] sm:$0x3] %vm245_vm1, %v2793_v0 }
  0x22   : > { %270 = vst.msk [vmem:[#allocation2 + $0xd0] sm:$0x3] %vm245_vm1, %v2793_v0  ;;  %273 = vst.msk [vmem:[#allocation2 + $0xe8] sm:$0x3] %vm245_vm1, %v2793_v0 }
  0x23   : > { %276 = vst.msk [vmem:[#allocation2 + $0x100] sm:$0x3] %vm245_vm1, %v2793_v0  ;;  %279 = vst.msk [vmem:[#allocation2 + $0x118] sm:$0x3] %vm245_vm1, %v2793_v0 }
  0x24   : > { %282 = vst.msk [vmem:[#allocation2 + $0x130] sm:$0x3] %vm245_vm1, %v2793_v0  ;;  %285 = vst.msk [vmem:[#allocation2 + $0x148] sm:$0x3] %vm245_vm1, %v2793_v0 }
  0x25   : > { %288 = vst.msk [vmem:[#allocation2 + $0x160] sm:$0x3] %vm245_vm1, %v2793_v0  ;;  %291 = vst.msk [vmem:[#allocation2 + $0x178] sm:$0x3] %vm245_vm1, %v2793_v0  ;;  %v396_v8 = vld [vmem:[#allocation2 + $0x9] sm:$0xff] }
  0x26   : > { %294 = vst.msk [vmem:[#allocation2 + $0x190] sm:$0x3] %vm245_vm1, %v2793_v0  ;;  %297 = vst.msk [vmem:[#allocation2 + $0x1a8] sm:$0x3] %vm245_vm1, %v2793_v0  ;;  %686 = vrot.lane.b32.xlu0 %v396_v8, %s2794_s25 }
  0x27   : > { %331 = vst.msk [vmem:[#allocation2 + $0x19] sm:$0xff] %vm242_vm0, %v298_v1  ;;  %333 = vst.msk [vmem:[#allocation2 + $0x31] sm:$0xff] %vm242_vm0, %v300_v2  ;;  %v428_v1 = vld [vmem:[#allocation2 + $0xa] sm:$0xff] }
  0x28   : > { %332 = vst.msk [vmem:[#allocation2 + $0x21] sm:$0xff] %vm242_vm0, %v299_v3  ;;  %335 = vst.msk [vmem:[#allocation2 + $0x49] sm:$0xff] %vm242_vm0, %v302_v4 }
  0x29   : > { %334 = vst.msk [vmem:[#allocation2 + $0x39] sm:$0xff] %vm242_vm0, %v301_v5  ;;  %337 = vst.msk [vmem:[#allocation2 + $0x61] sm:$0xff] %vm242_vm0, %v304_v6 }
  0x2a   : > { %336 = vst.msk [vmem:[#allocation2 + $0x51] sm:$0xff] %vm242_vm0, %v303_v9  ;;  %339 = vst.msk [vmem:[#allocation2 + $0x79] sm:$0xff] %vm242_vm0, %v306_v10 }
  0x2b   : > { %338 = vst.msk [vmem:[#allocation2 + $0x69] sm:$0xff] %vm242_vm0, %v305_v11  ;;  %341 = vst.msk [vmem:[#allocation2 + $0x91] sm:$0xff] %vm242_vm0, %v308_v12 }
  0x2c   : > { %340 = vst.msk [vmem:[#allocation2 + $0x81] sm:$0xff] %vm242_vm0, %v307_v13  ;;  %343 = vst.msk [vmem:[#allocation2 + $0xa9] sm:$0xff] %vm242_vm0, %v310_v14 }
  0x2d   : > { %342 = vst.msk [vmem:[#allocation2 + $0x99] sm:$0xff] %vm242_vm0, %v309_v15  ;;  %345 = vst.msk [vmem:[#allocation2 + $0xc1] sm:$0xff] %vm242_vm0, %v312_v16 }
  0x2e   : > { %344 = vst.msk [vmem:[#allocation2 + $0xb1] sm:$0xff] %vm242_vm0, %v311_v17  ;;  %347 = vst.msk [vmem:[#allocation2 + $0xd9] sm:$0xff] %vm242_vm0, %v314_v18  ;;  %v2957_v25 = vld [vmem:[#allocation2 + $0x19] sm:$0xff]  ;;  %v2959_v26 = vld [vmem:[#allocation2 + $0x31] sm:$0xff] }
  0x2f   : > { %346 = vst.msk [vmem:[#allocation2 + $0xc9] sm:$0xff] %vm242_vm0, %v313_v19  ;;  %349 = vst.msk [vmem:[#allocation2 + $0xf1] sm:$0xff] %vm242_vm0, %v316_v20  ;;  %688 = vrot.lane.b32.xlu1 %v2957_v25, %s2794_s25  ;;  %v2966_v27 = vld [vmem:[#allocation2 + $0x21] sm:$0xff]  ;;  %692 = vrot.lane.b32.xlu0 %v2959_v26, %s2794_s25  ;;  %v2974_v30 = vld [vmem:[#allocation2 + $0x49] sm:$0xff] }
  0x30   : > { %348 = vst.msk [vmem:[#allocation2 + $0xe1] sm:$0xff] %vm242_vm0, %v315_v21  ;;  %351 = vst.msk [vmem:[#allocation2 + $0x109] sm:$0xff] %vm242_vm0, %v318_v22  ;;  %v2978_v31 = vld [vmem:[#allocation2 + $0x39] sm:$0xff]  ;;  %v2982_v32 = vld [vmem:[#allocation2 + $0x61] sm:$0xff] }
  0x31   : > { %350 = vst.msk [vmem:[#allocation2 + $0xf9] sm:$0xff] %vm242_vm0, %v317_v23  ;;  %353 = vst.msk [vmem:[#allocation2 + $0x121] sm:$0xff] %vm242_vm0, %v320_v24  ;;  %v2994_v38 = vld [vmem:[#allocation2 + $0x51] sm:$0xff]  ;;  %v3002_v40 = vld [vmem:[#allocation2 + $0x79] sm:$0xff] }
  0x32   : > { %352 = vst.msk [vmem:[#allocation2 + $0x111] sm:$0xff] %vm242_vm0, %v319_v28  ;;  %355 = vst.msk [vmem:[#allocation2 + $0x139] sm:$0xff] %vm242_vm0, %v322_v29  ;;  %v3006_v41 = vld [vmem:[#allocation2 + $0x69] sm:$0xff]  ;;  %v3010_v42 = vld [vmem:[#allocation2 + $0x91] sm:$0xff] }
  0x33   : > { %690 = vrot.lane.b32.xlu1 %v2966_v27, %s2794_s25  ;;  %696 = vrot.lane.b32.xlu0 %v2974_v30, %s2794_s25  ;;  %354 = vst.msk [vmem:[#allocation2 + $0x129] sm:$0xff] %vm242_vm0, %v321_v33  ;;  %357 = vst.msk [vmem:[#allocation2 + $0x151] sm:$0xff] %vm242_vm0, %v324_v34  ;;  %v3014_v43 = vld [vmem:[#allocation2 + $0x81] sm:$0xff]  ;;  %v3018_v44 = vld [vmem:[#allocation2 + $0xa9] sm:$0xff] }
  0x34   : > { %356 = vst.msk [vmem:[#allocation2 + $0x141] sm:$0xff] %vm242_vm0, %v323_v35  ;;  %359 = vst.msk [vmem:[#allocation2 + $0x169] sm:$0xff] %vm242_vm0, %v326_v36  ;;  %v3022_v45 = vld [vmem:[#allocation2 + $0x99] sm:$0xff]  ;;  %v411_v46 = vld [vmem:[#allocation2 + $0xc1] sm:$0xff] }
  0x35   : > { %358 = vst.msk [vmem:[#allocation2 + $0x159] sm:$0xff] %vm242_vm0, %v325_v37  ;;  %360 = vst.msk [vmem:[#allocation2 + $0x171] sm:$0xff] %vm242_vm0, %v327_v39  ;;  %v3028_v47 = vld [vmem:[#allocation2 + $0xb1] sm:$0xff]  ;;  %v413_v48 = vld [vmem:[#allocation2 + $0xd9] sm:$0xff] }
  0x36   : > { %v412_v49 = vld [vmem:[#allocation2 + $0xc9] sm:$0xff]  ;;  %v415_v50 = vld [vmem:[#allocation2 + $0xf1] sm:$0xff]  ;;  %v3048_v0 = vld [vmem:[#allocation2 + $0x1a] sm:$0xff] }
  0x37   : > { %694 = vrot.lane.b32.xlu1 %v2978_v31, %s2794_s25  ;;  %700 = vrot.lane.b32.xlu0 %v2982_v32, %s2794_s25  ;;  %v414_v51 = vld [vmem:[#allocation2 + $0xe1] sm:$0xff]  ;;  %v417_v52 = vld [vmem:[#allocation2 + $0x109] sm:$0xff]  ;;  %v3053_v2 = vld [vmem:[#allocation2 + $0x32] sm:$0xff] }
  0x38   : > { %v416_v53 = vld [vmem:[#allocation2 + $0xf9] sm:$0xff]  ;;  %v419_v54 = vld [vmem:[#allocation2 + $0x121] sm:$0xff]  ;;  %v3060_v4 = vld [vmem:[#allocation2 + $0x4a] sm:$0xff] }
  0x39   : > { %v418_v55 = vld [vmem:[#allocation2 + $0x111] sm:$0xff]  ;;  %v421_v56 = vld [vmem:[#allocation2 + $0x139] sm:$0xff]  ;;  %v3056_v3 = vld [vmem:[#allocation2 + $0x22] sm:$0xff] }
  0x3a   : > { %v420_v57 = vld [vmem:[#allocation2 + $0x129] sm:$0xff]  ;;  %v423_v58 = vld [vmem:[#allocation2 + $0x151] sm:$0xff]  ;;  %v3064_v5 = vld [vmem:[#allocation2 + $0x3a] sm:$0xff] }
  0x3b   : > { %698 = vrot.lane.b32.xlu1 %v2994_v38, %s2794_s25  ;;  %704 = vrot.lane.b32.xlu0 %v3002_v40, %s2794_s25  ;;  %v422_v59 = vld [vmem:[#allocation2 + $0x141] sm:$0xff]  ;;  %v425_v60 = vld [vmem:[#allocation2 + $0x169] sm:$0xff]  ;;  %v3072_v7 = vld [vmem:[#allocation2 + $0x52] sm:$0xff] }
  0x3c   : > { %v424_v61 = vld [vmem:[#allocation2 + $0x159] sm:$0xff]  ;;  %v426_v63 = vld [vmem:[#allocation2 + $0x171] sm:$0xff]  ;;  %v3068_v6 = vld [vmem:[#allocation2 + $0x62] sm:$0xff] }
  0x3d   : > { %v3076_v8 = vld [vmem:[#allocation2 + $0x7a] sm:$0xff]  ;;  %v3080_v9 = vld [vmem:[#allocation2 + $0x6a] sm:$0xff]  ;;  %v3084_v10 = vld [vmem:[#allocation2 + $0x92] sm:$0xff] }
  0x3e   : > { %v3088_v11 = vld [vmem:[#allocation2 + $0x82] sm:$0xff]  ;;  %v3092_v12 = vld [vmem:[#allocation2 + $0xaa] sm:$0xff]  ;;  %v3096_v13 = vld [vmem:[#allocation2 + $0x9a] sm:$0xff] }
  0x3f   : > { %702 = vrot.lane.b32.xlu1 %v3006_v41, %s2794_s25  ;;  %708 = vrot.lane.b32.xlu0 %v3010_v42, %s2794_s25  ;;  %v3100_v14 = vld [vmem:[#allocation2 + $0xc2] sm:$0xff]  ;;  %v3104_v15 = vld [vmem:[#allocation2 + $0xb2] sm:$0xff]  ;;  %v445_v16 = vld [vmem:[#allocation2 + $0xda] sm:$0xff] }
  0x40   : > { %v3110_v17 = vld [vmem:[#allocation2 + $0xca] sm:$0xff]  ;;  %v447_v18 = vld [vmem:[#allocation2 + $0xf2] sm:$0xff]  ;;  %v446_v19 = vld [vmem:[#allocation2 + $0xe2] sm:$0xff] }
  0x41   : > { %v449_v20 = vld [vmem:[#allocation2 + $0x10a] sm:$0xff]  ;;  %v448_v21 = vld [vmem:[#allocation2 + $0xfa] sm:$0xff]  ;;  %v451_v22 = vld [vmem:[#allocation2 + $0x122] sm:$0xff] }
  0x42   : > { %v450_v23 = vld [vmem:[#allocation2 + $0x112] sm:$0xff]  ;;  %v453_v24 = vld [vmem:[#allocation2 + $0x13a] sm:$0xff]  ;;  %v452_v29 = vld [vmem:[#allocation2 + $0x12a] sm:$0xff] }
  0x43   : > { %706 = vrot.lane.b32.xlu1 %v3014_v43, %s2794_s25  ;;  %712 = vrot.lane.b32.xlu0 %v3018_v44, %s2794_s25  ;;  %v455_v33 = vld [vmem:[#allocation2 + $0x152] sm:$0xff]  ;;  %v454_v35 = vld [vmem:[#allocation2 + $0x142] sm:$0xff]  ;;  %v457_v37 = vld [vmem:[#allocation2 + $0x16a] sm:$0xff] }
  0x47   : > { %710 = vrot.lane.b32.xlu1 %v3022_v45, %s2794_s25  ;;  %716 = vrot.lane.b32.xlu0 %v411_v46, %s2794_s25  ;;  %v456_v46 = vld [vmem:[#allocation2 + $0x15a] sm:$0xff] }
  0x4b   : > { %714 = vrot.lane.b32.xlu1 %v3028_v47, %s2794_s25  ;;  %720 = vrot.lane.b32.xlu0 %v413_v48, %s2794_s25 }
  0x4f   : > { %718 = vrot.lane.b32.xlu1 %v412_v49, %s2794_s25  ;;  %724 = vrot.lane.b32.xlu0 %v415_v50, %s2794_s25  ;;  %v3139_v50 = vld [vmem:[#allocation2 + $0x18] sm:$0xff] }
  0x53   : > { %722 = vrot.lane.b32.xlu1 %v414_v51, %s2794_s25  ;;  %728 = vrot.lane.b32.xlu0 %v417_v52, %s2794_s25  ;;  %v458_v51 = vld [vmem:[#allocation2 + $0x172] sm:$0xff] }
  0x57   : > { %726 = vrot.lane.b32.xlu1 %v416_v53, %s2794_s25  ;;  %732 = vrot.lane.b32.xlu0 %v419_v54, %s2794_s25  ;;  %v3148_v54 = vld [vmem:[#allocation2 + $0x30] sm:$0xff] }
  0x5b   : > { %730 = vrot.lane.b32.xlu1 %v418_v55, %s2794_s25  ;;  %736 = vrot.lane.b32.xlu0 %v421_v56, %s2794_s25  ;;  %v3154_v56 = vld [vmem:[#allocation2 + $0x20] sm:$0xff] }
  0x5f   : > { %734 = vrot.lane.b32.xlu1 %v420_v57, %s2794_s25  ;;  %740 = vrot.lane.b32.xlu0 %v423_v58, %s2794_s25  ;;  %v3160_v58 = vld [vmem:[#allocation2 + $0x48] sm:$0xff] }
  0x63   : > { %738 = vrot.lane.b32.xlu1 %v422_v59, %s2794_s25  ;;  %744 = vrot.lane.b32.xlu0 %v425_v60, %s2794_s25  ;;  %v3166_v60 = vld [vmem:[#allocation2 + $0x38] sm:$0xff] }
  0x67   : > { %742 = vrot.lane.b32.xlu1 %v424_v61, %s2794_s25  ;;  %812 = vrot.lane.b32.xlu0 %v427_v62, %s2795_s26  ;;  %v3172_v62 = vld [vmem:[#allocation2 + $0x60] sm:$0xff] }
  0x6b   : > { %746 = vrot.lane.b32.xlu1 %v426_v63, %s2794_s25  ;;  %816 = vrot.lane.b32.xlu0 %v3048_v0, %s2795_s26  ;;  %s2799_s25 = smov 48  }
  0x6f   : > { %814 = vrot.lane.b32.xlu1 %v428_v1, %s2795_s26  ;;  %820 = vrot.lane.b32.xlu0 %v3053_v2, %s2795_s26  ;;  %v3178_v1 = vld [vmem:[#allocation2 + $0x50] sm:$0xff] }
  0x73   : > { %818 = vrot.lane.b32.xlu1 %v3056_v3, %s2795_s26  ;;  %824 = vrot.lane.b32.xlu0 %v3060_v4, %s2795_s26 }
  0x77   : > { %822 = vrot.lane.b32.xlu1 %v3064_v5, %s2795_s26  ;;  %828 = vrot.lane.b32.xlu0 %v3068_v6, %s2795_s26 }
  0x7b   : > { %826 = vrot.lane.b32.xlu1 %v3072_v7, %s2795_s26  ;;  %832 = vrot.lane.b32.xlu0 %v3076_v8, %s2795_s26 }
  0x7f   : > { %830 = vrot.lane.b32.xlu1 %v3080_v9, %s2795_s26  ;;  %836 = vrot.lane.b32.xlu0 %v3084_v10, %s2795_s26 }
  0x83   : > { %834 = vrot.lane.b32.xlu1 %v3088_v11, %s2795_s26  ;;  %840 = vrot.lane.b32.xlu0 %v3092_v12, %s2795_s26 }
  0x86   : > { %v3120_v28 = vpop.permute.xlu0 %684 }
  0x87   : > { %838 = vrot.lane.b32.xlu1 %v3096_v13, %s2795_s26  ;;  %844 = vrot.lane.b32.xlu0 %v3100_v14, %s2795_s26 }
  0x8b   : > { %842 = vrot.lane.b32.xlu1 %v3104_v15, %s2795_s26  ;;  %848 = vrot.lane.b32.xlu0 %v445_v16, %s2795_s26 }
  0x8f   : > { %846 = vrot.lane.b32.xlu1 %v3110_v17, %s2795_s26  ;;  %852 = vrot.lane.b32.xlu0 %v447_v18, %s2795_s26  ;;  %v3184_v18 = vld [vmem:[#allocation2 + $0x78] sm:$0xff] }
  0x93   : > { %850 = vrot.lane.b32.xlu1 %v446_v19, %s2795_s26  ;;  %856 = vrot.lane.b32.xlu0 %v449_v20, %s2795_s26  ;;  %v3190_v20 = vld [vmem:[#allocation2 + $0x68] sm:$0xff] }
  0x97   : > { %854 = vrot.lane.b32.xlu1 %v448_v21, %s2795_s26  ;;  %860 = vrot.lane.b32.xlu0 %v451_v22, %s2795_s26  ;;  %v3196_v22 = vld [vmem:[#allocation2 + $0x90] sm:$0xff] }
  0x98   : > { %v3124_v34 = vpop.permute.xlu0 %686 }
  0x9b   : > { %858 = vrot.lane.b32.xlu1 %v450_v23, %s2795_s26  ;;  %864 = vrot.lane.b32.xlu0 %v453_v24, %s2795_s26  ;;  %v3202_v24 = vld [vmem:[#allocation2 + $0x80] sm:$0xff] }
  0x9f   : > { %862 = vrot.lane.b32.xlu1 %v452_v29, %s2795_s26  ;;  %868 = vrot.lane.b32.xlu0 %v455_v33, %s2795_s26  ;;  %v3208_v33 = vld [vmem:[#allocation2 + $0xa8] sm:$0xff] }
  0xa1   : > { %v3128_v36 = vpop.permute.xlu1 %688  ;;  %v3130_v39 = vpop.permute.xlu0 %692 }
  0xa3   : > { %866 = vrot.lane.b32.xlu1 %v454_v35, %s2795_s26  ;;  %872 = vrot.lane.b32.xlu0 %v457_v37, %s2795_s26  ;;  %v3214_v37 = vld [vmem:[#allocation2 + $0x98] sm:$0xff] }
  0xa4   : > { %4283 = vst [vmem:[#allocation15_spill] sm:$0xff] %v3214_v37 }
  0xa5   : > { %v3134_v48 = vpop.permute.xlu1 %690  ;;  %v3136_v49 = vpop.permute.xlu0 %696 }
  0xa7   : > { %870 = vrot.lane.b32.xlu1 %v456_v46, %s2795_s26  ;;  %940 = vrot.lane.b32.xlu0 %v3139_v50, %s2796_s27 }
  0xa9   : > { %v3143_v52 = vpop.permute.xlu1 %694  ;;  %v3145_v53 = vpop.permute.xlu0 %700 }
  0xaa   : > { %4271 = vst [vmem:[#allocation3_spill] sm:$0xff] %v3145_v53 }
  0xab   : > { %874 = vrot.lane.b32.xlu1 %v458_v51, %s2795_s26  ;;  %944 = vrot.lane.b32.xlu0 %v3148_v54, %s2796_s27  ;;  %v3220_v51 = vld [vmem:[#allocation2 + $0xc0] sm:$0xff] }
  0xad   : > { %v3152_v55 = vpop.permute.xlu1 %698  ;;  %v3156_v57 = vpop.permute.xlu0 %704 }
  0xae   : > { %4272 = vst [vmem:[#allocation4_spill] sm:$0xff] %v3152_v55  ;;  %4273 = vst [vmem:[#allocation5_spill] sm:$0xff] %v3156_v57  ;;  %v1946_v57 = vld [vmem:[%s4262_s1 + $0x38] sm:$0xff] }
  0xaf   : > { %942 = vrot.lane.b32.xlu1 %v3154_v56, %s2796_s27  ;;  %948 = vrot.lane.b32.xlu0 %v3160_v58, %s2796_s27 }
  0xb1   : > { %v3164_v59 = vpop.permute.xlu1 %702  ;;  %v3168_v61 = vpop.permute.xlu0 %708 }
  0xb2   : > { %4274 = vst [vmem:[#allocation6_spill] sm:$0xff] %v3164_v59  ;;  %4275 = vst [vmem:[#allocation7_spill] sm:$0xff] %v3168_v61  ;;  %v3250_v61 = vld [vmem:[#allocation2 + $0xe0] sm:$0xff]  ;;  %v3268_v59 = vld [vmem:[#allocation2 + $0xf8] sm:$0xff] }
  0xb3   : > { %946 = vrot.lane.b32.xlu1 %v3166_v60, %s2796_s27  ;;  %952 = vrot.lane.b32.xlu0 %v3172_v62, %s2796_s27 }
  0xb5   : > { %v3176_v63 = vpop.permute.xlu1 %706  ;;  %v3180_v16 = vpop.permute.xlu0 %712 }
  0xb6   : > { %4276 = vst [vmem:[#allocation8_spill] sm:$0xff] %v3176_v63  ;;  %4277 = vst [vmem:[#allocation9_spill] sm:$0xff] %v3180_v16  ;;  %v3238_v16 = vld [vmem:[#allocation2 + $0xc8] sm:$0xff] }
  0xb7   : > { %950 = vrot.lane.b32.xlu1 %v3178_v1, %s2796_s27  ;;  %956 = vrot.lane.b32.xlu0 %v3184_v18, %s2796_s27 }
  0xb9   : > { %v3188_v19 = vpop.permute.xlu1 %710  ;;  %v3192_v21 = vpop.permute.xlu0 %716 }
  0xba   : > { %4278 = vst [vmem:[#allocation10_spill] sm:$0xff] %v3188_v19  ;;  %4279 = vst [vmem:[#allocation11_spill] sm:$0xff] %v3192_v21  ;;  %v3226_v21 = vld [vmem:[#allocation2 + $0xb0] sm:$0xff] }
  0xbb   : > { %954 = vrot.lane.b32.xlu1 %v3190_v20, %s2796_s27  ;;  %960 = vrot.lane.b32.xlu0 %v3196_v22, %s2796_s27 }
  0xbd   : > { %v3200_v23 = vpop.permute.xlu1 %714  ;;  %v3204_v29 = vpop.permute.xlu0 %720 }
  0xbe   : > { %4280 = vst [vmem:[#allocation12_spill] sm:$0xff] %v3200_v23  ;;  %4281 = vst [vmem:[#allocation13_spill] sm:$0xff] %v3204_v29 }
  0xbf   : > { %958 = vrot.lane.b32.xlu1 %v3202_v24, %s2796_s27  ;;  %964 = vrot.lane.b32.xlu0 %v3208_v33, %s2796_s27 }
  0xc1   : > { %v3212_v35 = vpop.permute.xlu1 %718  ;;  %v3216_v46 = vpop.permute.xlu0 %724 }
  0xc2   : > { %4282 = vst [vmem:[#allocation14_spill] sm:$0xff] %v3212_v35  ;;  %4284 = vst [vmem:[#allocation16_spill] sm:$0xff] %v3216_v46  ;;  %v3232_v35 = vld [vmem:[#allocation2 + $0xd8] sm:$0xff] }
  0xc3   : > { %962 = vrot.lane.b32.xlu1 %v3214_v37, %s2796_s27  ;;  %968 = vrot.lane.b32.xlu0 %v3220_v51, %s2796_s27 }
  0xc5   : > { %v3224_v29 = vpop.permute.xlu1 %722  ;;  %v3228_v23 = vpop.permute.xlu0 %728 }
  0xc6   : > { %4285 = vst [vmem:[#allocation17_spill] sm:$0xff] %v3224_v29  ;;  %4286 = vst [vmem:[#allocation18_spill] sm:$0xff] %v3228_v23  ;;  %v3244_v29 = vld [vmem:[#allocation2 + $0xf0] sm:$0xff] }
  0xc7   : > { %966 = vrot.lane.b32.xlu1 %v3226_v21, %s2796_s27  ;;  %972 = vrot.lane.b32.xlu0 %v3232_v35, %s2796_s27 }
  0xc9   : > { %v3236_v46 = vpop.permute.xlu1 %726  ;;  %v3240_v19 = vpop.permute.xlu0 %732 }
  0xca   : > { %4287 = vst [vmem:[#allocation19_spill] sm:$0xff] %v3236_v46  ;;  %4288 = vst [vmem:[#allocation20_spill] sm:$0xff] %v3240_v19  ;;  %v1947_v46 = vld [vmem:[%s4262_s1 + $0x40] sm:$0xff]  ;;  %v3259_v19 = vld [vmem:[#allocation2 + $0x108] sm:$0xff] }
  0xcb   : > { %970 = vrot.lane.b32.xlu1 %v3238_v16, %s2796_s27  ;;  %976 = vrot.lane.b32.xlu0 %v3244_v29, %s2796_s27  ;;  %4291 = vst [vmem:[#allocation23_spill] sm:$0xff] %v3259_v19 }
  0xcc   : > { %2674 = vmatprep.subr.mxu0 %v1947_v46  ;;  %2740 = vmatprep.subr.mxu1 %v1947_v46 }
  0xcd   : > { %v3248_v23 = vpop.permute.xlu1 %730  ;;  %v3255_v63 = vpop.permute.xlu0 %736  ;;  %2675 = vmatpush3.msra.mxu0 %v1947_v46  ;;  %2749 = vmatpush3.msra.mxu1 %v1947_v46  ;;  %v3284_v46 = vld [vmem:[#allocation2 + $0x110] sm:$0xff] }
  0xce   : > { %4289 = vst [vmem:[#allocation21_spill] sm:$0xff] %v3248_v23  ;;  %4290 = vst [vmem:[#allocation22_spill] sm:$0xff] %v3255_v63  ;;  %2676 = vmatprep.subr.mxu0 %v1946_v57  ;;  %v1945_v63 = vld [vmem:[%s4262_s1 + $0x30] sm:$0xff]  ;;  %2741 = vmatprep.subr.mxu1 %v1946_v57 }
  0xcf   : > { %974 = vrot.lane.b32.xlu1 %v3250_v61, %s2796_s27  ;;  %980 = vrot.lane.b32.xlu0 %v3259_v19, %s2796_s27  ;;  %4295 = vst [vmem:[#allocation27_spill] sm:$0xff] %v3284_v46 }
  0xd0   : > { %2677 = vmatpush3.msra.mxu0 %v1946_v57  ;;  %2750 = vmatpush3.msra.mxu1 %v1946_v57  ;;  %v1941_v57 = vld [vmem:[%s4262_s1 + $0x10] sm:$0xff] }
  0xd1   : > { %v3266_v23 = vpop.permute.xlu1 %734  ;;  %v3273_v53 = vpop.permute.xlu0 %740  ;;  %2678 = vmatprep.subr.mxu0 %v1945_v63  ;;  %2742 = vmatprep.subr.mxu1 %v1945_v63 }
  0xd2   : > { %4292 = vst [vmem:[#allocation24_spill] sm:$0xff] %v3266_v23  ;;  %4293 = vst [vmem:[#allocation25_spill] sm:$0xff] %v3273_v53  ;;  %2679 = vmatpush3.msra.mxu0 %v1945_v63  ;;  %v1944_v23 = vld [vmem:[%s4262_s1 + $0x28] sm:$0xff]  ;;  %v1943_v53 = vld [vmem:[%s4262_s1 + $0x20] sm:$0xff]  ;;  %2751 = vmatpush3.msra.mxu1 %v1945_v63 }
  0xd3   : > { %978 = vrot.lane.b32.xlu1 %v3268_v59, %s2796_s27  ;;  %1068 = vrot.lane.b32.xlu0 %v2957_v25, %s2797_s11  ;;  %v1942_v25 = vld [vmem:[%s4262_s1 + $0x18] sm:$0xff]  ;;  %v1939_v63 = vld [vmem:[%s4262_s1] sm:$0xff] }
  0xd4   : > { %2680 = vmatprep.subr.mxu0 %v1944_v23  ;;  %2743 = vmatprep.subr.mxu1 %v1944_v23 }
  0xd5   : > { %v3282_v55 = vpop.permute.xlu1 %738  ;;  %2681 = vmatpush3.msra.mxu0 %v1944_v23  ;;  %v3289_v19 = vpop.permute.xlu0 %744  ;;  %2752 = vmatpush3.msra.mxu1 %v1944_v23 }
  0xd6   : > { %4294 = vst [vmem:[#allocation26_spill] sm:$0xff] %v3282_v55  ;;  %4296 = vst [vmem:[#allocation28_spill] sm:$0xff] %v3289_v19  ;;  %2682 = vmatprep.subr.mxu0 %v1943_v53  ;;  %2744 = vmatprep.subr.mxu1 %v1943_v53 }
  0xd7   : > { %982 = vrot.lane.b32.xlu1 %v3284_v46, %s2796_s27  ;;  %2683 = vmatpush3.msra.mxu0 %v1943_v53 }
  0xd8   : > { %1196 = vrot.lane.b32.xlu0 %v3048_v0, %s2798_s16  ;;  %2684 = vmatprep.subr.mxu0 %v1942_v25  ;;  %v1940_v0 = vld [vmem:[%s4262_s1 + $0x8] sm:$0xff] }
  0xd9   : > { %v3298_v55 = vpop.permute.xlu1 %742  ;;  %2685 = vmatpush3.msra.mxu0 %v1942_v25  ;;  %v3303_v19 = vpop.permute.xlu0 %812  ;;  %2753 = vmatpush3.msra.mxu1 %v1943_v53 }
  0xda   : > { %4297 = vst [vmem:[#allocation29_spill] sm:$0xff] %v3298_v55  ;;  %2686 = vmatprep.subr.mxu0 %v1941_v57  ;;  %2745 = vmatprep.subr.mxu1 %v1942_v25 }
  0xdb   : > { %1070 = vrot.lane.b32.xlu1 %v2966_v27, %s2797_s11  ;;  %2687 = vmatpush3.msra.mxu0 %v1941_v57 }
  0xdc   : > { %1324 = vrot.lane.b32.xlu0 %v3148_v54, %s2799_s25  ;;  %2688 = vmatprep.subr.mxu0 %v1940_v0 }
  0xdd   : > { %v3312_v55 = vpop.permute.xlu1 %746  ;;  %2689 = vmatpush3.msra.mxu0 %v1940_v0  ;;  %v3317_v27 = vpop.permute.xlu0 %816  ;;  %2754 = vmatpush3.msra.mxu1 %v1942_v25 }
  0xde   : > { %4298 = vst [vmem:[#allocation30_spill] sm:$0xff] %v3312_v55  ;;  %2690 = vmatprep.subr.mxu0 %v1939_v63  ;;  %2746 = vmatprep.subr.mxu1 %v1941_v57 }
  0xdf   : > { %1198 = vrot.lane.b32.xlu1 %v3056_v3, %s2798_s16  ;;  %2691 = vmatpush3.msra.mxu0 %v1939_v63 }
  0xe0   : > { %1452 = vrot.lane.b32.xlu0 %v2959_v26, %s2800_s29  ;;  %2755 = vmatpush3.msra.mxu1 %v1941_v57 }
  0xe1   : > { %v3323_v55 = vpop.permute.xlu1 %814  ;;  %v3325_v46 = vpop.permute.xlu0 %820  ;;  %2747 = vmatprep.subr.mxu1 %v1940_v0 }
  0xe2   : > { %2756 = vmatpush3.msra.mxu1 %v1940_v0 }
  0xe3   : > { %1326 = vrot.lane.b32.xlu1 %v3166_v60, %s2799_s25  ;;  %2748 = vmatprep.subr.mxu1 %v1939_v63 }
  0xe4   : > { %1454 = vrot.lane.b32.xlu0 %v2978_v31, %s2800_s29  ;;  %2757 = vmatpush3.msra.mxu1 %v1939_v63 }
  0xe5   : > { %v3331_v3 = vpop.permute.xlu1 %818  ;;  %v3333_v23 = vpop.permute.xlu0 %824 }
  0xe7   : > { %1072 = vrot.lane.b32.xlu1 %v2959_v26, %s2797_s11 }
  0xe8   : > { %1074 = vrot.lane.b32.xlu0 %v2978_v31, %s2797_s11 }
  0xe9   : > { %v3339_v53 = vpop.permute.xlu1 %822  ;;  %v3341_v25 = vpop.permute.xlu0 %828 }
  0xea   : > { %4299 = vst [vmem:[#allocation31_spill] sm:$0xff] %v3341_v25 }
  0xeb   : > { %1580 = vrot.lane.b32.xlu1 %v3053_v2, %s2801_s30 }
  0xec   : > { %1582 = vrot.lane.b32.xlu0 %v3064_v5, %s2801_s30 }
  0xed   : > { %v3347_v57 = vpop.permute.xlu1 %826  ;;  %v3349_v26 = vpop.permute.xlu0 %832 }
  0xee   : > { %4300 = vst [vmem:[#allocation32_spill] sm:$0xff] %v3349_v26 }
  0xef   : > { %1200 = vrot.lane.b32.xlu1 %v3053_v2, %s2798_s16 }
  0xf0   : > { %1328 = vrot.lane.b32.xlu0 %v3160_v58, %s2799_s25 }
  0xf1   : > { %v3355_v31 = vpop.permute.xlu1 %830  ;;  %v3357_v0 = vpop.permute.xlu0 %836 }
  0xf2   : > { %4301 = vst [vmem:[#allocation33_spill] sm:$0xff] %v3357_v0 }
  0xf3   : > { %1202 = vrot.lane.b32.xlu1 %v3064_v5, %s2798_s16 }
  0xf4   : > { %1456 = vrot.lane.b32.xlu0 %v2974_v30, %s2800_s29 }
  0xf5   : > { %v3363_v63 = vpop.permute.xlu1 %834  ;;  %v3365_v25 = vpop.permute.xlu0 %840 }
  0xf6   : > { %4302 = vst [vmem:[#allocation34_spill] sm:$0xff] %v3365_v25 }
  0xf7   : > { %1330 = vrot.lane.b32.xlu1 %v3178_v1, %s2799_s25 }
  0xf8   : > { %1458 = vrot.lane.b32.xlu0 %v2994_v38, %s2800_s29 }
  0xf9   : > { %v3371_v2 = vpop.permute.xlu1 %838  ;;  %v3373_v26 = vpop.permute.xlu0 %844 }
  0xfa   : > { %4303 = vst [vmem:[#allocation35_spill] sm:$0xff] %v3371_v2  ;;  %4304 = vst [vmem:[#allocation36_spill] sm:$0xff] %v3373_v26 }
  0xfb   : > { %1076 = vrot.lane.b32.xlu1 %v2974_v30, %s2797_s11 }
  0xfc   : > { %1078 = vrot.lane.b32.xlu0 %v2994_v38, %s2797_s11 }
  0xfd   : > { %v3379_v5 = vpop.permute.xlu1 %842  ;;  %v3381_v0 = vpop.permute.xlu0 %848 }
  0xfe   : > { %4305 = vst [vmem:[#allocation37_spill] sm:$0xff] %v3379_v5  ;;  %4306 = vst [vmem:[#allocation38_spill] sm:$0xff] %v3381_v0 }
  0xff   : > { %1584 = vrot.lane.b32.xlu1 %v3060_v4, %s2801_s30 }
 0x100   : > { %1586 = vrot.lane.b32.xlu0 %v3072_v7, %s2801_s30 }
 0x101   : > { %v3387_v25 = vpop.permute.xlu1 %846  ;;  %v3389_v2 = vpop.permute.xlu0 %852 }
 0x102   : > { %4307 = vst [vmem:[#allocation39_spill] sm:$0xff] %v3387_v25  ;;  %4308 = vst [vmem:[#allocation40_spill] sm:$0xff] %v3389_v2 }
 0x103   : > { %1204 = vrot.lane.b32.xlu1 %v3060_v4, %s2798_s16 }
 0x104   : > { %1332 = vrot.lane.b32.xlu0 %v3172_v62, %s2799_s25 }
 0x105   : > { %v3395_v30 = vpop.permute.xlu1 %850  ;;  %v3397_v38 = vpop.permute.xlu0 %856 }
 0x106   : > { %4309 = vst [vmem:[#allocation41_spill] sm:$0xff] %v3395_v30  ;;  %4310 = vst [vmem:[#allocation42_spill] sm:$0xff] %v3397_v38 }
 0x107   : > { %1206 = vrot.lane.b32.xlu1 %v3072_v7, %s2798_s16 }
 0x108   : > { %1460 = vrot.lane.b32.xlu0 %v2982_v32, %s2800_s29 }
 0x109   : > { %v3403_v0 = vpop.permute.xlu1 %854  ;;  %v3405_v25 = vpop.permute.xlu0 %860 }
 0x10a   : > { %4311 = vst [vmem:[#allocation43_spill] sm:$0xff] %v3403_v0  ;;  %4312 = vst [vmem:[#allocation44_spill] sm:$0xff] %v3405_v25 }
 0x10b   : > { %1334 = vrot.lane.b32.xlu1 %v3190_v20, %s2799_s25 }
 0x10c   : > { %1462 = vrot.lane.b32.xlu0 %v3006_v41, %s2800_s29 }
 0x10d   : > { %v3411_v4 = vpop.permute.xlu1 %858  ;;  %v3413_v2 = vpop.permute.xlu0 %864 }
 0x10e   : > { %4313 = vst [vmem:[#allocation45_spill] sm:$0xff] %v3411_v4  ;;  %4314 = vst [vmem:[#allocation46_spill] sm:$0xff] %v3413_v2 }
 0x10f   : > { %1080 = vrot.lane.b32.xlu1 %v2982_v32, %s2797_s11 }
 0x110   : > { %1082 = vrot.lane.b32.xlu0 %v3006_v41, %s2797_s11 }
 0x111   : > { %v3419_v7 = vpop.permute.xlu1 %862  ;;  %v3421_v38 = vpop.permute.xlu0 %868 }
 0x112   : > { %4315 = vst [vmem:[#allocation47_spill] sm:$0xff] %v3419_v7  ;;  %4316 = vst [vmem:[#allocation48_spill] sm:$0xff] %v3421_v38 }
 0x113   : > { %1588 = vrot.lane.b32.xlu1 %v3068_v6, %s2801_s30 }
 0x114   : > { %1590 = vrot.lane.b32.xlu0 %v3080_v9, %s2801_s30 }
 0x115   : > { %v3427_v25 = vpop.permute.xlu1 %866  ;;  %v3429_v4 = vpop.permute.xlu0 %872 }
 0x116   : > { %4317 = vst [vmem:[#allocation49_spill] sm:$0xff] %v3427_v25  ;;  %4318 = vst [vmem:[#allocation50_spill] sm:$0xff] %v3429_v4 }
 0x117   : > { %1208 = vrot.lane.b32.xlu1 %v3068_v6, %s2798_s16 }
 0x118   : > { %1336 = vrot.lane.b32.xlu0 %v3184_v18, %s2799_s25 }
 0x119   : > { %v3435_v32 = vpop.permute.xlu1 %870  ;;  %v3437_v41 = vpop.permute.xlu0 %940 }
 0x11a   : > { %4319 = vst [vmem:[#allocation51_spill] sm:$0xff] %v3435_v32 }
 0x11b   : > { %1210 = vrot.lane.b32.xlu1 %v3080_v9, %s2798_s16 }
 0x11c   : > { %1464 = vrot.lane.b32.xlu0 %v3002_v40, %s2800_s29 }
 0x11d   : > { %v3443_v38 = vpop.permute.xlu1 %874  ;;  %v3445_v25 = vpop.permute.xlu0 %944 }
 0x11e   : > { %4320 = vst [vmem:[#allocation52_spill] sm:$0xff] %v3443_v38 }
 0x11f   : > { %1338 = vrot.lane.b32.xlu1 %v3202_v24, %s2799_s25 }
 0x120   : > { %1466 = vrot.lane.b32.xlu0 %v3014_v43, %s2800_s29 }
 0x121   : > { %v3451_v6 = vpop.permute.xlu1 %942  ;;  %v3453_v4 = vpop.permute.xlu0 %948 }
 0x123   : > { %1084 = vrot.lane.b32.xlu1 %v3002_v40, %s2797_s11 }
 0x124   : > { %1086 = vrot.lane.b32.xlu0 %v3014_v43, %s2797_s11 }
 0x125   : > { %v3459_v9 = vpop.permute.xlu1 %946  ;;  %v3461_v38 = vpop.permute.xlu0 %952 }
 0x127   : > { %1592 = vrot.lane.b32.xlu1 %v3076_v8, %s2801_s30 }
 0x128   : > { %1594 = vrot.lane.b32.xlu0 %v3088_v11, %s2801_s30 }
 0x129   : > { %v3467_v32 = vpop.permute.xlu1 %950  ;;  %v3469_v2 = vpop.permute.xlu0 %956 }
 0x12b   : > { %1212 = vrot.lane.b32.xlu1 %v3076_v8, %s2798_s16 }
 0x12c   : > { %1340 = vrot.lane.b32.xlu0 %v3196_v22, %s2799_s25 }
 0x12d   : > { %v3475_v40 = vpop.permute.xlu1 %954  ;;  %v3477_v43 = vpop.permute.xlu0 %960 }
 0x12f   : > { %1214 = vrot.lane.b32.xlu1 %v3088_v11, %s2798_s16 }
 0x130   : > { %1468 = vrot.lane.b32.xlu0 %v3010_v42, %s2800_s29 }
 0x131   : > { %v3483_v7 = vpop.permute.xlu1 %958  ;;  %v3485_v0 = vpop.permute.xlu0 %964 }
 0x132   : > { %4321 = vst [vmem:[#allocation53_spill] sm:$0xff] %v3485_v0 }
 0x133   : > { %1342 = vrot.lane.b32.xlu1 %v3214_v37, %s2799_s25 }
 0x134   : > { %1470 = vrot.lane.b32.xlu0 %v3022_v45, %s2800_s29 }
 0x135   : > { %v3491_v8 = vpop.permute.xlu1 %962  ;;  %v3493_v30 = vpop.permute.xlu0 %968 }
 0x136   : > { %4322 = vst [vmem:[#allocation54_spill] sm:$0xff] %v3493_v30 }
 0x137   : > { %1088 = vrot.lane.b32.xlu1 %v3010_v42, %s2797_s11 }
 0x138   : > { %1090 = vrot.lane.b32.xlu0 %v3022_v45, %s2797_s11 }
 0x139   : > { %v3499_v11 = vpop.permute.xlu1 %966  ;;  %v3501_v26 = vpop.permute.xlu0 %972 }
 0x13a   : > { %4323 = vst [vmem:[#allocation55_spill] sm:$0xff] %v3499_v11  ;;  %4324 = vst [vmem:[#allocation56_spill] sm:$0xff] %v3501_v26 }
 0x13b   : > { %1596 = vrot.lane.b32.xlu1 %v3084_v10, %s2801_s30 }
 0x13c   : > { %1598 = vrot.lane.b32.xlu0 %v3096_v13, %s2801_s30 }
 0x13d   : > { %v3507_v5 = vpop.permute.xlu1 %970  ;;  %v3509_v0 = vpop.permute.xlu0 %976 }
 0x13e   : > { %4325 = vst [vmem:[#allocation57_spill] sm:$0xff] %v3507_v5  ;;  %4326 = vst [vmem:[#allocation58_spill] sm:$0xff] %v3509_v0 }
 0x13f   : > { %1216 = vrot.lane.b32.xlu1 %v3084_v10, %s2798_s16  ;;  %v503_v10 = vld [vmem:[#allocation2 + $0xa9] sm:$0xff] }
 0x140   : > { %1344 = vrot.lane.b32.xlu0 %v3208_v33, %s2799_s25 }
 0x141   : > { %v3515_v42 = vpop.permute.xlu1 %974  ;;  %v3517_v45 = vpop.permute.xlu0 %980 }
 0x142   : > { %4327 = vst [vmem:[#allocation59_spill] sm:$0xff] %v3515_v42  ;;  %4328 = vst [vmem:[#allocation60_spill] sm:$0xff] %v3517_v45 }
 0x143   : > { %1218 = vrot.lane.b32.xlu1 %v3096_v13, %s2798_s16 }
 0x144   : > { %1472 = vrot.lane.b32.xlu0 %v3018_v44, %s2800_s29 }
 0x145   : > { %v3523_v26 = vpop.permute.xlu1 %978  ;;  %v1069_v5 = vpop.permute.xlu0 %1068 }
 0x146   : > { %4329 = vst [vmem:[#allocation61_spill] sm:$0xff] %v3523_v26  ;;  %v364_v26 = vld [vmem:[#allocation2 + $0x8] sm:$0xff] }
 0x147   : > { %1346 = vrot.lane.b32.xlu1 %v3226_v21, %s2799_s25  ;;  %v1677_v30 = vsel %vm242_vm0, %v364_v26, %v3124_v34 }
 0x148   : > { %1474 = vrot.lane.b32.xlu0 %v3028_v47, %s2800_s29 }
 0x149   : > { %v3529_v33 = vpop.permute.xlu1 %982 }
 0x14a   : > { %4330 = vst [vmem:[#allocation62_spill] sm:$0xff] %v3529_v33  ;;  %v1197_v0 = vpop.permute.xlu0 %1196  ;;  %v363_v33 = vld [vmem:[#allocation2] sm:$0xff] }
 0x14b   : > { %1092 = vrot.lane.b32.xlu1 %v503_v10, %s2797_s11  ;;  %v600_v10 = vld [vmem:[#allocation2 + $0xc1] sm:$0xff]  ;;  %v1676_v42 = vsel %vm242_vm0, %v363_v33, %v3120_v28 }
 0x14c   : > { %1094 = vrot.lane.b32.xlu0 %v3028_v47, %s2797_s11 }
 0x14d   : > { %v1071_v13 = vpop.permute.xlu1 %1070 }
 0x14e   : > { %v1325_v44 = vpop.permute.xlu0 %1324 }
 0x14f   : > { %1600 = vrot.lane.b32.xlu1 %v3092_v12, %s2801_s30 }
 0x150   : > { %1602 = vrot.lane.b32.xlu0 %v3104_v15, %s2801_s30 }
 0x151   : > { %v1199_v21 = vpop.permute.xlu1 %1198 }
 0x152   : > { %v1453_v45 = vpop.permute.xlu0 %1452 }
 0x153   : > { %1220 = vrot.lane.b32.xlu1 %v3092_v12, %s2798_s16  ;;  %v1709_v12 = vsel %vm1708_vm2, %v1676_v42, %v3303_v19  ;;  %v601_v19 = vld [vmem:[#allocation2 + $0xc9] sm:$0xff] }
 0x154   : > { %1348 = vrot.lane.b32.xlu0 %v3220_v51, %s2799_s25  ;;  %v1710_v51 = vsel %vm1708_vm2, %v1677_v30, %v3323_v55  ;;  %v1742_v37 = vsel %vm1741_vm3, %v1709_v12, %v3437_v41 }
 0x155   : > { %v1327_v47 = vpop.permute.xlu1 %1326  ;;  %v1743_v28 = vsel %vm1741_vm3, %v1710_v51, %v3451_v6  ;;  %v1775_v26 = vsel %vm1774_vm4, %v1742_v37, %v1069_v5  ;;  %v602_v51 = vld [vmem:[#allocation2 + $0xd9] sm:$0xff] }
 0x156   : > { %v1455_v11 = vpop.permute.xlu0 %1454  ;;  %v1808_v42 = vsel %vm1807_vm5, %v1775_v26, %v1197_v0 }
 0x157   : > { %1222 = vrot.lane.b32.xlu1 %v3104_v15, %s2798_s16  ;;  %v1776_v15 = vsel %vm1774_vm4, %v1743_v28, %v1071_v13  ;;  %v1841_v41 = vsel %vm1840_vm6, %v1808_v42, %v1325_v44  ;;  %v1679_v28 = vsel %vm242_vm0, %v3154_v56, %v3134_v48 }
 0x158   : > { %1476 = vrot.lane.b32.xlu0 %v600_v10, %s2800_s29  ;;  %v1809_v55 = vsel %vm1807_vm5, %v1776_v15, %v1199_v21  ;;  %v1874_v37 = vsel %vm1873_vm7, %v1841_v41, %v1453_v45  ;;  %v634_v41 = vld [vmem:[#allocation2 + $0xda] sm:$0xff] }
 0x159   : > { %v1073_v34 = vpop.permute.xlu1 %1072  ;;  %v1842_v6 = vsel %vm1840_vm6, %v1809_v55, %v1327_v47  ;;  %v1678_v47 = vsel %vm242_vm0, %v3139_v50, %v3128_v36  ;;  %v1712_v36 = vsel %vm1708_vm2, %v1679_v28, %v3331_v3 }
 0x15a   : > { %v1075_v30 = vpop.permute.xlu0 %1074  ;;  %v1875_v0 = vsel %vm1873_vm7, %v1842_v6, %v1455_v11  ;;  %v1711_v12 = vsel %vm1708_vm2, %v1678_v47, %v3317_v27 }
 0x15b   : > { %1350 = vrot.lane.b32.xlu1 %v3238_v16, %s2799_s25  ;;  %v1744_v26 = vsel %vm1741_vm3, %v1711_v12, %v3445_v25  ;;  %v603_v25 = vld [vmem:[#allocation2 + $0xe1] sm:$0xff] }
 0x15c   : > { %1478 = vrot.lane.b32.xlu0 %v601_v19, %s2800_s29  ;;  %v1777_v50 = vsel %vm1774_vm4, %v1744_v26, %v1073_v34 }
 0x15d   : > { %v1581_v5 = vpop.permute.xlu1 %1580 }
 0x15e   : > { %v1907_v33 = vsel %vm1906_vm8, %v1874_v37, %v1581_v5  ;;  %v1583_v13 = vpop.permute.xlu0 %1582  ;;  %v635_v37 = vld [vmem:[#allocation2 + $0xe2] sm:$0xff] }
 0x15f   : > { %1096 = vrot.lane.b32.xlu1 %v600_v10, %s2797_s11  ;;  %2692 = vmatprep.mubr.msk.f32.mxu0 %vm1955_vm9, %v1907_v33  ;;  %v1908_v16 = vsel %vm1906_vm8, %v1875_v0, %v1583_v13  ;;  %v328_v13 = vld [vmem:[%s2912_s24 + $0xf0] sm:$0xff] }
 0x160   : > { %1098 = vrot.lane.b32.xlu0 %v601_v19, %s2797_s11  ;;  %2693 = vmatmul.mubr.msk.f32.vlgmr.msra.gmra.mxu0 %vm1955_vm9, %v1908_v16  ;;  %v1680_v16 = vsel %vm242_vm0, %v3148_v54, %v3130_v39  ;;  %361 = vst.msk [vmem:[#allocation2 + $0x181] sm:$0xff] %vm242_vm0, %v328_v13 }
 0x161   : > { %v1201_v44 = vpop.permute.xlu1 %1200 }
 0x162   : > { %v1329_v45 = vpop.permute.xlu0 %1328  ;;  %v1810_v27 = vsel %vm1807_vm5, %v1777_v50, %v1201_v44 }
 0x163   : > { %1604 = vrot.lane.b32.xlu1 %v3100_v14, %s2801_s30 }
 0x164   : > { %1606 = vrot.lane.b32.xlu0 %v3110_v17, %s2801_s30 }
 0x165   : > { %v1203_v11 = vpop.permute.xlu1 %1202 }
 0x166   : > { %v1457_v21 = vpop.permute.xlu0 %1456 }
 0x167   : > { %1224 = vrot.lane.b32.xlu1 %v3100_v14, %s2798_s16 }
 0x168   : > { %1352 = vrot.lane.b32.xlu0 %v3232_v35, %s2799_s25  ;;  %v1745_v35 = vsel %vm1741_vm3, %v1712_v36, %v3459_v9 }
 0x169   : > { %v1331_v10 = vpop.permute.xlu1 %1330  ;;  %v1778_v56 = vsel %vm1774_vm4, %v1745_v35, %v1075_v30 }
 0x16a   : > { %v1459_v14 = vpop.permute.xlu0 %1458  ;;  %v1811_v15 = vsel %vm1807_vm5, %v1778_v56, %v1203_v11  ;;  %v604_v11 = vld [vmem:[#allocation2 + $0xf1] sm:$0xff]  ;;  %v637_v56 = vld [vmem:[#allocation2 + $0xfa] sm:$0xff] }
 0x16b   : > { %1226 = vrot.lane.b32.xlu1 %v3110_v17, %s2798_s16  ;;  %v1843_v17 = vsel %vm1840_vm6, %v1810_v27, %v1329_v45  ;;  %v1844_v3 = vsel %vm1840_vm6, %v1811_v15, %v1331_v10  ;;  %v1713_v45 = vsel %vm1708_vm2, %v1680_v16, %v3325_v46  ;;  %v636_v27 = vld [vmem:[#allocation2 + $0xf2] sm:$0xff] }
 0x16c   : > { %1480 = vrot.lane.b32.xlu0 %v602_v51, %s2800_s29  ;;  %v1876_v9 = vsel %vm1873_vm7, %v1843_v17, %v1457_v21  ;;  %v1877_v55 = vsel %vm1873_vm7, %v1844_v3, %v1459_v14  ;;  %v1681_v21 = vsel %vm242_vm0, %v3166_v60, %v3143_v52  ;;  %v1746_v47 = vsel %vm1741_vm3, %v1713_v45, %v3453_v4  ;;  %v605_v4 = vld [vmem:[#allocation2 + $0xf9] sm:$0xff]  ;;  %v4331_v3 = vld [vmem:[#allocation23_spill] sm:$0xff] }
 0x16d   : > { %v1077_v48 = vpop.permute.xlu1 %1076  ;;  %v1714_v39 = vsel %vm1708_vm2, %v1681_v21, %v3339_v53  ;;  %v1682_v17 = vsel %vm242_vm0, %v3160_v58, %v3136_v49 }
 0x16e   : > { %v1079_v19 = vpop.permute.xlu0 %1078  ;;  %v1779_v54 = vsel %vm1774_vm4, %v1746_v47, %v1077_v48  ;;  %v1747_v46 = vsel %vm1741_vm3, %v1714_v39, %v3467_v32  ;;  %v638_v47 = vld [vmem:[#allocation2 + $0x10a] sm:$0xff]  ;;  %v639_v39 = vld [vmem:[#allocation2 + $0x112] sm:$0xff] }
 0x16f   : > { %1354 = vrot.lane.b32.xlu1 %v3250_v61, %s2799_s25  ;;  %v1780_v60 = vsel %vm1774_vm4, %v1747_v46, %v1079_v19 }
 0x170   : > { %1482 = vrot.lane.b32.xlu0 %v603_v25, %s2800_s29 }
 0x171   : > { %v1585_v34 = vpop.permute.xlu1 %1584 }
 0x172   : > { %v1909_v42 = vsel %vm1906_vm8, %v1876_v9, %v1585_v34  ;;  %v1587_v30 = vpop.permute.xlu0 %1586  ;;  %v1715_v34 = vsel %vm1708_vm2, %v1682_v17, %v3333_v23  ;;  %v609_v17 = vld [vmem:[#allocation2 + $0x129] sm:$0xff] }
 0x173   : > { %1100 = vrot.lane.b32.xlu1 %v602_v51, %s2797_s11  ;;  %2695 = vmatprep.mubr.msk.f32.mxu0 %vm1955_vm9, %v1909_v42  ;;  %v1910_v61 = vsel %vm1906_vm8, %v1877_v55, %v1587_v30  ;;  %v606_v42 = vld [vmem:[#allocation2 + $0x109] sm:$0xff]  ;;  %v4332_v55 = vld [vmem:[#allocation4_spill] sm:$0xff] }
 0x174   : > { %1102 = vrot.lane.b32.xlu0 %v603_v25, %s2797_s11  ;;  %2696 = vmatmul.mubr.msk.f32.gmra.mxu0 %vm1955_vm9, %v1910_v61  ;;  %v1683_v30 = vsel %vm242_vm0, %v3178_v1, %v4332_v55  ;;  %v1748_v61 = vsel %vm1741_vm3, %v1715_v34, %v3461_v38 }
 0x175   : > { %v1205_v6 = vpop.permute.xlu1 %1204  ;;  %v1716_v49 = vsel %vm1708_vm2, %v1683_v30, %v3347_v57  ;;  %v640_v30 = vld [vmem:[#allocation2 + $0x122] sm:$0xff] }
 0x176   : > { %v1333_v5 = vpop.permute.xlu0 %1332  ;;  %v1812_v12 = vsel %vm1807_vm5, %v1779_v54, %v1205_v6  ;;  %v1749_v6 = vsel %vm1741_vm3, %v1716_v49, %v3475_v40 }
 0x177   : > { %1608 = vrot.lane.b32.xlu1 %v634_v41, %s2801_s30  ;;  %v1845_v53 = vsel %vm1840_vm6, %v1812_v12, %v1333_v5  ;;  %v607_v5 = vld [vmem:[#allocation2 + $0x111] sm:$0xff]  ;;  %v3699_v12 = vld [vmem:[#allocation2 + $0x120] sm:$0xff] }
 0x178   : > { %1610 = vrot.lane.b32.xlu0 %v635_v37, %s2801_s30 }
 0x179   : > { %v1207_v33 = vpop.permute.xlu1 %1206 }
 0x17a   : > { %v1461_v0 = vpop.permute.xlu0 %1460  ;;  %v1813_v51 = vsel %vm1807_vm5, %v1780_v60, %v1207_v33 }
 0x17b   : > { %1228 = vrot.lane.b32.xlu1 %v634_v41, %s2798_s16  ;;  %v1878_v26 = vsel %vm1873_vm7, %v1845_v53, %v1461_v0  ;;  %v4333_v0 = vld [vmem:[#allocation27_spill] sm:$0xff]  ;;  %v4336_v53 = vld [vmem:[#allocation6_spill] sm:$0xff] }
 0x17c   : > { %1356 = vrot.lane.b32.xlu0 %v3244_v29, %s2799_s25  ;;  %v329_v29 = vld [vmem:[%s2912_s24 + $0xf8] sm:$0xff] }
 0x17d   : > { %v1335_v44 = vpop.permute.xlu1 %1334  ;;  %362 = vst.msk [vmem:[#allocation2 + $0x189] sm:$0xff] %vm242_vm0, %v329_v29 }
 0x17e   : > { %v1463_v10 = vpop.permute.xlu0 %1462  ;;  %v1846_v32 = vsel %vm1840_vm6, %v1813_v51, %v1335_v44  ;;  %v4335_v51 = vld [vmem:[#allocation31_spill] sm:$0xff] }
 0x17f   : > { %1230 = vrot.lane.b32.xlu1 %v635_v37, %s2798_s16  ;;  %v1879_v50 = vsel %vm1873_vm7, %v1846_v32, %v1463_v10  ;;  %v1685_v32 = vsel %vm242_vm0, %v3190_v20, %v4336_v53  ;;  %v642_v53 = vld [vmem:[#allocation2 + $0x13a] sm:$0xff] }
 0x180   : > { %1484 = vrot.lane.b32.xlu0 %v604_v11, %s2800_s29 }
 0x181   : > { %v1081_v52 = vpop.permute.xlu1 %1080 }
 0x182   : > { %v1083_v28 = vpop.permute.xlu0 %1082  ;;  %v1781_v58 = vsel %vm1774_vm4, %v1748_v61, %v1081_v52  ;;  %v4334_v52 = vld [vmem:[#allocation3_spill] sm:$0xff] }
 0x183   : > { %1358 = vrot.lane.b32.xlu1 %v3268_v59, %s2799_s25  ;;  %v1782_v1 = vsel %vm1774_vm4, %v1749_v6, %v1083_v28  ;;  %v1684_v60 = vsel %vm242_vm0, %v3172_v62, %v4334_v52  ;;  %v1718_v62 = vsel %vm1708_vm2, %v1685_v32, %v3355_v31  ;;  %v4340_v32 = vld [vmem:[#allocation7_spill] sm:$0xff] }
 0x184   : > { %1486 = vrot.lane.b32.xlu0 %v605_v4, %s2800_s29  ;;  %v1717_v28 = vsel %vm1708_vm2, %v1684_v60, %v4335_v51  ;;  %v611_v60 = vld [vmem:[#allocation2 + $0x141] sm:$0xff] }
 0x185   : > { %v1589_v14 = vpop.permute.xlu1 %1588 }
 0x186   : > { %v1911_v36 = vsel %vm1906_vm8, %v1878_v26, %v1589_v14  ;;  %v1591_v35 = vpop.permute.xlu0 %1590  ;;  %v1750_v26 = vsel %vm1741_vm3, %v1717_v28, %v3469_v2 }
 0x187   : > { %1104 = vrot.lane.b32.xlu1 %v604_v11, %s2797_s11  ;;  %2698 = vmatprep.mubr.msk.f32.mxu0 %vm1955_vm9, %v1911_v36  ;;  %v1912_v59 = vsel %vm1906_vm8, %v1879_v50, %v1591_v35  ;;  %v3714_v36 = vld [vmem:[#allocation2 + $0x128] sm:$0xff]  ;;  %v1751_v35 = vsel %vm1741_vm3, %v1718_v62, %v3483_v7  ;;  %v4341_v62 = vld [vmem:[#allocation33_spill] sm:$0xff] }
 0x188   : > { %1106 = vrot.lane.b32.xlu0 %v605_v4, %s2797_s11  ;;  %2699 = vmatmul.mubr.msk.f32.gmra.mxu0 %vm1955_vm9, %v1912_v59 }
 0x189   : > { %v1209_v48 = vpop.permute.xlu1 %1208 }
 0x18a   : > { %v1337_v25 = vpop.permute.xlu0 %1336  ;;  %v1814_v23 = vsel %vm1807_vm5, %v1781_v58, %v1209_v48  ;;  %v4337_v58 = vld [vmem:[#allocation5_spill] sm:$0xff] }
 0x18b   : > { %1612 = vrot.lane.b32.xlu1 %v636_v27, %s2801_s30  ;;  %v1847_v57 = vsel %vm1840_vm6, %v1814_v23, %v1337_v25  ;;  %v608_v25 = vld [vmem:[#allocation2 + $0x121] sm:$0xff]  ;;  %v1686_v6 = vsel %vm242_vm0, %v3184_v18, %v4337_v58  ;;  %v581_v58 = vld [vmem:[#allocation2 + $0x158] sm:$0xff] }
 0x18c   : > { %1614 = vrot.lane.b32.xlu0 %v637_v56, %s2801_s30 }
 0x18d   : > { %v1211_v15 = vpop.permute.xlu1 %1210 }
 0x18e   : > { %v1465_v19 = vpop.permute.xlu0 %1464  ;;  %v1815_v38 = vsel %vm1807_vm5, %v1782_v1, %v1211_v15 }
 0x18f   : > { %1232 = vrot.lane.b32.xlu1 %v636_v27, %s2798_s16  ;;  %v1880_v40 = vsel %vm1873_vm7, %v1847_v57, %v1465_v19 }
 0x190   : > { %1360 = vrot.lane.b32.xlu0 %v4331_v3, %s2799_s25 }
 0x191   : > { %v1339_v9 = vpop.permute.xlu1 %1338 }
 0x192   : > { %v1467_v41 = vpop.permute.xlu0 %1466  ;;  %v1848_v13 = vsel %vm1840_vm6, %v1815_v38, %v1339_v9  ;;  %v4339_v38 = vld [vmem:[#allocation8_spill] sm:$0xff] }
 0x193   : > { %1234 = vrot.lane.b32.xlu1 %v637_v56, %s2798_s16  ;;  %v1881_v45 = vsel %vm1873_vm7, %v1848_v13, %v1467_v41  ;;  %v641_v41 = vld [vmem:[#allocation2 + $0x12a] sm:$0xff] }
 0x194   : > { %1488 = vrot.lane.b32.xlu0 %v606_v42, %s2800_s29 }
 0x195   : > { %v1085_v37 = vpop.permute.xlu1 %1084 }
 0x196   : > { %v1087_v33 = vpop.permute.xlu0 %1086  ;;  %v1783_v50 = vsel %vm1774_vm4, %v1750_v26, %v1085_v37  ;;  %v4338_v37 = vld [vmem:[#allocation32_spill] sm:$0xff]  ;;  %v1688_v26 = vsel %vm242_vm0, %v3196_v22, %v4340_v32 }
 0x197   : > { %1362 = vrot.lane.b32.xlu1 %v4333_v0, %s2799_s25  ;;  %v1784_v2 = vsel %vm1774_vm4, %v1751_v35, %v1087_v33  ;;  %v1719_v1 = vsel %vm1708_vm2, %v1686_v6, %v4338_v37  ;;  %v1687_v33 = vsel %vm242_vm0, %v3202_v24, %v4339_v38  ;;  %v643_v35 = vld [vmem:[#allocation2 + $0x142] sm:$0xff]  ;;  %v612_v38 = vld [vmem:[#allocation2 + $0x151] sm:$0xff] }
 0x198   : > { %1490 = vrot.lane.b32.xlu0 %v607_v5, %s2800_s29  ;;  %v1752_v0 = vsel %vm1741_vm3, %v1719_v1, %v3477_v43  ;;  %v1720_v18 = vsel %vm1708_vm2, %v1687_v33, %v3363_v63 }
 0x199   : > { %v1593_v16 = vpop.permute.xlu1 %1592 }
 0x19a   : > { %v1913_v44 = vsel %vm1906_vm8, %v1880_v40, %v1593_v16  ;;  %v1595_v11 = vpop.permute.xlu0 %1594  ;;  %v1753_v40 = vsel %vm1741_vm3, %v1720_v18, %v3491_v8  ;;  %v2775_v18 = vld [vmem:[#allocation2 + $0xa8] sm:$0xff] }
 0x19b   : > { %1108 = vrot.lane.b32.xlu1 %v606_v42, %s2797_s11  ;;  %2701 = vmatprep.mubr.msk.f32.mxu0 %vm1955_vm9, %v1913_v44  ;;  %v1914_v21 = vsel %vm1906_vm8, %v1881_v45, %v1595_v11  ;;  %v579_v45 = vld [vmem:[#allocation2 + $0x140] sm:$0xff] }
 0x19c   : > { %1110 = vrot.lane.b32.xlu0 %v607_v5, %s2797_s11  ;;  %2702 = vmatmul.mubr.msk.f32.gmra.mxu0 %vm1955_vm9, %v1914_v21  ;;  %v578_v5 = vld [vmem:[#allocation2 + $0x138] sm:$0xff] }
 0x19d   : > { %v1213_v10 = vpop.permute.xlu1 %1212 }
 0x19e   : > { %v1341_v54 = vpop.permute.xlu0 %1340  ;;  %v1816_v59 = vsel %vm1807_vm5, %v1783_v50, %v1213_v10  ;;  %v1721_v50 = vsel %vm1708_vm2, %v1688_v26, %v4341_v62 }
 0x19f   : > { %1616 = vrot.lane.b32.xlu1 %v638_v47, %s2801_s30  ;;  %v1849_v31 = vsel %vm1840_vm6, %v1816_v59, %v1341_v54  ;;  %v4342_v59 = vld [vmem:[#allocation10_spill] sm:$0xff] }
 0x1a0   : > { %1618 = vrot.lane.b32.xlu0 %v639_v39, %s2801_s30 }
 0x1a1   : > { %v1215_v29 = vpop.permute.xlu1 %1214 }
 0x1a2   : > { %v1469_v46 = vpop.permute.xlu0 %1468  ;;  %v1817_v27 = vsel %vm1807_vm5, %v1784_v2, %v1215_v29 }
 0x1a3   : > { %1236 = vrot.lane.b32.xlu1 %v638_v47, %s2798_s16  ;;  %v1882_v7 = vsel %vm1873_vm7, %v1849_v31, %v1469_v46  ;;  %v610_v46 = vld [vmem:[#allocation2 + $0x139] sm:$0xff] }
 0x1a4   : > { %1364 = vrot.lane.b32.xlu0 %v3699_v12, %s2799_s25 }
 0x1a5   : > { %v1343_v4 = vpop.permute.xlu1 %1342 }
 0x1a6   : > { %v1471_v14 = vpop.permute.xlu0 %1470  ;;  %v1850_v56 = vsel %vm1840_vm6, %v1817_v27, %v1343_v4  ;;  %v4344_v27 = vld [vmem:[#allocation53_spill] sm:$0xff] }
 0x1a7   : > { %1238 = vrot.lane.b32.xlu1 %v639_v39, %s2798_s16  ;;  %v1883_v3 = vsel %vm1873_vm7, %v1850_v56, %v1471_v14  ;;  %v4345_v56 = vld [vmem:[#allocation35_spill] sm:$0xff] }
 0x1a8   : > { %1366 = vrot.lane.b32.xlu0 %v3714_v36, %s2799_s25 }
 0x1a9   : > { %v1089_v20 = vpop.permute.xlu1 %1088 }
 0x1aa   : > { %v1091_v48 = vpop.permute.xlu0 %1090  ;;  %v1785_v13 = vsel %vm1774_vm4, %v1752_v0, %v1089_v20  ;;  %v4343_v20 = vld [vmem:[#allocation15_spill] sm:$0xff]  ;;  %v613_v0 = vld [vmem:[#allocation2 + $0x159] sm:$0xff] }
 0x1ab   : > { %984 = vrot.lane.b32.xlu1 %v3699_v12, %s2796_s27  ;;  %v1786_v24 = vsel %vm1774_vm4, %v1753_v40, %v1091_v48  ;;  %v1689_v2 = vsel %vm242_vm0, %v4343_v20, %v4342_v59  ;;  %v1754_v48 = vsel %vm1741_vm3, %v1721_v50, %v4344_v27 }
 0x1ac   : > { %986 = vrot.lane.b32.xlu0 %v3714_v36, %s2796_s27  ;;  %v1722_v22 = vsel %vm1708_vm2, %v1689_v2, %v4345_v56 }
 0x1ad   : > { %v1597_v15 = vpop.permute.xlu1 %1596 }
 0x1ae   : > { %v1915_v19 = vsel %vm1906_vm8, %v1882_v7, %v1597_v15  ;;  %v1599_v9 = vpop.permute.xlu0 %1598  ;;  %v4346_v7 = vld [vmem:[#allocation55_spill] sm:$0xff] }
 0x1af   : > { %1492 = vrot.lane.b32.xlu1 %v608_v25, %s2800_s29  ;;  %2704 = vmatprep.mubr.msk.f32.mxu0 %vm1955_vm9, %v1915_v19  ;;  %v1916_v34 = vsel %vm1906_vm8, %v1883_v3, %v1599_v9  ;;  %v1755_v15 = vsel %vm1741_vm3, %v1722_v22, %v4346_v7  ;;  %v580_v9 = vld [vmem:[#allocation2 + $0x150] sm:$0xff]  ;;  %v2777_v7 = vld [vmem:[#allocation2 + $0xc0] sm:$0xff] }
 0x1b0   : > { %1494 = vrot.lane.b32.xlu0 %v609_v17, %s2800_s29  ;;  %2705 = vmatmul.mubr.msk.f32.gmra.mxu0 %vm1955_vm9, %v1916_v34 }
 0x1b1   : > { %v1217_v42 = vpop.permute.xlu1 %1216 }
 0x1b2   : > { %v1345_v55 = vpop.permute.xlu0 %1344  ;;  %v1818_v16 = vsel %vm1807_vm5, %v1785_v13, %v1217_v42  ;;  %v4347_v13 = vld [vmem:[#allocation9_spill] sm:$0xff] }
 0x1b3   : > { %1112 = vrot.lane.b32.xlu1 %v608_v25, %s2797_s11  ;;  %v1851_v63 = vsel %vm1840_vm6, %v1818_v16, %v1345_v55  ;;  %v1690_v40 = vsel %vm242_vm0, %v2775_v18, %v4347_v13 }
 0x1b4   : > { %1114 = vrot.lane.b32.xlu0 %v609_v17, %s2797_s11 }
 0x1b5   : > { %v1219_v61 = vpop.permute.xlu1 %1218 }
 0x1b6   : > { %v1473_v49 = vpop.permute.xlu0 %1472  ;;  %v1819_v43 = vsel %vm1807_vm5, %v1786_v24, %v1219_v61 }
 0x1b7   : > { %1620 = vrot.lane.b32.xlu1 %v640_v30, %s2801_s30  ;;  %v1884_v47 = vsel %vm1873_vm7, %v1851_v63, %v1473_v49  ;;  %v4350_v63 = vld [vmem:[#allocation54_spill] sm:$0xff] }
 0x1b8   : > { %1622 = vrot.lane.b32.xlu0 %v641_v41, %s2801_s30 }
 0x1b9   : > { %v1347_v23 = vpop.permute.xlu1 %1346 }
 0x1ba   : > { %v1475_v57 = vpop.permute.xlu0 %1474  ;;  %v1852_v21 = vsel %vm1840_vm6, %v1819_v43, %v1347_v23  ;;  %v4349_v43 = vld [vmem:[#allocation12_spill] sm:$0xff] }
 0x1bb   : > { %1240 = vrot.lane.b32.xlu1 %v640_v30, %s2798_s16  ;;  %v1885_v39 = vsel %vm1873_vm7, %v1852_v21, %v1475_v57 }
 0x1bc   : > { %1368 = vrot.lane.b32.xlu0 %v578_v5, %s2799_s25 }
 0x1bd   : > { %v1093_v44 = vpop.permute.xlu1 %1092 }
 0x1be   : > { %v1095_v11 = vpop.permute.xlu0 %1094  ;;  %v1787_v25 = vsel %vm1774_vm4, %v1754_v48, %v1093_v44  ;;  %v4348_v44 = vld [vmem:[#allocation34_spill] sm:$0xff]  ;;  %v583_v48 = vld [vmem:[#allocation2 + $0x170] sm:$0xff] }
 0x1bf   : > { %1242 = vrot.lane.b32.xlu1 %v641_v41, %s2798_s16  ;;  %v1788_v3 = vsel %vm1774_vm4, %v1755_v15, %v1095_v11  ;;  %v1723_v24 = vsel %vm1708_vm2, %v1690_v40, %v4348_v44  ;;  %v4353_v15 = vld [vmem:[#allocation11_spill] sm:$0xff] }
 0x1c0   : > { %1370 = vrot.lane.b32.xlu0 %v579_v45, %s2799_s25  ;;  %v1756_v21 = vsel %vm1741_vm3, %v1723_v24, %v4350_v63  ;;  %v646_v40 = vld [vmem:[#allocation2 + $0x16a] sm:$0xff] }
 0x1c1   : > { %v1601_v8 = vpop.permute.xlu1 %1600 }
 0x1c2   : > { %v1917_v10 = vsel %vm1906_vm8, %v1884_v47, %v1601_v8  ;;  %v1603_v54 = vpop.permute.xlu0 %1602  ;;  %v4351_v8 = vld [vmem:[#allocation37_spill] sm:$0xff] }
 0x1c3   : > { %988 = vrot.lane.b32.xlu1 %v578_v5, %s2796_s27  ;;  %2707 = vmatprep.mubr.msk.f32.mxu0 %vm1955_vm9, %v1917_v10  ;;  %v1918_v29 = vsel %vm1906_vm8, %v1885_v39, %v1603_v54  ;;  %v644_v54 = vld [vmem:[#allocation2 + $0x152] sm:$0xff] }
 0x1c4   : > { %990 = vrot.lane.b32.xlu0 %v579_v45, %s2796_s27  ;;  %2708 = vmatmul.mubr.msk.f32.gmra.mxu0 %vm1955_vm9, %v1918_v29  ;;  %v2776_v45 = vld [vmem:[#allocation2 + $0xb0] sm:$0xff]  ;;  %v4352_v29 = vld [vmem:[#allocation57_spill] sm:$0xff] }
 0x1c5   : > { %v1221_v52 = vpop.permute.xlu1 %1220  ;;  %v1691_v11 = vsel %vm242_vm0, %v2776_v45, %v4349_v43  ;;  %v647_v45 = vld [vmem:[#allocation2 + $0x172] sm:$0xff] }
 0x1c6   : > { %v1349_v4 = vpop.permute.xlu0 %1348  ;;  %v1820_v19 = vsel %vm1807_vm5, %v1787_v25, %v1221_v52  ;;  %v1724_v10 = vsel %vm1708_vm2, %v1691_v11, %v4351_v8  ;;  %v614_v25 = vld [vmem:[#allocation2 + $0x169] sm:$0xff] }
 0x1c7   : > { %1496 = vrot.lane.b32.xlu1 %v610_v46, %s2800_s29  ;;  %v1853_v55 = vsel %vm1840_vm6, %v1820_v19, %v1349_v4  ;;  %v1692_v19 = vsel %vm242_vm0, %v2777_v7, %v4353_v15 }
 0x1c8   : > { %1498 = vrot.lane.b32.xlu0 %v611_v60, %s2800_s29 }
 0x1c9   : > { %v1223_v51 = vpop.permute.xlu1 %1222 }
 0x1ca   : > { %v1477_v28 = vpop.permute.xlu0 %1476  ;;  %v1821_v34 = vsel %vm1807_vm5, %v1788_v3, %v1223_v51  ;;  %v645_v51 = vld [vmem:[#allocation2 + $0x15a] sm:$0xff] }
 0x1cb   : > { %1116 = vrot.lane.b32.xlu1 %v610_v46, %s2797_s11  ;;  %v1886_v61 = vsel %vm1873_vm7, %v1853_v55, %v1477_v28  ;;  %v1757_v46 = vsel %vm1741_vm3, %v1724_v10, %v4352_v29  ;;  %v4354_v3 = vld [vmem:[#allocation36_spill] sm:$0xff]  ;;  %v4355_v55 = vld [vmem:[#allocation14_spill] sm:$0xff] }
 0x1cc   : > { %1118 = vrot.lane.b32.xlu0 %v611_v60, %s2797_s11  ;;  %v2779_v29 = vld [vmem:[#allocation2 + $0xd8] sm:$0xff] }
 0x1cd   : > { %v1351_v14 = vpop.permute.xlu1 %1350 }
 0x1ce   : > { %v1479_v31 = vpop.permute.xlu0 %1478  ;;  %v1854_v30 = vsel %vm1840_vm6, %v1821_v34, %v1351_v14  ;;  %v615_v34 = vld [vmem:[#allocation2 + $0x171] sm:$0xff] }
 0x1cf   : > { %1624 = vrot.lane.b32.xlu1 %v642_v53, %s2801_s30  ;;  %v1887_v6 = vsel %vm1873_vm7, %v1854_v30, %v1479_v31 }
 0x1d0   : > { %1626 = vrot.lane.b32.xlu0 %v643_v35, %s2801_s30 }
 0x1d1   : > { %v1097_v17 = vpop.permute.xlu1 %1096 }
 0x1d2   : > { %v1099_v42 = vpop.permute.xlu0 %1098  ;;  %v1789_v39 = vsel %vm1774_vm4, %v1756_v21, %v1097_v17 }
 0x1d3   : > { %1244 = vrot.lane.b32.xlu1 %v642_v53, %s2798_s16  ;;  %v1790_v4 = vsel %vm1774_vm4, %v1757_v46, %v1099_v42  ;;  %v2778_v42 = vld [vmem:[#allocation2 + $0xc8] sm:$0xff]  ;;  %v4359_v46 = vld [vmem:[#allocation13_spill] sm:$0xff] }
 0x1d4   : > { %1372 = vrot.lane.b32.xlu0 %v580_v9, %s2799_s25  ;;  %v1693_v30 = vsel %vm242_vm0, %v2778_v42, %v4355_v55 }
 0x1d5   : > { %v1605_v41 = vpop.permute.xlu1 %1604 }
 0x1d6   : > { %v1919_v49 = vsel %vm1906_vm8, %v1886_v61, %v1605_v41  ;;  %v1607_v23 = vpop.permute.xlu0 %1606  ;;  %v4356_v61 = vld [vmem:[#allocation56_spill] sm:$0xff] }
 0x1d7   : > { %1246 = vrot.lane.b32.xlu1 %v643_v35, %s2798_s16  ;;  %2710 = vmatprep.mubr.msk.f32.mxu0 %vm1955_vm9, %v1919_v49  ;;  %v1920_v37 = vsel %vm1906_vm8, %v1887_v6, %v1607_v23  ;;  %v582_v35 = vld [vmem:[#allocation2 + $0x168] sm:$0xff] }
 0x1d8   : > { %1374 = vrot.lane.b32.xlu0 %v581_v58, %s2799_s25  ;;  %2711 = vmatmul.mubr.msk.f32.gmra.mxu0 %vm1955_vm9, %v1920_v37  ;;  %v4358_v37 = vld [vmem:[#allocation59_spill] sm:$0xff] }
 0x1d9   : > { %v1225_v1 = vpop.permute.xlu1 %1224 }
 0x1da   : > { %v1353_v5 = vpop.permute.xlu0 %1352  ;;  %v1822_v52 = vsel %vm1807_vm5, %v1789_v39, %v1225_v1  ;;  %v585_v39 = vld [vmem:[#allocation2 + $0x188] sm:$0xff] }
 0x1db   : > { %992 = vrot.lane.b32.xlu1 %v580_v9, %s2796_s27  ;;  %v1855_v32 = vsel %vm1840_vm6, %v1822_v52, %v1353_v5  ;;  %v1725_v9 = vsel %vm1708_vm2, %v1692_v19, %v4354_v3  ;;  %v1694_v52 = vsel %vm242_vm0, %v2779_v29, %v4359_v46 }
 0x1dc   : > { %994 = vrot.lane.b32.xlu0 %v581_v58, %s2796_s27  ;;  %v1758_v41 = vsel %vm1741_vm3, %v1725_v9, %v4356_v61  ;;  %v4357_v58 = vld [vmem:[#allocation39_spill] sm:$0xff] }
 0x1dd   : > { %v1227_v33 = vpop.permute.xlu1 %1226  ;;  %v1726_v6 = vsel %vm1708_vm2, %v1693_v30, %v4357_v58  ;;  %v648_v30 = vld [vmem:[#allocation2 + $0x182] sm:$0xff] }
 0x1de   : > { %v1481_v57 = vpop.permute.xlu0 %1480  ;;  %v1823_v28 = vsel %vm1807_vm5, %v1790_v4, %v1227_v33  ;;  %v1759_v1 = vsel %vm1741_vm3, %v1726_v6, %v4358_v37  ;;  %v4360_v4 = vld [vmem:[#allocation38_spill] sm:$0xff]  ;;  %v586_v6 = vld [vmem:[#allocation2 + $0x198] sm:$0xff] }
 0x1df   : > { %1500 = vrot.lane.b32.xlu1 %v612_v38, %s2800_s29  ;;  %v1888_v14 = vsel %vm1873_vm7, %v1855_v32, %v1481_v57 }
 0x1e0   : > { %1502 = vrot.lane.b32.xlu0 %v613_v0, %s2800_s29 }
 0x1e1   : > { %v1355_v16 = vpop.permute.xlu1 %1354 }
 0x1e2   : > { %v1483_v47 = vpop.permute.xlu0 %1482  ;;  %v1856_v26 = vsel %vm1840_vm6, %v1823_v28, %v1355_v16  ;;  %v2780_v28 = vld [vmem:[#allocation2 + $0xe0] sm:$0xff] }
 0x1e3   : > { %1120 = vrot.lane.b32.xlu1 %v612_v38, %s2797_s11  ;;  %v1889_v59 = vsel %vm1873_vm7, %v1856_v26, %v1483_v47  ;;  %v584_v47 = vld [vmem:[#allocation2 + $0x180] sm:$0xff]  ;;  %v4362_v26 = vld [vmem:[#allocation58_spill] sm:$0xff] }
 0x1e4   : > { %1122 = vrot.lane.b32.xlu0 %v613_v0, %s2797_s11 }
 0x1e5   : > { %v1101_v60 = vpop.permute.xlu1 %1100 }
 0x1e6   : > { %v1103_v53 = vpop.permute.xlu0 %1102  ;;  %v1791_v23 = vsel %vm1774_vm4, %v1758_v41, %v1101_v60  ;;  %v649_v41 = vld [vmem:[#allocation2 + $0x18a] sm:$0xff] }
 0x1e7   : > { %1628 = vrot.lane.b32.xlu1 %v644_v54, %s2801_s30  ;;  %v1792_v33 = vsel %vm1774_vm4, %v1759_v1, %v1103_v53  ;;  %v4361_v53 = vld [vmem:[#allocation17_spill] sm:$0xff] }
 0x1e8   : > { %1630 = vrot.lane.b32.xlu0 %v645_v51, %s2801_s30  ;;  %v1695_v32 = vsel %vm242_vm0, %v2780_v28, %v4361_v53  ;;  %v618_v1 = vld [vmem:[#allocation2 + $0x199] sm:$0xff] }
 0x1e9   : > { %v1609_v62 = vpop.permute.xlu1 %1608 }
 0x1ea   : > { %v1921_v50 = vsel %vm1906_vm8, %v1888_v14, %v1609_v62  ;;  %v1611_v20 = vpop.permute.xlu0 %1610 }
 0x1eb   : > { %1248 = vrot.lane.b32.xlu1 %v644_v54, %s2798_s16  ;;  %2713 = vmatprep.mubr.msk.f32.mxu0 %vm1955_vm9, %v1921_v50  ;;  %v1922_v2 = vsel %vm1906_vm8, %v1889_v59, %v1611_v20  ;;  %v4363_v50 = vld [vmem:[#allocation41_spill] sm:$0xff] }
 0x1ec   : > { %1376 = vrot.lane.b32.xlu0 %v582_v35, %s2799_s25  ;;  %2714 = vmatmul.mubr.msk.f32.gmra.mxu0 %vm1955_vm9, %v1922_v2  ;;  %v616_v20 = vld [vmem:[#allocation2 + $0x181] sm:$0xff] }
 0x1ed   : > { %v1229_v27 = vpop.permute.xlu1 %1228  ;;  %v4364_v2 = vld [vmem:[#allocation61_spill] sm:$0xff] }
 0x1ee   : > { %v1357_v31 = vpop.permute.xlu0 %1356  ;;  %v1824_v5 = vsel %vm1807_vm5, %v1791_v23, %v1229_v27 }
 0x1ef   : > { %1250 = vrot.lane.b32.xlu1 %v645_v51, %s2798_s16  ;;  %v1857_v18 = vsel %vm1840_vm6, %v1824_v5, %v1357_v31  ;;  %v1727_v51 = vsel %vm1708_vm2, %v1694_v52, %v4360_v4  ;;  %v4370_v4 = vld [vmem:[#allocation62_spill] sm:$0xff] }
 0x1f0   : > { %1378 = vrot.lane.b32.xlu0 %v583_v48, %s2799_s25  ;;  %v1760_v14 = vsel %vm1741_vm3, %v1727_v51, %v4362_v26 }
 0x1f1   : > { %v1231_v56 = vpop.permute.xlu1 %1230 }
 0x1f2   : > { %v1485_v22 = vpop.permute.xlu0 %1484  ;;  %v1825_v0 = vsel %vm1807_vm5, %v1792_v33, %v1231_v56  ;;  %v587_v33 = vld [vmem:[#allocation2 + $0x1a0] sm:$0xff] }
 0x1f3   : > { %996 = vrot.lane.b32.xlu1 %v582_v35, %s2796_s27  ;;  %v1890_v16 = vsel %vm1873_vm7, %v1857_v18, %v1485_v22  ;;  %v1728_v35 = vsel %vm1708_vm2, %v1695_v32, %v4363_v50  ;;  %v617_v22 = vld [vmem:[#allocation2 + $0x189] sm:$0xff] }
 0x1f4   : > { %998 = vrot.lane.b32.xlu0 %v583_v48, %s2796_s27  ;;  %v1761_v27 = vsel %vm1741_vm3, %v1728_v35, %v4364_v2 }
 0x1f5   : > { %v1359_v17 = vpop.permute.xlu1 %1358 }
 0x1f6   : > { %v1487_v49 = vpop.permute.xlu0 %1486  ;;  %v1858_v13 = vsel %vm1840_vm6, %v1825_v0, %v1359_v17  ;;  %v2781_v0 = vld [vmem:[#allocation2 + $0xf0] sm:$0xff] }
 0x1f7   : > { %1504 = vrot.lane.b32.xlu1 %v614_v25, %s2800_s29  ;;  %v1891_v43 = vsel %vm1873_vm7, %v1858_v13, %v1487_v49 }
 0x1f8   : > { %1506 = vrot.lane.b32.xlu0 %v615_v34, %s2800_s29 }
 0x1f9   : > { %v1105_v38 = vpop.permute.xlu1 %1104 }
 0x1fa   : > { %v1107_v57 = vpop.permute.xlu0 %1106  ;;  %v1793_v59 = vsel %vm1774_vm4, %v1760_v14, %v1105_v38  ;;  %v3926_v38 = vld [vmem:[%s4263_s2] ss:$0 sm:$0xff] }
 0x1fb   : > { %1124 = vrot.lane.b32.xlu1 %v614_v25, %s2797_s11  ;;  %v1794_v56 = vsel %vm1774_vm4, %v1761_v27, %v1107_v57  ;;  %v4365_v57 = vld [vmem:[#allocation16_spill] sm:$0xff] }
 0x1fc   : > { %1126 = vrot.lane.b32.xlu0 %v615_v34, %s2797_s11  ;;  %v1696_v18 = vsel %vm242_vm0, %v2781_v0, %v4365_v57  ;;  %v4372_v0 = vld [vmem:[#allocation42_spill] sm:$0xff] }
 0x1fd   : > { %v1613_v44 = vpop.permute.xlu1 %1612 }
 0x1fe   : > { %v1923_v24 = vsel %vm1906_vm8, %v1890_v16, %v1613_v44  ;;  %v1615_v11 = vpop.permute.xlu0 %1614  ;;  %v4366_v16 = vld [vmem:[#allocation40_spill] sm:$0xff] }
 0x1ff   : > { %1632 = vrot.lane.b32.xlu1 %v646_v40, %s2801_s30  ;;  %2716 = vmatprep.mubr.msk.f32.mxu1 %vm1955_vm9, %v1923_v24  ;;  %v1924_v63 = vsel %vm1906_vm8, %v1891_v43, %v1615_v11  ;;  %v1729_v44 = vsel %vm1708_vm2, %v1696_v18, %v4366_v16  ;;  %v2782_v43 = vld [vmem:[#allocation2 + $0xf8] sm:$0xff]  ;;  %v4367_v11 = vld [vmem:[#allocation19_spill] sm:$0xff] }
 0x200   : > { %1634 = vrot.lane.b32.xlu0 %v647_v45, %s2801_s30  ;;  %2717 = vmatmul.mubr.msk.f32.vlgmr.msra.gmra.mxu1 %vm1955_vm9, %v1924_v63  ;;  %v1697_v63 = vsel %vm242_vm0, %v2782_v43, %v4367_v11  ;;  %v2784_v16 = vld [vmem:[#allocation2 + $0x110] sm:$0xff] }
 0x201   : > { %v1233_v21 = vpop.permute.xlu1 %1232 }
 0x202   : > { %v1361_v8 = vpop.permute.xlu0 %1360  ;;  %v1826_v48 = vsel %vm1807_vm5, %v1793_v59, %v1233_v21  ;;  %v4368_v21 = vld [vmem:[#allocation60_spill] sm:$0xff] }
 0x203   : > { %1252 = vrot.lane.b32.xlu1 %v646_v40, %s2798_s16  ;;  %v1859_v15 = vsel %vm1840_vm6, %v1826_v48, %v1361_v8  ;;  %v651_v48 = vld [vmem:[#allocation2 + $0x1a2] sm:$0xff] }
 0x204   : > { %1380 = vrot.lane.b32.xlu0 %v584_v47, %s2799_s25 }
 0x205   : > { %v1235_v10 = vpop.permute.xlu1 %1234 }
 0x206   : > { %v1489_v54 = vpop.permute.xlu0 %1488  ;;  %v1827_v25 = vsel %vm1807_vm5, %v1794_v56, %v1235_v10 }
 0x207   : > { %1254 = vrot.lane.b32.xlu1 %v647_v45, %s2798_s16  ;;  %v1892_v17 = vsel %vm1873_vm7, %v1859_v15, %v1489_v54  ;;  %v650_v45 = vld [vmem:[#allocation2 + $0x19a] sm:$0xff] }
 0x208   : > { %1382 = vrot.lane.b32.xlu0 %v585_v39, %s2799_s25 }
 0x209   : > { %v1363_v60 = vpop.permute.xlu1 %1362 }
 0x20a   : > { %v1491_v62 = vpop.permute.xlu0 %1490  ;;  %v1860_v19 = vsel %vm1840_vm6, %v1827_v25, %v1363_v60  ;;  %v619_v60 = vld [vmem:[#allocation2 + $0x1a1] sm:$0xff] }
 0x20b   : > { %1000 = vrot.lane.b32.xlu1 %v584_v47, %s2796_s27  ;;  %v1893_v34 = vsel %vm1873_vm7, %v1860_v19, %v1491_v62  ;;  %v1762_v47 = vsel %vm1741_vm3, %v1729_v44, %v4368_v21  ;;  %v4373_v44 = vld [vmem:[#allocation21_spill] sm:$0xff] }
 0x20c   : > { %1002 = vrot.lane.b32.xlu0 %v585_v39, %s2796_s27  ;;  %v4369_v39 = vld [vmem:[#allocation43_spill] sm:$0xff] }
 0x20d   : > { %v1109_v31 = vpop.permute.xlu1 %1108  ;;  %v1730_v54 = vsel %vm1708_vm2, %v1697_v63, %v4369_v39  ;;  %v4374_v63 = vld [vmem:[#allocation45_spill] sm:$0xff] }
 0x20e   : > { %v1111_v7 = vpop.permute.xlu0 %1110  ;;  %v1795_v29 = vsel %vm1774_vm4, %v1762_v47, %v1109_v31  ;;  %v1763_v51 = vsel %vm1741_vm3, %v1730_v54, %v4370_v4 }
 0x20f   : > { %1508 = vrot.lane.b32.xlu1 %v616_v20, %s2800_s29  ;;  %v1796_v32 = vsel %vm1774_vm4, %v1763_v51, %v1111_v7 }
 0x210   : > { %1510 = vrot.lane.b32.xlu0 %v617_v22, %s2800_s29 }
 0x211   : > { %v1617_v3 = vpop.permute.xlu1 %1616 }
 0x212   : > { %v1925_v9 = vsel %vm1906_vm8, %v1892_v17, %v1617_v3  ;;  %v1619_v42 = vpop.permute.xlu0 %1618 }
 0x213   : > { %1128 = vrot.lane.b32.xlu1 %v616_v20, %s2797_s11  ;;  %2719 = vmatprep.mubr.msk.f32.mxu1 %vm1955_vm9, %v1925_v9  ;;  %v1926_v55 = vsel %vm1906_vm8, %v1893_v34, %v1619_v42 }
 0x214   : > { %1130 = vrot.lane.b32.xlu0 %v617_v22, %s2797_s11  ;;  %2720 = vmatmul.mubr.msk.f32.gmra.mxu1 %vm1955_vm9, %v1926_v55 }
 0x215   : > { %v1237_v61 = vpop.permute.xlu1 %1236 }
 0x216   : > { %v1365_v49 = vpop.permute.xlu0 %1364  ;;  %v1828_v28 = vsel %vm1807_vm5, %v1795_v29, %v1237_v61 }
 0x217   : > { %1636 = vrot.lane.b32.xlu1 %v648_v30, %s2801_s30  ;;  %v1861_v20 = vsel %vm1840_vm6, %v1828_v28, %v1365_v49 }
 0x218   : > { %1638 = vrot.lane.b32.xlu0 %v649_v41, %s2801_s30 }
 0x219   : > { %v1239_v58 = vpop.permute.xlu1 %1238 }
 0x21a   : > { %v1367_v23 = vpop.permute.xlu0 %1366  ;;  %v1829_v50 = vsel %vm1807_vm5, %v1796_v32, %v1239_v58 }
 0x21b   : > { %1256 = vrot.lane.b32.xlu1 %v648_v30, %s2798_s16  ;;  %v1862_v25 = vsel %vm1840_vm6, %v1829_v50, %v1367_v23  ;;  %v4371_v23 = vld [vmem:[#allocation18_spill] sm:$0xff] }
 0x21c   : > { %1384 = vrot.lane.b32.xlu0 %v586_v6, %s2799_s25  ;;  %v2783_v6 = vld [vmem:[#allocation2 + $0x108] sm:$0xff] }
 0x21d   : > { %v3918_v37 = vpop.permute.xlu1 %984 }
 0x21e   : > { %v3920_v5 = vpop.permute.xlu0 %986 }
 0x21f   : > { %1258 = vrot.lane.b32.xlu1 %v649_v41, %s2798_s16 }
 0x220   : > { %1512 = vrot.lane.b32.xlu0 %v618_v1, %s2800_s29  ;;  %v2694_v13 = vpop.f32.mrf.mxu0  ;;  %v1698_v1 = vsel %vm242_vm0, %v2783_v6, %v4371_v23  ;;  %v4376_v6 = vld [vmem:[#allocation44_spill] sm:$0xff] }
 0x221   : > { %v1493_v40 = vpop.permute.xlu1 %1492  ;;  %v2124_v24 = vadd.f32 %v2694_v13, %v3926_v38  ;;  %v1731_v57 = vsel %vm1708_vm2, %v1698_v1, %v4372_v0 }
 0x222   : > { %v1495_v8 = vpop.permute.xlu0 %1494  ;;  %v2118_v10 = vpop.f32.mrf.mxu0  ;;  %v1894_v31 = vsel %vm1873_vm7, %v1861_v20, %v1493_v40 }
 0x223   : > { %1386 = vrot.lane.b32.xlu1 %v587_v33, %s2799_s25  ;;  %2278 = vst.msk [vmem:[%s3936_s8 + $0x8] sm:$0xff] %vm242_vm0, %v2124_v24  ;;  %v2381_v46 = vmul.f32 %v2124_v24, %v2124_v24  ;;  %v2119_v52 = vadd.f32 %v3926_v38, %v2118_v10  ;;  %v2310_v26 = vsel %vm242_vm0, %v2124_v24, 0.0  ;;  %v1895_v15 = vsel %vm1873_vm7, %v1862_v25, %v1495_v8 }
 0x224   : > { %1640 = vrot.lane.b32.xlu0 %v650_v45, %s2801_s30  ;;  %v1699_v24 = vsel %vm242_vm0, %v2784_v16, %v4373_v44  ;;  %v1764_v45 = vsel %vm1741_vm3, %v1731_v57, %v3918_v37 }
 0x225   : > { %v1113_v53 = vpop.permute.xlu1 %1112  ;;  %2277 = vst.msk [vmem:[%s3936_s8] sm:$0xff] %vm242_vm0, %v2119_v52  ;;  %v2309_v14 = vsel %vm242_vm0, %v2119_v52, 0.0  ;;  %v2380_v62 = vmul.f32 %v2119_v52, %v2119_v52  ;;  %v2413_v2 = vsel %vm242_vm0, %v2381_v46, 0.0  ;;  %v1732_v21 = vsel %vm1708_vm2, %v1699_v24, %v4374_v63 }
 0x226   : > { %v2311_v35 = vadd.f32 %v2310_v26, %v2309_v14  ;;  %v1115_v59 = vpop.permute.xlu0 %1114  ;;  %v1797_v47 = vsel %vm1774_vm4, %v1764_v45, %v1113_v53  ;;  %v1765_v39 = vsel %vm1741_vm3, %v1732_v21, %v3920_v5 }
 0x227   : > { %1514 = vrot.lane.b32.xlu1 %v619_v60, %s2800_s29  ;;  %v2412_v27 = vsel %vm242_vm0, %v2380_v62, 0.0  ;;  %v1798_v37 = vsel %vm1774_vm4, %v1765_v39, %v1115_v59 }
 0x228   : > { %v2414_v56 = vadd.f32 %v2413_v2, %v2412_v27 }
 0x229   : > { %v1621_v22 = vpop.permute.xlu1 %1620 }
 0x22a   : > { %v1927_v7 = vsel %vm1906_vm8, %v1894_v31, %v1621_v22  ;;  %v1623_v19 = vpop.permute.xlu0 %1622 }
 0x22b   : > { %1642 = vrot.lane.b32.xlu1 %v651_v48, %s2801_s30  ;;  %2722 = vmatprep.mubr.msk.f32.mxu1 %vm1955_vm9, %v1927_v7  ;;  %v1928_v17 = vsel %vm1906_vm8, %v1895_v15, %v1623_v19 }
 0x22c   : > { %2723 = vmatmul.mubr.msk.f32.gmra.mxu1 %vm1955_vm9, %v1928_v17 }
 0x22d   : > { %v1241_v3 = vpop.permute.xlu1 %1240 }
 0x22e   : > { %v1369_v9 = vpop.permute.xlu0 %1368  ;;  %v1830_v54 = vsel %vm1807_vm5, %v1797_v47, %v1241_v3 }
 0x22f   : > { %v1863_v53 = vsel %vm1840_vm6, %v1830_v54, %v1369_v9 }
 0x231   : > { %v1243_v34 = vpop.permute.xlu1 %1242 }
 0x232   : > { %v1371_v42 = vpop.permute.xlu0 %1370  ;;  %v1831_v4 = vsel %vm1807_vm5, %v1798_v37, %v1243_v34 }
 0x233   : > { %v1864_v5 = vsel %vm1840_vm6, %v1831_v4, %v1371_v42  ;;  %v4375_v42 = vld [vmem:[#allocation20_spill] sm:$0xff] }
 0x234   : > { %v2697_v30 = vpop.f32.mrf.mxu0 }
 0x235   : > { %v3974_v55 = vpop.permute.xlu1 %988  ;;  %v2134_v61 = vadd.f32 %v2697_v30, %v3926_v38  ;;  %v1700_v30 = vsel %vm242_vm0, %v3699_v12, %v4375_v42  ;;  %v4382_v42 = vld [vmem:[#allocation49_spill] sm:$0xff] }
 0x236   : > { %v3977_v41 = vpop.permute.xlu0 %990  ;;  %v2128_v49 = vpop.f32.mrf.mxu0  ;;  %v1733_v23 = vsel %vm1708_vm2, %v1700_v30, %v4376_v6 }
 0x237   : > { %2280 = vst.msk [vmem:[%s3936_s8 + $0x18] sm:$0xff] %vm242_vm0, %v2134_v61  ;;  %v2129_v58 = vadd.f32 %v3926_v38, %v2128_v49  ;;  %v2383_v18 = vmul.f32 %v2134_v61, %v2134_v61  ;;  %v2314_v8 = vsel %vm242_vm0, %v2134_v61, 0.0  ;;  %v1766_v57 = vsel %vm1741_vm3, %v1733_v23, %v3974_v55 }
 0x239   : > { %v1497_v33 = vpop.permute.xlu1 %1496  ;;  %2279 = vst.msk [vmem:[%s3936_s8 + $0x10] sm:$0xff] %vm242_vm0, %v2129_v58  ;;  %v2312_v13 = vsel %vm242_vm0, %v2129_v58, 0.0  ;;  %v2382_v40 = vmul.f32 %v2129_v58, %v2129_v58  ;;  %v2417_v60 = vsel %vm242_vm0, %v2383_v18, 0.0 }
 0x23a   : > { %v2313_v43 = vadd.f32 %v2312_v13, %v2311_v35  ;;  %v1499_v11 = vpop.permute.xlu0 %1498  ;;  %v1896_v32 = vsel %vm1873_vm7, %v1863_v53, %v1497_v33  ;;  %v4377_v33 = vld [vmem:[#allocation24_spill] sm:$0xff] }
 0x23b   : > { %v2415_v10 = vsel %vm242_vm0, %v2382_v40, 0.0  ;;  %v1897_v62 = vsel %vm1873_vm7, %v1864_v5, %v1499_v11  ;;  %v1701_v0 = vsel %vm242_vm0, %v3714_v36, %v4377_v33  ;;  %v4378_v40 = vld [vmem:[#allocation47_spill] sm:$0xff] }
 0x23c   : > { %v2416_v29 = vadd.f32 %v2415_v10, %v2414_v56  ;;  %v2315_v52 = vadd.f32 %v2314_v8, %v2313_v43  ;;  %v1734_v12 = vsel %vm1708_vm2, %v1701_v0, %v4378_v40 }
 0x23d   : > { %v1117_v46 = vpop.permute.xlu1 %1116  ;;  %v1767_v44 = vsel %vm1741_vm3, %v1734_v12, %v3977_v41 }
 0x23e   : > { %v1119_v51 = vpop.permute.xlu0 %1118  ;;  %v2418_v28 = vadd.f32 %v2417_v60, %v2416_v29  ;;  %v1799_v16 = vsel %vm1774_vm4, %v1766_v57, %v1117_v46 }
 0x23f   : > { %v1800_v43 = vsel %vm1774_vm4, %v1767_v44, %v1119_v51 }
 0x241   : > { %v1625_v26 = vpop.permute.xlu1 %1624 }
 0x242   : > { %v1929_v14 = vsel %vm1906_vm8, %v1896_v32, %v1625_v26  ;;  %v1627_v50 = vpop.permute.xlu0 %1626 }
 0x243   : > { %2725 = vmatprep.mubr.msk.f32.mxu1 %vm1955_vm9, %v1929_v14  ;;  %v1930_v35 = vsel %vm1906_vm8, %v1897_v62, %v1627_v50 }
 0x244   : > { %2726 = vmatmul.mubr.msk.f32.gmra.mxu1 %vm1955_vm9, %v1930_v35 }
 0x245   : > { %v1245_v59 = vpop.permute.xlu1 %1244 }
 0x246   : > { %v1373_v20 = vpop.permute.xlu0 %1372  ;;  %v1832_v24 = vsel %vm1807_vm5, %v1799_v16, %v1245_v59  ;;  %v389_v59 = vld [vmem:[#allocation2 + $0x138] sm:$0xff] }
 0x247   : > { %v1865_v55 = vsel %vm1840_vm6, %v1832_v24, %v1373_v20 }
 0x248   : > { %v2700_v27 = vpop.f32.mrf.mxu0 }
 0x249   : > { %v1247_v2 = vpop.permute.xlu1 %1246  ;;  %v2144_v48 = vadd.f32 %v2700_v27, %v3926_v38 }
 0x24a   : > { %v1375_v31 = vpop.permute.xlu0 %1374  ;;  %v2138_v56 = vpop.f32.mrf.mxu0  ;;  %v1833_v36 = vsel %vm1807_vm5, %v1800_v43, %v1247_v2 }
 0x24b   : > { %2282 = vst.msk [vmem:[%s3936_s8 + $0x28] sm:$0xff] %vm242_vm0, %v2144_v48  ;;  %v2139_v22 = vadd.f32 %v3926_v38, %v2138_v56  ;;  %v2385_v7 = vmul.f32 %v2144_v48, %v2144_v48  ;;  %v2318_v9 = vsel %vm242_vm0, %v2144_v48, 0.0  ;;  %v1866_v47 = vsel %vm1840_vm6, %v1833_v36, %v1375_v31  ;;  %v390_v48 = vld [vmem:[#allocation2 + $0x140] sm:$0xff]  ;;  %v4379_v31 = vld [vmem:[#allocation22_spill] sm:$0xff] }
 0x24c   : > { %v1702_v56 = vsel %vm242_vm0, %v389_v59, %v4379_v31 }
 0x24d   : > { %v4016_v25 = vpop.permute.xlu1 %992  ;;  %2281 = vst.msk [vmem:[%s3936_s8 + $0x20] sm:$0xff] %vm242_vm0, %v2139_v22  ;;  %v2316_v15 = vsel %vm242_vm0, %v2139_v22, 0.0  ;;  %v2384_v19 = vmul.f32 %v2139_v22, %v2139_v22  ;;  %v2421_v1 = vsel %vm242_vm0, %v2385_v7, 0.0  ;;  %v4380_v7 = vld [vmem:[#allocation46_spill] sm:$0xff] }
 0x24e   : > { %v2317_v17 = vadd.f32 %v2316_v15, %v2315_v52  ;;  %v4021_v3 = vpop.permute.xlu0 %994  ;;  %v1735_v15 = vsel %vm1708_vm2, %v1702_v56, %v4380_v7 }
 0x24f   : > { %v2419_v34 = vsel %vm242_vm0, %v2384_v19, 0.0  ;;  %v4381_v19 = vld [vmem:[#allocation26_spill] sm:$0xff] }
 0x250   : > { %v2420_v61 = vadd.f32 %v2419_v34, %v2418_v28  ;;  %v2319_v58 = vadd.f32 %v2318_v9, %v2317_v17  ;;  %v1703_v17 = vsel %vm242_vm0, %v390_v48, %v4381_v19  ;;  %v1768_v9 = vsel %vm1741_vm3, %v1735_v15, %v4016_v25 }
 0x251   : > { %v1501_v49 = vpop.permute.xlu1 %1500  ;;  %v1736_v30 = vsel %vm1708_vm2, %v1703_v17, %v4382_v42 }
 0x252   : > { %v1503_v18 = vpop.permute.xlu0 %1502  ;;  %v2422_v13 = vadd.f32 %v2421_v1, %v2420_v61  ;;  %v1898_v63 = vsel %vm1873_vm7, %v1865_v55, %v1501_v49  ;;  %v1769_v49 = vsel %vm1741_vm3, %v1736_v30, %v4021_v3 }
 0x253   : > { %v1899_v41 = vsel %vm1873_vm7, %v1866_v47, %v1503_v18 }
 0x255   : > { %v1121_v45 = vpop.permute.xlu1 %1120 }
 0x256   : > { %v1123_v11 = vpop.permute.xlu0 %1122  ;;  %v1801_v61 = vsel %vm1774_vm4, %v1768_v9, %v1121_v45 }
 0x257   : > { %v1802_v23 = vsel %vm1774_vm4, %v1769_v49, %v1123_v11 }
 0x259   : > { %v1629_v21 = vpop.permute.xlu1 %1628 }
 0x25a   : > { %v1931_v8 = vsel %vm1906_vm8, %v1898_v63, %v1629_v21  ;;  %v1631_v10 = vpop.permute.xlu0 %1630 }
 0x25b   : > { %2728 = vmatprep.mubr.msk.f32.mxu1 %vm1955_vm9, %v1931_v8  ;;  %v1932_v39 = vsel %vm1906_vm8, %v1899_v41, %v1631_v10 }
 0x25c   : > { %2729 = vmatmul.mubr.msk.f32.gmra.mxu1 %vm1955_vm9, %v1932_v39  ;;  %v2703_v29 = vpop.f32.mrf.mxu0 }
 0x25d   : > { %v1249_v54 = vpop.permute.xlu1 %1248  ;;  %v2154_v46 = vadd.f32 %v2703_v29, %v3926_v38 }
 0x25e   : > { %v1377_v52 = vpop.permute.xlu0 %1376  ;;  %v2148_v37 = vpop.f32.mrf.mxu0 }
 0x25f   : > { %2284 = vst.msk [vmem:[%s3936_s8 + $0x38] sm:$0xff] %vm242_vm0, %v2154_v46  ;;  %v2149_v60 = vadd.f32 %v3926_v38, %v2148_v37  ;;  %v2387_v51 = vmul.f32 %v2154_v46, %v2154_v46  ;;  %v2322_v5 = vsel %vm242_vm0, %v2154_v46, 0.0  ;;  %v391_v37 = vld [vmem:[#allocation2 + $0x150] sm:$0xff] }
 0x261   : > { %v1251_v4 = vpop.permute.xlu1 %1250  ;;  %2283 = vst.msk [vmem:[%s3936_s8 + $0x30] sm:$0xff] %vm242_vm0, %v2149_v60  ;;  %v2320_v28 = vsel %vm242_vm0, %v2149_v60, 0.0  ;;  %v2386_v53 = vmul.f32 %v2149_v60, %v2149_v60  ;;  %v2425_v20 = vsel %vm242_vm0, %v2387_v51, 0.0  ;;  %v392_v60 = vld [vmem:[#allocation2 + $0x158] sm:$0xff]  ;;  %v4383_v51 = vld [vmem:[#allocation25_spill] sm:$0xff] }
 0x262   : > { %v2321_v32 = vadd.f32 %v2320_v28, %v2319_v58  ;;  %v1379_v26 = vpop.permute.xlu0 %1378  ;;  %v1834_v58 = vsel %vm1807_vm5, %v1801_v61, %v1249_v54  ;;  %v1835_v1 = vsel %vm1807_vm5, %v1802_v23, %v1251_v4  ;;  %v1704_v28 = vsel %vm242_vm0, %v391_v37, %v4383_v51  ;;  %v4390_v37 = vld [vmem:[#allocation52_spill] sm:$0xff] }
 0x263   : > { %v2423_v14 = vsel %vm242_vm0, %v2386_v53, 0.0  ;;  %v1867_v25 = vsel %vm1840_vm6, %v1834_v58, %v1377_v52 }
 0x264   : > { %v2424_v62 = vadd.f32 %v2423_v14, %v2422_v13  ;;  %v2323_v35 = vadd.f32 %v2322_v5, %v2321_v32  ;;  %v1868_v13 = vsel %vm1840_vm6, %v1835_v1, %v1379_v26  ;;  %v4384_v32 = vld [vmem:[#allocation29_spill] sm:$0xff]  ;;  %v4385_v5 = vld [vmem:[#allocation48_spill] sm:$0xff] }
 0x265   : > { %v997_v50 = vpop.permute.xlu1 %996  ;;  %v1705_v26 = vsel %vm242_vm0, %v392_v60, %v4384_v32  ;;  %v1737_v14 = vsel %vm1708_vm2, %v1704_v28, %v4385_v5 }
 0x266   : > { %v999_v2 = vpop.permute.xlu0 %998  ;;  %v2426_v27 = vadd.f32 %v2425_v20, %v2424_v62  ;;  %v4386_v62 = vld [vmem:[#allocation51_spill] sm:$0xff]  ;;  %v1770_v59 = vsel %vm1741_vm3, %v1737_v14, %v997_v50 }
 0x269   : > { %v1505_v22 = vpop.permute.xlu1 %1504 }
 0x26a   : > { %v1507_v34 = vpop.permute.xlu0 %1506  ;;  %v1900_v0 = vsel %vm1873_vm7, %v1867_v25, %v1505_v22  ;;  %v393_v25 = vld [vmem:[#allocation2 + $0x168] sm:$0xff] }
 0x26b   : > { %v1901_v12 = vsel %vm1873_vm7, %v1868_v13, %v1507_v34 }
 0x26d   : > { %v1125_v6 = vpop.permute.xlu1 %1124 }
 0x26e   : > { %v1127_v33 = vpop.permute.xlu0 %1126  ;;  %v1803_v48 = vsel %vm1774_vm4, %v1770_v59, %v1125_v6 }
 0x270   : > { %v2706_v18 = vpop.f32.mrf.mxu0 }
 0x271   : > { %v1633_v57 = vpop.permute.xlu1 %1632  ;;  %v2164_v40 = vadd.f32 %v2706_v18, %v3926_v38 }
 0x272   : > { %v1933_v3 = vsel %vm1906_vm8, %v1900_v0, %v1633_v57  ;;  %v1635_v16 = vpop.permute.xlu0 %1634  ;;  %v2158_v44 = vpop.f32.mrf.mxu0 }
 0x273   : > { %2731 = vmatprep.mubr.msk.f32.mxu1 %vm1955_vm9, %v1933_v3  ;;  %2286 = vst.msk [vmem:[%s3936_s8 + $0x48] sm:$0xff] %vm242_vm0, %v2164_v40  ;;  %v1934_v24 = vsel %vm1906_vm8, %v1901_v12, %v1635_v16  ;;  %v2159_v45 = vadd.f32 %v3926_v38, %v2158_v44  ;;  %v2389_v36 = vmul.f32 %v2164_v40, %v2164_v40  ;;  %v2326_v47 = vsel %vm242_vm0, %v2164_v40, 0.0  ;;  %v4387_v16 = vld [vmem:[#allocation28_spill] sm:$0xff] }
 0x274   : > { %2732 = vmatmul.mubr.msk.f32.gmra.mxu1 %vm1955_vm9, %v1934_v24  ;;  %v1706_v44 = vsel %vm242_vm0, %v393_v25, %v4387_v16 }
 0x275   : > { %v1253_v43 = vpop.permute.xlu1 %1252  ;;  %2285 = vst.msk [vmem:[%s3936_s8 + $0x40] sm:$0xff] %vm242_vm0, %v2159_v45  ;;  %v2324_v11 = vsel %vm242_vm0, %v2159_v45, 0.0  ;;  %v2388_v55 = vmul.f32 %v2159_v45, %v2159_v45  ;;  %v2429_v54 = vsel %vm242_vm0, %v2389_v36, 0.0 }
 0x276   : > { %v2325_v63 = vadd.f32 %v2324_v11, %v2323_v35  ;;  %v1381_v21 = vpop.permute.xlu0 %1380  ;;  %v1738_v35 = vsel %vm1708_vm2, %v1705_v26, %v4386_v62  ;;  %v1836_v56 = vsel %vm1807_vm5, %v1803_v48, %v1253_v43  ;;  %v4388_v43 = vld [vmem:[#allocation50_spill] sm:$0xff] }
 0x277   : > { %v2427_v8 = vsel %vm242_vm0, %v2388_v55, 0.0  ;;  %v1869_v50 = vsel %vm1840_vm6, %v1836_v56, %v1381_v21  ;;  %v1739_v36 = vsel %vm1708_vm2, %v1706_v44, %v4388_v43 }
 0x278   : > { %v2428_v41 = vadd.f32 %v2427_v8, %v2426_v27  ;;  %v2327_v39 = vadd.f32 %v2326_v47, %v2325_v63  ;;  %v1771_v27 = vsel %vm1741_vm3, %v1738_v35, %v999_v2  ;;  %v394_v8 = vld [vmem:[#allocation2 + $0x170] sm:$0xff] }
 0x279   : > { %v1255_v10 = vpop.permute.xlu1 %1254  ;;  %v1804_v31 = vsel %vm1774_vm4, %v1771_v27, %v1127_v33 }
 0x27a   : > { %v1383_v29 = vpop.permute.xlu0 %1382  ;;  %v2430_v46 = vadd.f32 %v2429_v54, %v2428_v41  ;;  %v1837_v15 = vsel %vm1807_vm5, %v1804_v31, %v1255_v10 }
 0x27b   : > { %v1870_v34 = vsel %vm1840_vm6, %v1837_v15, %v1383_v29 }
 0x27d   : > { %v1001_v52 = vpop.permute.xlu1 %1000 }
 0x27e   : > { %v1003_v4 = vpop.permute.xlu0 %1002  ;;  %v1772_v11 = vsel %vm1741_vm3, %v1739_v36, %v1001_v52 }
 0x281   : > { %v1509_v53 = vpop.permute.xlu1 %1508 }
 0x282   : > { %v1511_v20 = vpop.permute.xlu0 %1510  ;;  %v1902_v42 = vsel %vm1873_vm7, %v1869_v50, %v1509_v53 }
 0x283   : > { %v1903_v23 = vsel %vm1873_vm7, %v1870_v34, %v1511_v20 }
 0x284   : > { %v2709_v7 = vpop.f32.mrf.mxu0 }
 0x285   : > { %v1129_v22 = vpop.permute.xlu1 %1128  ;;  %v2174_v19 = vadd.f32 %v2709_v7, %v3926_v38 }
 0x286   : > { %v1131_v17 = vpop.permute.xlu0 %1130  ;;  %v2168_v9 = vpop.f32.mrf.mxu0  ;;  %v1805_v63 = vsel %vm1774_vm4, %v1772_v11, %v1129_v22 }
 0x287   : > { %2288 = vst.msk [vmem:[%s3936_s8 + $0x58] sm:$0xff] %vm242_vm0, %v2174_v19  ;;  %v2169_v2 = vadd.f32 %v3926_v38, %v2168_v9  ;;  %v2391_v61 = vmul.f32 %v2174_v19, %v2174_v19  ;;  %v2330_v0 = vsel %vm242_vm0, %v2174_v19, 0.0 }
 0x289   : > { %v1637_v30 = vpop.permute.xlu1 %1636  ;;  %2287 = vst.msk [vmem:[%s3936_s8 + $0x50] sm:$0xff] %vm242_vm0, %v2169_v2  ;;  %v2328_v49 = vsel %vm242_vm0, %v2169_v2, 0.0  ;;  %v2390_v58 = vmul.f32 %v2169_v2, %v2169_v2  ;;  %v2433_v12 = vsel %vm242_vm0, %v2391_v61, 0.0 }
 0x28a   : > { %v1935_v6 = vsel %vm1906_vm8, %v1902_v42, %v1637_v30  ;;  %v2329_v1 = vadd.f32 %v2328_v49, %v2327_v39  ;;  %v1639_v33 = vpop.permute.xlu0 %1638  ;;  %v4389_v39 = vld [vmem:[#allocation30_spill] sm:$0xff] }
 0x28b   : > { %2734 = vmatprep.mubr.msk.f32.mxu1 %vm1955_vm9, %v1935_v6  ;;  %v2431_v57 = vsel %vm242_vm0, %v2390_v58, 0.0  ;;  %v1936_v18 = vsel %vm1906_vm8, %v1903_v23, %v1639_v33  ;;  %v1707_v54 = vsel %vm242_vm0, %v394_v8, %v4389_v39 }
 0x28c   : > { %v2432_v13 = vadd.f32 %v2431_v57, %v2430_v46  ;;  %2735 = vmatmul.mubr.msk.f32.gmra.mxu1 %vm1955_vm9, %v1936_v18  ;;  %v2331_v40 = vadd.f32 %v2330_v0, %v2329_v1  ;;  %v1740_v52 = vsel %vm1708_vm2, %v1707_v54, %v4390_v37 }
 0x28d   : > { %v1257_v3 = vpop.permute.xlu1 %1256  ;;  %v1773_v51 = vsel %vm1741_vm3, %v1740_v52, %v1003_v4 }
 0x28e   : > { %v1385_v24 = vpop.permute.xlu0 %1384  ;;  %v2434_v45 = vadd.f32 %v2433_v12, %v2432_v13  ;;  %v1838_v21 = vsel %vm1807_vm5, %v1805_v63, %v1257_v3  ;;  %v1806_v32 = vsel %vm1774_vm4, %v1773_v51, %v1131_v17 }
 0x28f   : > { %v1871_v10 = vsel %vm1840_vm6, %v1838_v21, %v1385_v24 }
 0x291   : > { %v1259_v55 = vpop.permute.xlu1 %1258 }
 0x292   : > { %v1513_v47 = vpop.permute.xlu0 %1512  ;;  %v1839_v5 = vsel %vm1807_vm5, %v1806_v32, %v1259_v55 }
 0x293   : > { %v1904_v29 = vsel %vm1873_vm7, %v1871_v10, %v1513_v47 }
 0x295   : > { %v1387_v41 = vpop.permute.xlu1 %1386 }
 0x296   : > { %v1641_v46 = vpop.permute.xlu0 %1640  ;;  %v1872_v62 = vsel %vm1840_vm6, %v1839_v5, %v1387_v41 }
 0x297   : > { %v1937_v60 = vsel %vm1906_vm8, %v1904_v29, %v1641_v46 }
 0x298   : > { %2737 = vmatprep.mubr.msk.f32.mxu1 %vm1955_vm9, %v1937_v60  ;;  %v2712_v53 = vpop.f32.mrf.mxu0 }
 0x299   : > { %v1515_v28 = vpop.permute.xlu1 %1514  ;;  %v2184_v26 = vadd.f32 %v2712_v53, %v3926_v38 }
 0x29a   : > { %v2178_v14 = vpop.f32.mrf.mxu0  ;;  %v1905_v59 = vsel %vm1873_vm7, %v1872_v62, %v1515_v28 }
 0x29b   : > { %2290 = vst.msk [vmem:[%s3936_s8 + $0x68] sm:$0xff] %vm242_vm0, %v2184_v26  ;;  %v2179_v35 = vadd.f32 %v3926_v38, %v2178_v14  ;;  %v2393_v20 = vmul.f32 %v2184_v26, %v2184_v26  ;;  %v2334_v22 = vsel %vm242_vm0, %v2184_v26, 0.0 }
 0x29d   : > { %v1643_v4 = vpop.permute.xlu1 %1642  ;;  %2289 = vst.msk [vmem:[%s3936_s8 + $0x60] sm:$0xff] %vm242_vm0, %v2179_v35  ;;  %v2332_v27 = vsel %vm242_vm0, %v2179_v35, 0.0  ;;  %v2392_v48 = vmul.f32 %v2179_v35, %v2179_v35  ;;  %v2437_v17 = vsel %vm242_vm0, %v2393_v20, 0.0 }
 0x29e   : > { %v1938_v31 = vsel %vm1906_vm8, %v1905_v59, %v1643_v4  ;;  %v2333_v56 = vadd.f32 %v2332_v27, %v2331_v40 }
 0x29f   : > { %2738 = vmatmul.mubr.msk.f32.gmra.mxu1 %vm1955_vm9, %v1938_v31  ;;  %v2435_v7 = vsel %vm242_vm0, %v2392_v48, 0.0 }
 0x2a0   : > { %v2436_v15 = vadd.f32 %v2435_v7, %v2434_v45  ;;  %v2335_v19 = vadd.f32 %v2334_v22, %v2333_v56 }
 0x2a2   : > { %v2438_v9 = vadd.f32 %v2437_v17, %v2436_v15 }
 0x2ac   : > { %v2715_v50 = vpop.f32.mrf.mxu0 }
 0x2ad   : > { %v2194_v2 = vadd.f32 %v2715_v50, %v3926_v38 }
 0x2ae   : > { %v2188_v34 = vpop.f32.mrf.mxu0 }
 0x2af   : > { %2292 = vst.msk [vmem:[%s3936_s8 + $0x78] sm:$0xff] %vm242_vm0, %v2194_v2  ;;  %v2189_v42 = vadd.f32 %v3926_v38, %v2188_v34  ;;  %v2395_v30 = vmul.f32 %v2194_v2, %v2194_v2  ;;  %v2338_v6 = vsel %vm242_vm0, %v2194_v2, 0.0 }
 0x2b1   : > { %2291 = vst.msk [vmem:[%s3936_s8 + $0x70] sm:$0xff] %vm242_vm0, %v2189_v42  ;;  %v2336_v61 = vsel %vm242_vm0, %v2189_v42, 0.0  ;;  %v2394_v49 = vmul.f32 %v2189_v42, %v2189_v42  ;;  %v2441_v25 = vsel %vm242_vm0, %v2395_v30, 0.0 }
 0x2b2   : > { %v2337_v58 = vadd.f32 %v2336_v61, %v2335_v19 }
 0x2b3   : > { %v2439_v23 = vsel %vm242_vm0, %v2394_v49, 0.0 }
 0x2b4   : > { %v2440_v1 = vadd.f32 %v2439_v23, %v2438_v9  ;;  %v2339_v33 = vadd.f32 %v2338_v6, %v2337_v58 }
 0x2b6   : > { %v2442_v0 = vadd.f32 %v2441_v25, %v2440_v1 }
 0x2c0   : > { %v2718_v57 = vpop.f32.mrf.mxu1 }
 0x2c1   : > { %v2204_v18 = vadd.f32 %v2718_v57, %v3926_v38 }
 0x2c2   : > { %v2198_v13 = vpop.f32.mrf.mxu1 }
 0x2c3   : > { %2294 = vst.msk [vmem:[%s3936_s8 + $0x88] sm:$0xff] %vm242_vm0, %v2204_v18  ;;  %v2199_v3 = vadd.f32 %v3926_v38, %v2198_v13  ;;  %v2397_v40 = vmul.f32 %v2204_v18, %v2204_v18  ;;  %v2342_v24 = vsel %vm242_vm0, %v2204_v18, 0.0 }
 0x2c5   : > { %2293 = vst.msk [vmem:[%s3936_s8 + $0x80] sm:$0xff] %vm242_vm0, %v2199_v3  ;;  %v2340_v12 = vsel %vm242_vm0, %v2199_v3, 0.0  ;;  %v2396_v16 = vmul.f32 %v2199_v3, %v2199_v3  ;;  %v2445_v11 = vsel %vm242_vm0, %v2397_v40, 0.0 }
 0x2c6   : > { %v2341_v44 = vadd.f32 %v2340_v12, %v2339_v33 }
 0x2c7   : > { %v2443_v45 = vsel %vm242_vm0, %v2396_v16, 0.0 }
 0x2c8   : > { %v2444_v43 = vadd.f32 %v2443_v45, %v2442_v0  ;;  %v2343_v36 = vadd.f32 %v2342_v24, %v2341_v44 }
 0x2ca   : > { %v2446_v55 = vadd.f32 %v2445_v11, %v2444_v43 }
 0x2d4   : > { %v2721_v63 = vpop.f32.mrf.mxu1 }
 0x2d5   : > { %v2214_v21 = vadd.f32 %v2721_v63, %v3926_v38 }
 0x2d6   : > { %v2208_v47 = vpop.f32.mrf.mxu1 }
 0x2d7   : > { %2296 = vst.msk [vmem:[%s3936_s8 + $0x98] sm:$0xff] %vm242_vm0, %v2214_v21  ;;  %v2209_v8 = vadd.f32 %v3926_v38, %v2208_v47  ;;  %v2399_v41 = vmul.f32 %v2214_v21, %v2214_v21  ;;  %v2346_v29 = vsel %vm242_vm0, %v2214_v21, 0.0 }
 0x2d9   : > { %2295 = vst.msk [vmem:[%s3936_s8 + $0x90] sm:$0xff] %vm242_vm0, %v2209_v8  ;;  %v2344_v10 = vsel %vm242_vm0, %v2209_v8, 0.0  ;;  %v2398_v39 = vmul.f32 %v2209_v8, %v2209_v8  ;;  %v2449_v60 = vsel %vm242_vm0, %v2399_v41, 0.0 }
 0x2da   : > { %v2345_v54 = vadd.f32 %v2344_v10, %v2343_v36 }
 0x2db   : > { %v2447_v46 = vsel %vm242_vm0, %v2398_v39, 0.0 }
 0x2dc   : > { %v2448_v37 = vadd.f32 %v2447_v46, %v2446_v55  ;;  %v2347_v52 = vadd.f32 %v2346_v29, %v2345_v54 }
 0x2de   : > { %v2450_v51 = vadd.f32 %v2449_v60, %v2448_v37 }
 0x2ec   : > { %v2724_v28 = vpop.f32.mrf.mxu1 }
 0x2ed   : > { %v2224_v53 = vadd.f32 %v2724_v28, %v3926_v38 }
 0x2ee   : > { %v2218_v32 = vpop.f32.mrf.mxu1 }
 0x2ef   : > { %2298 = vst.msk [vmem:[%s3936_s8 + $0xa8] sm:$0xff] %vm242_vm0, %v2224_v53  ;;  %v2219_v26 = vadd.f32 %v3926_v38, %v2218_v32  ;;  %v2401_v5 = vmul.f32 %v2224_v53, %v2224_v53  ;;  %v2350_v59 = vsel %vm242_vm0, %v2224_v53, 0.0 }
 0x2f1   : > { %2297 = vst.msk [vmem:[%s3936_s8 + $0xa0] sm:$0xff] %vm242_vm0, %v2219_v26  ;;  %v2348_v14 = vsel %vm242_vm0, %v2219_v26, 0.0  ;;  %v2400_v62 = vmul.f32 %v2219_v26, %v2219_v26  ;;  %v2453_v48 = vsel %vm242_vm0, %v2401_v5, 0.0 }
 0x2f2   : > { %v2349_v35 = vadd.f32 %v2348_v14, %v2347_v52 }
 0x2f3   : > { %v2451_v4 = vsel %vm242_vm0, %v2400_v62, 0.0 }
 0x2f4   : > { %v2452_v20 = vadd.f32 %v2451_v4, %v2450_v51  ;;  %v2351_v27 = vadd.f32 %v2350_v59, %v2349_v35 }
 0x2f6   : > { %v2454_v31 = vadd.f32 %v2453_v48, %v2452_v20 }
 0x304   : > { %v2727_v56 = vpop.f32.mrf.mxu1 }
 0x305   : > { %v2234_v22 = vadd.f32 %v2727_v56, %v3926_v38 }
 0x306   : > { %v2228_v7 = vpop.f32.mrf.mxu1 }
 0x307   : > { %2300 = vst.msk [vmem:[%s3936_s8 + $0xb8] sm:$0xff] %vm242_vm0, %v2234_v22  ;;  %v2229_v15 = vadd.f32 %v3926_v38, %v2228_v7  ;;  %v2403_v19 = vmul.f32 %v2234_v22, %v2234_v22  ;;  %v2354_v2 = vsel %vm242_vm0, %v2234_v22, 0.0 }
 0x309   : > { %2299 = vst.msk [vmem:[%s3936_s8 + $0xb0] sm:$0xff] %vm242_vm0, %v2229_v15  ;;  %v2352_v17 = vsel %vm242_vm0, %v2229_v15, 0.0  ;;  %v2402_v9 = vmul.f32 %v2229_v15, %v2229_v15  ;;  %v2457_v61 = vsel %vm242_vm0, %v2403_v19, 0.0 }
 0x30a   : > { %v2353_v50 = vadd.f32 %v2352_v17, %v2351_v27 }
 0x30b   : > { %v2455_v34 = vsel %vm242_vm0, %v2402_v9, 0.0 }
 0x30c   : > { %v2456_v42 = vadd.f32 %v2455_v34, %v2454_v31  ;;  %v2355_v30 = vadd.f32 %v2354_v2, %v2353_v50 }
 0x30e   : > { %v2458_v49 = vadd.f32 %v2457_v61, %v2456_v42 }
 0x31c   : > { %v2730_v58 = vpop.f32.mrf.mxu1 }
 0x31d   : > { %v2244_v6 = vadd.f32 %v2730_v58, %v3926_v38 }
 0x31e   : > { %v2238_v23 = vpop.f32.mrf.mxu1 }
 0x31f   : > { %2302 = vst.msk [vmem:[%s3936_s8 + $0xc8] sm:$0xff] %vm242_vm0, %v2244_v6  ;;  %v2239_v1 = vadd.f32 %v3926_v38, %v2238_v23  ;;  %v2405_v45 = vmul.f32 %v2244_v6, %v2244_v6  ;;  %v2358_v11 = vsel %vm242_vm0, %v2244_v6, 0.0 }
 0x321   : > { %2301 = vst.msk [vmem:[%s3936_s8 + $0xc0] sm:$0xff] %vm242_vm0, %v2239_v1  ;;  %v2404_v13 = vmul.f32 %v2239_v1, %v2239_v1  ;;  %v2356_v12 = vsel %vm242_vm0, %v2239_v1, 0.0  ;;  %v2461_v21 = vsel %vm242_vm0, %v2405_v45, 0.0 }
 0x322   : > { %v2357_v24 = vadd.f32 %v2356_v12, %v2355_v30 }
 0x323   : > { %v2459_v44 = vsel %vm242_vm0, %v2404_v13, 0.0 }
 0x324   : > { %v2460_v36 = vadd.f32 %v2459_v44, %v2458_v49  ;;  %v2359_v63 = vadd.f32 %v2358_v11, %v2357_v24 }
 0x326   : > { %v2462_v41 = vadd.f32 %v2461_v21, %v2460_v36 }
 0x334   : > { %v2733_v33 = vpop.f32.mrf.mxu1 }
 0x335   : > { %v2254_v25 = vadd.f32 %v2733_v33, %v3926_v38 }
 0x336   : > { %v2248_v0 = vpop.f32.mrf.mxu1 }
 0x337   : > { %2304 = vst.msk [vmem:[%s3936_s8 + $0xd8] sm:$0xff] %vm242_vm0, %v2254_v25  ;;  %v2249_v57 = vadd.f32 %v3926_v38, %v2248_v0  ;;  %v2407_v10 = vmul.f32 %v2254_v25, %v2254_v25  ;;  %v2362_v29 = vsel %vm242_vm0, %v2254_v25, 0.0 }
 0x339   : > { %2303 = vst.msk [vmem:[%s3936_s8 + $0xd0] sm:$0xff] %vm242_vm0, %v2249_v57  ;;  %v2406_v43 = vmul.f32 %v2249_v57, %v2249_v57  ;;  %v2360_v55 = vsel %vm242_vm0, %v2249_v57, 0.0  ;;  %v2465_v52 = vsel %vm242_vm0, %v2407_v10, 0.0 }
 0x33a   : > { %v2361_v8 = vadd.f32 %v2360_v55, %v2359_v63 }
 0x33b   : > { %v2463_v47 = vsel %vm242_vm0, %v2406_v43, 0.0 }
 0x33c   : > { %v2464_v54 = vadd.f32 %v2463_v47, %v2462_v41  ;;  %v2363_v37 = vadd.f32 %v2362_v29, %v2361_v8 }
 0x33e   : > { %v2466_v28 = vadd.f32 %v2465_v52, %v2464_v54 }
 0x34c   : > { %v2736_v18 = vpop.f32.mrf.mxu1 }
 0x34d   : > { %v2264_v3 = vadd.f32 %v2736_v18, %v3926_v38 }
 0x34e   : > { %v2258_v40 = vpop.f32.mrf.mxu1 }
 0x34f   : > { %2306 = vst.msk [vmem:[%s3936_s8 + $0xe8] sm:$0xff] %vm242_vm0, %v2264_v3  ;;  %v2259_v16 = vadd.f32 %v3926_v38, %v2258_v40  ;;  %v2409_v32 = vmul.f32 %v2264_v3, %v2264_v3  ;;  %v2366_v62 = vsel %vm242_vm0, %v2264_v3, 0.0 }
 0x351   : > { %2305 = vst.msk [vmem:[%s3936_s8 + $0xe0] sm:$0xff] %vm242_vm0, %v2259_v16  ;;  %v2408_v39 = vmul.f32 %v2259_v16, %v2259_v16  ;;  %v2364_v46 = vsel %vm242_vm0, %v2259_v16, 0.0  ;;  %v2469_v4 = vsel %vm242_vm0, %v2409_v32, 0.0 }
 0x352   : > { %v2365_v51 = vadd.f32 %v2364_v46, %v2363_v37 }
 0x353   : > { %v2467_v60 = vsel %vm242_vm0, %v2408_v39, 0.0 }
 0x354   : > { %v2468_v5 = vadd.f32 %v2467_v60, %v2466_v28  ;;  %v2367_v59 = vadd.f32 %v2366_v62, %v2365_v51 }
 0x356   : > { %v2470_v56 = vadd.f32 %v2469_v4, %v2468_v5 }
 0x35f   : > { %v2739_v53 = vpop.f32.mrf.mxu1 }
 0x360   : > { %v2274_v26 = vadd.f32 %v2739_v53, %v3926_v38 }
 0x361   : > { %v2268_v14 = vpop.f32.mrf.mxu1 }
 0x362   : > { %2308 = vst.msk [vmem:[%s3936_s8 + $0xf8] sm:$0xff] %vm242_vm0, %v2274_v26  ;;  %v2269_v35 = vadd.f32 %v3926_v38, %v2268_v14  ;;  %v2411_v20 = vmul.f32 %v2274_v26, %v2274_v26  ;;  %v2370_v22 = vsel %vm242_vm0, %v2274_v26, 0.0 }
 0x364   : > { %2307 = vst.msk [vmem:[%s3936_s8 + $0xf0] sm:$0xff] %vm242_vm0, %v2269_v35  ;;  %v2368_v27 = vsel %vm242_vm0, %v2269_v35, 0.0  ;;  %v2410_v48 = vmul.f32 %v2269_v35, %v2269_v35  ;;  %v2473_v38 = vsel %vm242_vm0, %v2411_v20, 0.0 }
 0x365   : > { %v2369_v31 = vadd.f32 %v2368_v27, %v2367_v59 }
 0x366   : > { %v2471_v7 = vsel %vm242_vm0, %v2410_v48, 0.0 }
 0x367   : > { %v2371_v15 = vadd.f32 %v2370_v22, %v2369_v31  ;;  %v2472_v19 = vadd.f32 %v2471_v7, %v2470_v56 }
 0x369   : > { %v2372_v17 = vrot.slane %v2371_v15, 4  ;;  %v2474_v9 = vadd.f32 %v2473_v38, %v2472_v19 }
 0x36b   : > { %v2373_v50 = vadd.f32 %v2372_v17, %v2371_v15  ;;  %v2475_v2 = vrot.slane %v2474_v9, 4 }
 0x36d   : > { %v2374_v34 = vrot.slane %v2373_v50, 2  ;;  %v2476_v42 = vadd.f32 %v2475_v2, %v2474_v9 }
 0x36f   : > { %v2375_v30 = vadd.f32 %v2374_v34, %v2373_v50  ;;  %v2477_v61 = vrot.slane %v2476_v42, 2 }
 0x371   : > { %v2376_v49 = vrot.slane %v2375_v30, 1  ;;  %v2478_v58 = vadd.f32 %v2477_v61, %v2476_v42 }
 0x373   : > { %v2377_v6 = vadd.f32 %v2376_v49, %v2375_v30  ;;  %v2479_v23 = vrot.slane %v2478_v58, 1 }
 0x375   : > { %2379 = vst.msk [vmem:[%s238_s10] sm:$0x1] %vm2378_vm10, %v2377_v6  ;;  %v2480_v1 = vadd.f32 %v2479_v23, %v2478_v58 }
 0x377   : > { %2481 = vst.msk [vmem:[%s241_s13] sm:$0x1] %vm2378_vm10, %v2480_v1 }
 0x378 PF: > { %s16_s18 = sadd.s32 1, %s2791_s18  }
 0x379   : > { %p13_p4 = scmp.ge.s32.totalorder %s16_s18, 4  }
 0x37b   :  { %15 = sbr.rel (!%p13_p4) target bundleno = 1 (0x1), region = 88 }

// kernel: unet_module_forward.4
= control target key start
LH: loop header
LB: loop body
LE: loop exit
PB: predicated region body
PF: predicated region fallthrough
CT: control target
= control target key end

     0   :  { %s2811_s18 = smov 0   ;;  %s4234_s0 = inlined_call_operand.vmem [shape: f32[2,16,16,4], index: 0, kind: input, shape index: {}]   ;;  %s4235_s1 = inlined_call_operand.vmem [shape: f32[36,8], index: 1, kind: input, shape index: {}]   ;;  %s4236_s2 = inlined_call_operand.vmem [shape: f32[1,8], index: 2, kind: input, shape index: {}]   ;;  %s4237_s3 = inlined_call_operand.vmem [shape: f32[2,16,16,8], index: 3, kind: output, shape index: {0}]   ;;  %s4238_s4 = inlined_call_operand.vmem [shape: f32[2,1,8], index: 4, kind: output, shape index: {1}]   ;;  %s4239_s5 = inlined_call_operand.vmem [shape: f32[2,1,8], index: 5, kind: output, shape index: {2}]  }
   0x1 LB: > { %s2587_s19 = sadd.s32 4294967295, %s2770_s18   ;;  %p2591_p0 = scmp.ge.s32.totalorder %s2770_s18, 1  ;;  %s2770_s18 = sphi %s2811_s18, %s16_s18  }
   0x2   : > { %p192_p1 = scmp.lt.s32.totalorder %s2770_s18, 3 }
   0x4   : > { %p193_p2 = pnand %p2591_p0, %p192_p1 }
   0x6   : > { %196 = sbr.rel (%p193_p2) target bundleno = 888 (0x378), region = 32 }
   0xb   : > { %vm242_vm0 = vcmask 31744   ;;  %vm245_vm1 = vcmask 25600   ;;  %p2821_p3 = scmp.lt.s32.totalorder %s2587_s19, 1  ;;  %v2772_v0 = vmov 0.0   ;;  %s2773_s25 = smov 4   ;;  %vm2048_vm2 = vcmask 1043456  }
   0xc   : > { %243 = vst.msk [vmem:[#allocation2] sm:$0xff] %vm242_vm0, %v2772_v0  ;;  %244 = vst.msk [vmem:[#allocation2 + $0x8] sm:$0xff] %vm242_vm0, %v2772_v0  ;;  %s2774_s26 = smov 8   ;;  %s2775_s27 = smov 12   ;;  %vm1708_vm3 = vcmask 64512   ;;  %vm1741_vm4 = vcmask 97280  }
   0xd   : > { %247 = vst.msk [vmem:[#allocation2 + $0x18] sm:$0xff] %vm242_vm0, %v2772_v0  ;;  %248 = vst.msk [vmem:[#allocation2 + $0x20] sm:$0xff] %vm242_vm0, %v2772_v0  ;;  %s4370_s19 = smov (!%p2821_p3, %s2587_s19), 1  ;;  %s2776_s28 = smov 16   ;;  %vm1774_vm5 = vcmask 130048   ;;  %vm1807_vm6 = vcmask 162816  }
   0xe   : > { %250 = vst.msk [vmem:[#allocation2 + $0x30] sm:$0xff] %vm242_vm0, %v2772_v0  ;;  %251 = vst.msk [vmem:[#allocation2 + $0x38] sm:$0xff] %vm242_vm0, %v2772_v0  ;;  %s2632_s21 = sshll.u32 %s4370_s19, 8  ;;  %s2777_s8 = smov 20   ;;  %vm1840_vm7 = vcmask 195584   ;;  %vm1873_vm8 = vcmask 228352  }
   0xf   : > { %253 = vst.msk [vmem:[#allocation2 + $0x48] sm:$0xff] %vm242_vm0, %v2772_v0  ;;  %254 = vst.msk [vmem:[#allocation2 + $0x50] sm:$0xff] %vm242_vm0, %v2772_v0  ;;  %s2891_s24 = scalar_lea.vmem %s4234_s0, %s2632_s21  ;;  %s2778_s13 = smov 24   ;;  %vm1906_vm9 = vcmask 261120   ;;  %vm1951_vm10 = vcmask 293888   ;;  %vm2378_vm11 = vcmask 57344  }
  0x10   : > { %256 = vst.msk [vmem:[#allocation2 + $0x60] sm:$0xff] %vm242_vm0, %v2772_v0  ;;  %257 = vst.msk [vmem:[#allocation2 + $0x68] sm:$0xff] %vm242_vm0, %v2772_v0  ;;  %v298_v1 = vld [vmem:[%s2891_s24] sm:$0xff]  ;;  %v300_v2 = vld [vmem:[%s2891_s24 + $0x10] sm:$0xff]  ;;  %s2779_s16 = smov 28   ;;  %s2780_s17 = smov 32  }
  0x11   : > { %259 = vst.msk [vmem:[#allocation2 + $0x78] sm:$0xff] %vm242_vm0, %v2772_v0  ;;  %260 = vst.msk [vmem:[#allocation2 + $0x80] sm:$0xff] %vm242_vm0, %v2772_v0  ;;  %v299_v3 = vld [vmem:[%s2891_s24 + $0x8] sm:$0xff]  ;;  %v302_v4 = vld [vmem:[%s2891_s24 + $0x20] sm:$0xff]  ;;  %s241_s30 = scalar_lea.vmem %s4239_s5, %s4370_s19 }
  0x12   : > { %262 = vst.msk [vmem:[#allocation2 + $0x90] sm:$0xff] %vm242_vm0, %v2772_v0  ;;  %263 = vst.msk [vmem:[#allocation2 + $0x98] sm:$0xff] %vm242_vm0, %v2772_v0  ;;  %v301_v5 = vld [vmem:[%s2891_s24 + $0x18] sm:$0xff]  ;;  %v304_v6 = vld [vmem:[%s2891_s24 + $0x30] sm:$0xff] }
  0x13   : > { %265 = vst.msk [vmem:[#allocation2 + $0xa8] sm:$0xff] %vm242_vm0, %v2772_v0  ;;  %266 = vst.msk [vmem:[#allocation2 + $0xb0] sm:$0xff] %vm242_vm0, %v2772_v0  ;;  %v395_v7 = vld [vmem:[#allocation2 + $0x1] sm:$0xff]  ;;  %v305_v11 = vld [vmem:[%s2891_s24 + $0x38] sm:$0xff] }
  0x14   : > { %268 = vst.msk [vmem:[#allocation2 + $0xc0] sm:$0xff] %vm242_vm0, %v2772_v0  ;;  %269 = vst.msk [vmem:[#allocation2 + $0xc8] sm:$0xff] %vm242_vm0, %v2772_v0  ;;  %v303_v9 = vld [vmem:[%s2891_s24 + $0x28] sm:$0xff]  ;;  %684 = vrot.lane.b32.xlu0 %v395_v7, %s2773_s25  ;;  %v306_v10 = vld [vmem:[%s2891_s24 + $0x40] sm:$0xff] }
  0x15   : > { %271 = vst.msk [vmem:[#allocation2 + $0xd8] sm:$0xff] %vm242_vm0, %v2772_v0  ;;  %272 = vst.msk [vmem:[#allocation2 + $0xe0] sm:$0xff] %vm242_vm0, %v2772_v0  ;;  %v308_v12 = vld [vmem:[%s2891_s24 + $0x50] sm:$0xff]  ;;  %v307_v13 = vld [vmem:[%s2891_s24 + $0x48] sm:$0xff] }
  0x16   : > { %274 = vst.msk [vmem:[#allocation2 + $0xf0] sm:$0xff] %vm242_vm0, %v2772_v0  ;;  %275 = vst.msk [vmem:[#allocation2 + $0xf8] sm:$0xff] %vm242_vm0, %v2772_v0  ;;  %v310_v14 = vld [vmem:[%s2891_s24 + $0x60] sm:$0xff]  ;;  %v309_v15 = vld [vmem:[%s2891_s24 + $0x58] sm:$0xff] }
  0x17   : > { %277 = vst.msk [vmem:[#allocation2 + $0x108] sm:$0xff] %vm242_vm0, %v2772_v0  ;;  %278 = vst.msk [vmem:[#allocation2 + $0x110] sm:$0xff] %vm242_vm0, %v2772_v0  ;;  %v312_v16 = vld [vmem:[%s2891_s24 + $0x70] sm:$0xff]  ;;  %v311_v17 = vld [vmem:[%s2891_s24 + $0x68] sm:$0xff] }
  0x18   : > { %280 = vst.msk [vmem:[#allocation2 + $0x120] sm:$0xff] %vm242_vm0, %v2772_v0  ;;  %281 = vst.msk [vmem:[#allocation2 + $0x128] sm:$0xff] %vm242_vm0, %v2772_v0  ;;  %v314_v18 = vld [vmem:[%s2891_s24 + $0x80] sm:$0xff]  ;;  %v313_v19 = vld [vmem:[%s2891_s24 + $0x78] sm:$0xff] }
  0x19   : > { %283 = vst.msk [vmem:[#allocation2 + $0x138] sm:$0xff] %vm242_vm0, %v2772_v0  ;;  %284 = vst.msk [vmem:[#allocation2 + $0x140] sm:$0xff] %vm242_vm0, %v2772_v0  ;;  %v316_v20 = vld [vmem:[%s2891_s24 + $0x90] sm:$0xff]  ;;  %v315_v21 = vld [vmem:[%s2891_s24 + $0x88] sm:$0xff] }
  0x1a   : > { %286 = vst.msk [vmem:[#allocation2 + $0x150] sm:$0xff] %vm242_vm0, %v2772_v0  ;;  %287 = vst.msk [vmem:[#allocation2 + $0x158] sm:$0xff] %vm242_vm0, %v2772_v0  ;;  %v318_v22 = vld [vmem:[%s2891_s24 + $0xa0] sm:$0xff]  ;;  %v317_v23 = vld [vmem:[%s2891_s24 + $0x98] sm:$0xff] }
  0x1b   : > { %289 = vst.msk [vmem:[#allocation2 + $0x168] sm:$0xff] %vm242_vm0, %v2772_v0  ;;  %290 = vst.msk [vmem:[#allocation2 + $0x170] sm:$0xff] %vm242_vm0, %v2772_v0  ;;  %v320_v24 = vld [vmem:[%s2891_s24 + $0xb0] sm:$0xff]  ;;  %v319_v28 = vld [vmem:[%s2891_s24 + $0xa8] sm:$0xff] }
  0x1c   : > { %292 = vst.msk [vmem:[#allocation2 + $0x180] sm:$0xff] %vm242_vm0, %v2772_v0  ;;  %293 = vst.msk [vmem:[#allocation2 + $0x188] sm:$0xff] %vm242_vm0, %v2772_v0  ;;  %v322_v29 = vld [vmem:[%s2891_s24 + $0xc0] sm:$0xff]  ;;  %v321_v33 = vld [vmem:[%s2891_s24 + $0xb8] sm:$0xff] }
  0x1d   : > { %295 = vst.msk [vmem:[#allocation2 + $0x198] sm:$0xff] %vm242_vm0, %v2772_v0  ;;  %296 = vst.msk [vmem:[#allocation2 + $0x1a0] sm:$0xff] %vm242_vm0, %v2772_v0  ;;  %v324_v34 = vld [vmem:[%s2891_s24 + $0xd0] sm:$0xff]  ;;  %v323_v35 = vld [vmem:[%s2891_s24 + $0xc8] sm:$0xff] }
  0x1e   : > { %246 = vst.msk [vmem:[#allocation2 + $0x10] sm:$0x3] %vm245_vm1, %v2772_v0  ;;  %249 = vst.msk [vmem:[#allocation2 + $0x28] sm:$0x3] %vm245_vm1, %v2772_v0  ;;  %v326_v36 = vld [vmem:[%s2891_s24 + $0xe0] sm:$0xff]  ;;  %v325_v37 = vld [vmem:[%s2891_s24 + $0xd8] sm:$0xff] }
  0x1f   : > { %252 = vst.msk [vmem:[#allocation2 + $0x40] sm:$0x3] %vm245_vm1, %v2772_v0  ;;  %255 = vst.msk [vmem:[#allocation2 + $0x58] sm:$0x3] %vm245_vm1, %v2772_v0  ;;  %v327_v39 = vld [vmem:[%s2891_s24 + $0xe8] sm:$0xff] }
  0x20   : > { %258 = vst.msk [vmem:[#allocation2 + $0x70] sm:$0x3] %vm245_vm1, %v2772_v0  ;;  %261 = vst.msk [vmem:[#allocation2 + $0x88] sm:$0x3] %vm245_vm1, %v2772_v0  ;;  %v427_v62 = vld [vmem:[#allocation2 + $0x2] sm:$0xff] }
  0x21   : > { %264 = vst.msk [vmem:[#allocation2 + $0xa0] sm:$0x3] %vm245_vm1, %v2772_v0  ;;  %267 = vst.msk [vmem:[#allocation2 + $0xb8] sm:$0x3] %vm245_vm1, %v2772_v0 }
  0x22   : > { %270 = vst.msk [vmem:[#allocation2 + $0xd0] sm:$0x3] %vm245_vm1, %v2772_v0  ;;  %273 = vst.msk [vmem:[#allocation2 + $0xe8] sm:$0x3] %vm245_vm1, %v2772_v0 }
  0x23   : > { %276 = vst.msk [vmem:[#allocation2 + $0x100] sm:$0x3] %vm245_vm1, %v2772_v0  ;;  %279 = vst.msk [vmem:[#allocation2 + $0x118] sm:$0x3] %vm245_vm1, %v2772_v0 }
  0x24   : > { %282 = vst.msk [vmem:[#allocation2 + $0x130] sm:$0x3] %vm245_vm1, %v2772_v0  ;;  %285 = vst.msk [vmem:[#allocation2 + $0x148] sm:$0x3] %vm245_vm1, %v2772_v0 }
  0x25   : > { %288 = vst.msk [vmem:[#allocation2 + $0x160] sm:$0x3] %vm245_vm1, %v2772_v0  ;;  %291 = vst.msk [vmem:[#allocation2 + $0x178] sm:$0x3] %vm245_vm1, %v2772_v0  ;;  %v396_v8 = vld [vmem:[#allocation2 + $0x9] sm:$0xff] }
  0x26   : > { %294 = vst.msk [vmem:[#allocation2 + $0x190] sm:$0x3] %vm245_vm1, %v2772_v0  ;;  %297 = vst.msk [vmem:[#allocation2 + $0x1a8] sm:$0x3] %vm245_vm1, %v2772_v0  ;;  %686 = vrot.lane.b32.xlu0 %v396_v8, %s2773_s25 }
  0x27   : > { %331 = vst.msk [vmem:[#allocation2 + $0x19] sm:$0xff] %vm242_vm0, %v298_v1  ;;  %333 = vst.msk [vmem:[#allocation2 + $0x31] sm:$0xff] %vm242_vm0, %v300_v2  ;;  %v428_v1 = vld [vmem:[#allocation2 + $0xa] sm:$0xff] }
  0x28   : > { %332 = vst.msk [vmem:[#allocation2 + $0x21] sm:$0xff] %vm242_vm0, %v299_v3  ;;  %335 = vst.msk [vmem:[#allocation2 + $0x49] sm:$0xff] %vm242_vm0, %v302_v4 }
  0x29   : > { %334 = vst.msk [vmem:[#allocation2 + $0x39] sm:$0xff] %vm242_vm0, %v301_v5  ;;  %337 = vst.msk [vmem:[#allocation2 + $0x61] sm:$0xff] %vm242_vm0, %v304_v6 }
  0x2a   : > { %336 = vst.msk [vmem:[#allocation2 + $0x51] sm:$0xff] %vm242_vm0, %v303_v9  ;;  %339 = vst.msk [vmem:[#allocation2 + $0x79] sm:$0xff] %vm242_vm0, %v306_v10 }
  0x2b   : > { %338 = vst.msk [vmem:[#allocation2 + $0x69] sm:$0xff] %vm242_vm0, %v305_v11  ;;  %341 = vst.msk [vmem:[#allocation2 + $0x91] sm:$0xff] %vm242_vm0, %v308_v12 }
  0x2c   : > { %340 = vst.msk [vmem:[#allocation2 + $0x81] sm:$0xff] %vm242_vm0, %v307_v13  ;;  %343 = vst.msk [vmem:[#allocation2 + $0xa9] sm:$0xff] %vm242_vm0, %v310_v14 }
  0x2d   : > { %342 = vst.msk [vmem:[#allocation2 + $0x99] sm:$0xff] %vm242_vm0, %v309_v15  ;;  %345 = vst.msk [vmem:[#allocation2 + $0xc1] sm:$0xff] %vm242_vm0, %v312_v16 }
  0x2e   : > { %344 = vst.msk [vmem:[#allocation2 + $0xb1] sm:$0xff] %vm242_vm0, %v311_v17  ;;  %347 = vst.msk [vmem:[#allocation2 + $0xd9] sm:$0xff] %vm242_vm0, %v314_v18  ;;  %v2936_v25 = vld [vmem:[#allocation2 + $0x19] sm:$0xff]  ;;  %v2938_v26 = vld [vmem:[#allocation2 + $0x31] sm:$0xff] }
  0x2f   : > { %346 = vst.msk [vmem:[#allocation2 + $0xc9] sm:$0xff] %vm242_vm0, %v313_v19  ;;  %349 = vst.msk [vmem:[#allocation2 + $0xf1] sm:$0xff] %vm242_vm0, %v316_v20  ;;  %688 = vrot.lane.b32.xlu1 %v2936_v25, %s2773_s25  ;;  %v2945_v27 = vld [vmem:[#allocation2 + $0x21] sm:$0xff]  ;;  %692 = vrot.lane.b32.xlu0 %v2938_v26, %s2773_s25  ;;  %v2953_v30 = vld [vmem:[#allocation2 + $0x49] sm:$0xff] }
  0x30   : > { %348 = vst.msk [vmem:[#allocation2 + $0xe1] sm:$0xff] %vm242_vm0, %v315_v21  ;;  %351 = vst.msk [vmem:[#allocation2 + $0x109] sm:$0xff] %vm242_vm0, %v318_v22  ;;  %v2957_v31 = vld [vmem:[#allocation2 + $0x39] sm:$0xff]  ;;  %v2961_v32 = vld [vmem:[#allocation2 + $0x61] sm:$0xff] }
  0x31   : > { %350 = vst.msk [vmem:[#allocation2 + $0xf9] sm:$0xff] %vm242_vm0, %v317_v23  ;;  %353 = vst.msk [vmem:[#allocation2 + $0x121] sm:$0xff] %vm242_vm0, %v320_v24  ;;  %v2973_v38 = vld [vmem:[#allocation2 + $0x51] sm:$0xff]  ;;  %v2981_v40 = vld [vmem:[#allocation2 + $0x79] sm:$0xff] }
  0x32   : > { %352 = vst.msk [vmem:[#allocation2 + $0x111] sm:$0xff] %vm242_vm0, %v319_v28  ;;  %355 = vst.msk [vmem:[#allocation2 + $0x139] sm:$0xff] %vm242_vm0, %v322_v29  ;;  %v2985_v41 = vld [vmem:[#allocation2 + $0x69] sm:$0xff]  ;;  %v2989_v42 = vld [vmem:[#allocation2 + $0x91] sm:$0xff] }
  0x33   : > { %690 = vrot.lane.b32.xlu1 %v2945_v27, %s2773_s25  ;;  %696 = vrot.lane.b32.xlu0 %v2953_v30, %s2773_s25  ;;  %354 = vst.msk [vmem:[#allocation2 + $0x129] sm:$0xff] %vm242_vm0, %v321_v33  ;;  %357 = vst.msk [vmem:[#allocation2 + $0x151] sm:$0xff] %vm242_vm0, %v324_v34  ;;  %v2993_v43 = vld [vmem:[#allocation2 + $0x81] sm:$0xff]  ;;  %v2997_v44 = vld [vmem:[#allocation2 + $0xa9] sm:$0xff] }
  0x34   : > { %356 = vst.msk [vmem:[#allocation2 + $0x141] sm:$0xff] %vm242_vm0, %v323_v35  ;;  %359 = vst.msk [vmem:[#allocation2 + $0x169] sm:$0xff] %vm242_vm0, %v326_v36  ;;  %v3001_v45 = vld [vmem:[#allocation2 + $0x99] sm:$0xff]  ;;  %v411_v46 = vld [vmem:[#allocation2 + $0xc1] sm:$0xff] }
  0x35   : > { %358 = vst.msk [vmem:[#allocation2 + $0x159] sm:$0xff] %vm242_vm0, %v325_v37  ;;  %360 = vst.msk [vmem:[#allocation2 + $0x171] sm:$0xff] %vm242_vm0, %v327_v39  ;;  %v3007_v47 = vld [vmem:[#allocation2 + $0xb1] sm:$0xff]  ;;  %v413_v48 = vld [vmem:[#allocation2 + $0xd9] sm:$0xff] }
  0x36   : > { %v412_v49 = vld [vmem:[#allocation2 + $0xc9] sm:$0xff]  ;;  %v415_v50 = vld [vmem:[#allocation2 + $0xf1] sm:$0xff]  ;;  %v3027_v0 = vld [vmem:[#allocation2 + $0x1a] sm:$0xff] }
  0x37   : > { %694 = vrot.lane.b32.xlu1 %v2957_v31, %s2773_s25  ;;  %700 = vrot.lane.b32.xlu0 %v2961_v32, %s2773_s25  ;;  %v414_v51 = vld [vmem:[#allocation2 + $0xe1] sm:$0xff]  ;;  %v417_v52 = vld [vmem:[#allocation2 + $0x109] sm:$0xff]  ;;  %v3032_v2 = vld [vmem:[#allocation2 + $0x32] sm:$0xff] }
  0x38   : > { %v416_v53 = vld [vmem:[#allocation2 + $0xf9] sm:$0xff]  ;;  %v419_v54 = vld [vmem:[#allocation2 + $0x121] sm:$0xff]  ;;  %v3039_v4 = vld [vmem:[#allocation2 + $0x4a] sm:$0xff] }
  0x39   : > { %v418_v55 = vld [vmem:[#allocation2 + $0x111] sm:$0xff]  ;;  %v421_v56 = vld [vmem:[#allocation2 + $0x139] sm:$0xff]  ;;  %v3035_v3 = vld [vmem:[#allocation2 + $0x22] sm:$0xff] }
  0x3a   : > { %v420_v57 = vld [vmem:[#allocation2 + $0x129] sm:$0xff]  ;;  %v423_v58 = vld [vmem:[#allocation2 + $0x151] sm:$0xff]  ;;  %v3043_v5 = vld [vmem:[#allocation2 + $0x3a] sm:$0xff] }
  0x3b   : > { %698 = vrot.lane.b32.xlu1 %v2973_v38, %s2773_s25  ;;  %704 = vrot.lane.b32.xlu0 %v2981_v40, %s2773_s25  ;;  %v422_v59 = vld [vmem:[#allocation2 + $0x141] sm:$0xff]  ;;  %v425_v60 = vld [vmem:[#allocation2 + $0x169] sm:$0xff]  ;;  %v3051_v7 = vld [vmem:[#allocation2 + $0x52] sm:$0xff] }
  0x3c   : > { %v424_v61 = vld [vmem:[#allocation2 + $0x159] sm:$0xff]  ;;  %v426_v63 = vld [vmem:[#allocation2 + $0x171] sm:$0xff]  ;;  %v3047_v6 = vld [vmem:[#allocation2 + $0x62] sm:$0xff] }
  0x3d   : > { %v3055_v8 = vld [vmem:[#allocation2 + $0x7a] sm:$0xff]  ;;  %v3059_v9 = vld [vmem:[#allocation2 + $0x6a] sm:$0xff]  ;;  %v3063_v10 = vld [vmem:[#allocation2 + $0x92] sm:$0xff] }
  0x3e   : > { %v3067_v11 = vld [vmem:[#allocation2 + $0x82] sm:$0xff]  ;;  %v3071_v12 = vld [vmem:[#allocation2 + $0xaa] sm:$0xff]  ;;  %v3075_v13 = vld [vmem:[#allocation2 + $0x9a] sm:$0xff] }
  0x3f   : > { %702 = vrot.lane.b32.xlu1 %v2985_v41, %s2773_s25  ;;  %708 = vrot.lane.b32.xlu0 %v2989_v42, %s2773_s25  ;;  %v3079_v14 = vld [vmem:[#allocation2 + $0xc2] sm:$0xff]  ;;  %v3083_v15 = vld [vmem:[#allocation2 + $0xb2] sm:$0xff]  ;;  %v445_v16 = vld [vmem:[#allocation2 + $0xda] sm:$0xff] }
  0x40   : > { %v3089_v17 = vld [vmem:[#allocation2 + $0xca] sm:$0xff]  ;;  %v447_v18 = vld [vmem:[#allocation2 + $0xf2] sm:$0xff]  ;;  %v446_v19 = vld [vmem:[#allocation2 + $0xe2] sm:$0xff] }
  0x41   : > { %v449_v20 = vld [vmem:[#allocation2 + $0x10a] sm:$0xff]  ;;  %v448_v21 = vld [vmem:[#allocation2 + $0xfa] sm:$0xff]  ;;  %v451_v22 = vld [vmem:[#allocation2 + $0x122] sm:$0xff] }
  0x42   : > { %v450_v23 = vld [vmem:[#allocation2 + $0x112] sm:$0xff]  ;;  %v453_v24 = vld [vmem:[#allocation2 + $0x13a] sm:$0xff]  ;;  %v452_v29 = vld [vmem:[#allocation2 + $0x12a] sm:$0xff] }
  0x43   : > { %706 = vrot.lane.b32.xlu1 %v2993_v43, %s2773_s25  ;;  %712 = vrot.lane.b32.xlu0 %v2997_v44, %s2773_s25  ;;  %v455_v33 = vld [vmem:[#allocation2 + $0x152] sm:$0xff]  ;;  %v454_v35 = vld [vmem:[#allocation2 + $0x142] sm:$0xff]  ;;  %v457_v37 = vld [vmem:[#allocation2 + $0x16a] sm:$0xff] }
  0x47   : > { %710 = vrot.lane.b32.xlu1 %v3001_v45, %s2773_s25  ;;  %716 = vrot.lane.b32.xlu0 %v411_v46, %s2773_s25  ;;  %v456_v46 = vld [vmem:[#allocation2 + $0x15a] sm:$0xff] }
  0x4b   : > { %714 = vrot.lane.b32.xlu1 %v3007_v47, %s2773_s25  ;;  %720 = vrot.lane.b32.xlu0 %v413_v48, %s2773_s25 }
  0x4f   : > { %718 = vrot.lane.b32.xlu1 %v412_v49, %s2773_s25  ;;  %724 = vrot.lane.b32.xlu0 %v415_v50, %s2773_s25  ;;  %v3118_v50 = vld [vmem:[#allocation2 + $0x18] sm:$0xff] }
  0x53   : > { %722 = vrot.lane.b32.xlu1 %v414_v51, %s2773_s25  ;;  %728 = vrot.lane.b32.xlu0 %v417_v52, %s2773_s25  ;;  %v458_v51 = vld [vmem:[#allocation2 + $0x172] sm:$0xff] }
  0x57   : > { %726 = vrot.lane.b32.xlu1 %v416_v53, %s2773_s25  ;;  %732 = vrot.lane.b32.xlu0 %v419_v54, %s2773_s25  ;;  %v3127_v54 = vld [vmem:[#allocation2 + $0x30] sm:$0xff] }
  0x5b   : > { %730 = vrot.lane.b32.xlu1 %v418_v55, %s2773_s25  ;;  %736 = vrot.lane.b32.xlu0 %v421_v56, %s2773_s25  ;;  %v3133_v56 = vld [vmem:[#allocation2 + $0x20] sm:$0xff] }
  0x5f   : > { %734 = vrot.lane.b32.xlu1 %v420_v57, %s2773_s25  ;;  %740 = vrot.lane.b32.xlu0 %v423_v58, %s2773_s25  ;;  %v3139_v58 = vld [vmem:[#allocation2 + $0x48] sm:$0xff] }
  0x63   : > { %738 = vrot.lane.b32.xlu1 %v422_v59, %s2773_s25  ;;  %744 = vrot.lane.b32.xlu0 %v425_v60, %s2773_s25  ;;  %v3145_v60 = vld [vmem:[#allocation2 + $0x38] sm:$0xff] }
  0x67   : > { %742 = vrot.lane.b32.xlu1 %v424_v61, %s2773_s25  ;;  %812 = vrot.lane.b32.xlu0 %v427_v62, %s2774_s26  ;;  %v3151_v62 = vld [vmem:[#allocation2 + $0x60] sm:$0xff] }
  0x6b   : > { %746 = vrot.lane.b32.xlu1 %v426_v63, %s2773_s25  ;;  %816 = vrot.lane.b32.xlu0 %v3027_v0, %s2774_s26  ;;  %s3908_s25 = scalar_lea.vmem %s4237_s3, %s2632_s21 }
  0x6f   : > { %814 = vrot.lane.b32.xlu1 %v428_v1, %s2774_s26  ;;  %820 = vrot.lane.b32.xlu0 %v3032_v2, %s2774_s26  ;;  %v3157_v1 = vld [vmem:[#allocation2 + $0x50] sm:$0xff] }
  0x73   : > { %818 = vrot.lane.b32.xlu1 %v3035_v3, %s2774_s26  ;;  %824 = vrot.lane.b32.xlu0 %v3039_v4, %s2774_s26 }
  0x77   : > { %822 = vrot.lane.b32.xlu1 %v3043_v5, %s2774_s26  ;;  %828 = vrot.lane.b32.xlu0 %v3047_v6, %s2774_s26 }
  0x7b   : > { %826 = vrot.lane.b32.xlu1 %v3051_v7, %s2774_s26  ;;  %832 = vrot.lane.b32.xlu0 %v3055_v8, %s2774_s26 }
  0x7f   : > { %830 = vrot.lane.b32.xlu1 %v3059_v9, %s2774_s26  ;;  %836 = vrot.lane.b32.xlu0 %v3063_v10, %s2774_s26 }
  0x83   : > { %834 = vrot.lane.b32.xlu1 %v3067_v11, %s2774_s26  ;;  %840 = vrot.lane.b32.xlu0 %v3071_v12, %s2774_s26 }
  0x86   : > { %v3099_v28 = vpop.permute.xlu0 %684 }
  0x87   : > { %838 = vrot.lane.b32.xlu1 %v3075_v13, %s2774_s26  ;;  %844 = vrot.lane.b32.xlu0 %v3079_v14, %s2774_s26 }
  0x8b   : > { %842 = vrot.lane.b32.xlu1 %v3083_v15, %s2774_s26  ;;  %848 = vrot.lane.b32.xlu0 %v445_v16, %s2774_s26 }
  0x8f   : > { %846 = vrot.lane.b32.xlu1 %v3089_v17, %s2774_s26  ;;  %852 = vrot.lane.b32.xlu0 %v447_v18, %s2774_s26  ;;  %v3163_v18 = vld [vmem:[#allocation2 + $0x78] sm:$0xff] }
  0x93   : > { %850 = vrot.lane.b32.xlu1 %v446_v19, %s2774_s26  ;;  %856 = vrot.lane.b32.xlu0 %v449_v20, %s2774_s26  ;;  %v3169_v20 = vld [vmem:[#allocation2 + $0x68] sm:$0xff] }
  0x97   : > { %854 = vrot.lane.b32.xlu1 %v448_v21, %s2774_s26  ;;  %860 = vrot.lane.b32.xlu0 %v451_v22, %s2774_s26  ;;  %v3175_v22 = vld [vmem:[#allocation2 + $0x90] sm:$0xff] }
  0x98   : > { %v3103_v34 = vpop.permute.xlu0 %686 }
  0x9b   : > { %858 = vrot.lane.b32.xlu1 %v450_v23, %s2774_s26  ;;  %864 = vrot.lane.b32.xlu0 %v453_v24, %s2774_s26  ;;  %v3181_v24 = vld [vmem:[#allocation2 + $0x80] sm:$0xff] }
  0x9f   : > { %862 = vrot.lane.b32.xlu1 %v452_v29, %s2774_s26  ;;  %868 = vrot.lane.b32.xlu0 %v455_v33, %s2774_s26  ;;  %v3187_v33 = vld [vmem:[#allocation2 + $0xa8] sm:$0xff] }
  0xa0   : > { %4256 = vst [vmem:[#allocation14_spill] sm:$0xff] %v3187_v33 }
  0xa1   : > { %v3107_v36 = vpop.permute.xlu1 %688  ;;  %v3109_v39 = vpop.permute.xlu0 %692 }
  0xa3   : > { %866 = vrot.lane.b32.xlu1 %v454_v35, %s2774_s26  ;;  %872 = vrot.lane.b32.xlu0 %v457_v37, %s2774_s26  ;;  %v3193_v37 = vld [vmem:[#allocation2 + $0x98] sm:$0xff] }
  0xa4   : > { %4258 = vst [vmem:[#allocation16_spill] sm:$0xff] %v3193_v37 }
  0xa5   : > { %v3113_v48 = vpop.permute.xlu1 %690  ;;  %v3115_v49 = vpop.permute.xlu0 %696 }
  0xa7   : > { %870 = vrot.lane.b32.xlu1 %v456_v46, %s2774_s26  ;;  %940 = vrot.lane.b32.xlu0 %v3118_v50, %s2775_s27 }
  0xa9   : > { %v3122_v52 = vpop.permute.xlu1 %694  ;;  %v3124_v53 = vpop.permute.xlu0 %700 }
  0xaa   : > { %4245 = vst [vmem:[#allocation3_spill] sm:$0xff] %v3124_v53  ;;  %v1943_v53 = vld [vmem:[%s4235_s1 + $0x20] sm:$0xf] }
  0xab   : > { %874 = vrot.lane.b32.xlu1 %v458_v51, %s2774_s26  ;;  %944 = vrot.lane.b32.xlu0 %v3127_v54, %s2775_s27  ;;  %v3199_v51 = vld [vmem:[#allocation2 + $0xc0] sm:$0xff] }
  0xac   : > { %2671 = vmatprep.subr.msk.mxu0 %vm2048_vm2, %v1943_v53  ;;  %2729 = vmatprep.subr.msk.mxu1 %vm2048_vm2, %v1943_v53 }
  0xad   : > { %v3131_v55 = vpop.permute.xlu1 %698  ;;  %v3135_v57 = vpop.permute.xlu0 %704  ;;  %2672 = vmatpush3.msk.msra.mxu0 %vm2048_vm2, %v1943_v53  ;;  %2734 = vmatpush3.msk.msra.mxu1 %vm2048_vm2, %v1943_v53  ;;  %v1939_v53 = vld [vmem:[%s4235_s1] sm:$0xff] }
  0xae   : > { %4246 = vst [vmem:[#allocation4_spill] sm:$0xff] %v3131_v55  ;;  %4247 = vst [vmem:[#allocation5_spill] sm:$0xff] %v3135_v57  ;;  %v3241_v57 = vld [vmem:[#allocation2 + $0xf8] sm:$0xff] }
  0xaf   : > { %942 = vrot.lane.b32.xlu1 %v3133_v56, %s2775_s27  ;;  %948 = vrot.lane.b32.xlu0 %v3139_v58, %s2775_s27 }
  0xb1   : > { %v3143_v59 = vpop.permute.xlu1 %702  ;;  %v3147_v61 = vpop.permute.xlu0 %708 }
  0xb2   : > { %4248 = vst [vmem:[#allocation6_spill] sm:$0xff] %v3143_v59  ;;  %4249 = vst [vmem:[#allocation7_spill] sm:$0xff] %v3147_v61  ;;  %v3229_v61 = vld [vmem:[#allocation2 + $0xe0] sm:$0xff] }
  0xb3   : > { %946 = vrot.lane.b32.xlu1 %v3145_v60, %s2775_s27  ;;  %952 = vrot.lane.b32.xlu0 %v3151_v62, %s2775_s27 }
  0xb5   : > { %v3155_v63 = vpop.permute.xlu1 %706  ;;  %v3159_v16 = vpop.permute.xlu0 %712 }
  0xb6   : > { %4250 = vst [vmem:[#allocation8_spill] sm:$0xff] %v3155_v63  ;;  %4251 = vst [vmem:[#allocation9_spill] sm:$0xff] %v3159_v16  ;;  %v3217_v16 = vld [vmem:[#allocation2 + $0xc8] sm:$0xff] }
  0xb7   : > { %950 = vrot.lane.b32.xlu1 %v3157_v1, %s2775_s27  ;;  %956 = vrot.lane.b32.xlu0 %v3163_v18, %s2775_s27 }
  0xb9   : > { %v3167_v19 = vpop.permute.xlu1 %710  ;;  %v3171_v21 = vpop.permute.xlu0 %716 }
  0xba   : > { %4252 = vst [vmem:[#allocation10_spill] sm:$0xff] %v3167_v19  ;;  %4253 = vst [vmem:[#allocation11_spill] sm:$0xff] %v3171_v21  ;;  %v3205_v21 = vld [vmem:[#allocation2 + $0xb0] sm:$0xff] }
  0xbb   : > { %954 = vrot.lane.b32.xlu1 %v3169_v20, %s2775_s27  ;;  %960 = vrot.lane.b32.xlu0 %v3175_v22, %s2775_s27  ;;  %4261 = vst [vmem:[#allocation19_spill] sm:$0xff] %v3205_v21 }
  0xbd   : > { %v3179_v23 = vpop.permute.xlu1 %714  ;;  %v3183_v29 = vpop.permute.xlu0 %720 }
  0xbe   : > { %4254 = vst [vmem:[#allocation12_spill] sm:$0xff] %v3179_v23  ;;  %4255 = vst [vmem:[#allocation13_spill] sm:$0xff] %v3183_v29 }
  0xbf   : > { %958 = vrot.lane.b32.xlu1 %v3181_v24, %s2775_s27  ;;  %964 = vrot.lane.b32.xlu0 %v3187_v33, %s2775_s27 }
  0xc1   : > { %v3191_v35 = vpop.permute.xlu1 %718  ;;  %v3195_v46 = vpop.permute.xlu0 %724 }
  0xc2   : > { %4257 = vst [vmem:[#allocation15_spill] sm:$0xff] %v3191_v35  ;;  %4259 = vst [vmem:[#allocation17_spill] sm:$0xff] %v3195_v46  ;;  %v3211_v35 = vld [vmem:[#allocation2 + $0xd8] sm:$0xff] }
  0xc3   : > { %962 = vrot.lane.b32.xlu1 %v3193_v37, %s2775_s27  ;;  %968 = vrot.lane.b32.xlu0 %v3199_v51, %s2775_s27 }
  0xc5   : > { %v3203_v29 = vpop.permute.xlu1 %722  ;;  %v3207_v23 = vpop.permute.xlu0 %728 }
  0xc6   : > { %4260 = vst [vmem:[#allocation18_spill] sm:$0xff] %v3203_v29  ;;  %4262 = vst [vmem:[#allocation20_spill] sm:$0xff] %v3207_v23  ;;  %v3223_v29 = vld [vmem:[#allocation2 + $0xf0] sm:$0xff] }
  0xc7   : > { %966 = vrot.lane.b32.xlu1 %v3205_v21, %s2775_s27  ;;  %972 = vrot.lane.b32.xlu0 %v3211_v35, %s2775_s27 }
  0xc9   : > { %v3215_v46 = vpop.permute.xlu1 %726  ;;  %v3219_v19 = vpop.permute.xlu0 %732 }
  0xca   : > { %4263 = vst [vmem:[#allocation21_spill] sm:$0xff] %v3215_v46  ;;  %4264 = vst [vmem:[#allocation22_spill] sm:$0xff] %v3219_v19  ;;  %v3235_v46 = vld [vmem:[#allocation2 + $0x108] sm:$0xff] }
  0xcb   : > { %970 = vrot.lane.b32.xlu1 %v3217_v16, %s2775_s27  ;;  %976 = vrot.lane.b32.xlu0 %v3223_v29, %s2775_s27 }
  0xcd   : > { %v3227_v23 = vpop.permute.xlu1 %730  ;;  %v3231_v63 = vpop.permute.xlu0 %736 }
  0xce   : > { %4265 = vst [vmem:[#allocation23_spill] sm:$0xff] %v3227_v23  ;;  %4266 = vst [vmem:[#allocation24_spill] sm:$0xff] %v3231_v63  ;;  %v3251_v23 = vld [vmem:[#allocation2 + $0x110] sm:$0xff] }
  0xcf   : > { %974 = vrot.lane.b32.xlu1 %v3229_v61, %s2775_s27  ;;  %980 = vrot.lane.b32.xlu0 %v3235_v46, %s2775_s27  ;;  %4270 = vst [vmem:[#allocation28_spill] sm:$0xff] %v3251_v23 }
  0xd1   : > { %v3239_v19 = vpop.permute.xlu1 %734  ;;  %v3243_v59 = vpop.permute.xlu0 %740 }
  0xd2   : > { %4267 = vst [vmem:[#allocation25_spill] sm:$0xff] %v3239_v19  ;;  %4268 = vst [vmem:[#allocation26_spill] sm:$0xff] %v3243_v59 }
  0xd3   : > { %978 = vrot.lane.b32.xlu1 %v3241_v57, %s2775_s27  ;;  %1068 = vrot.lane.b32.xlu0 %v2936_v25, %s2776_s28  ;;  %v1942_v25 = vld [vmem:[%s4235_s1 + $0x18] sm:$0xff] }
  0xd4   : > { %2673 = vmatprep.subr.mxu0 %v1942_v25  ;;  %2730 = vmatprep.subr.mxu1 %v1942_v25 }
  0xd5   : > { %v3249_v63 = vpop.permute.xlu1 %738  ;;  %v3256_v19 = vpop.permute.xlu0 %744  ;;  %2674 = vmatpush3.msra.mxu0 %v1942_v25  ;;  %2735 = vmatpush3.msra.mxu1 %v1942_v25 }
  0xd6   : > { %4269 = vst [vmem:[#allocation27_spill] sm:$0xff] %v3249_v63  ;;  %4271 = vst [vmem:[#allocation29_spill] sm:$0xff] %v3256_v19  ;;  %v1941_v19 = vld [vmem:[%s4235_s1 + $0x10] sm:$0xff] }
  0xd7   : > { %982 = vrot.lane.b32.xlu1 %v3251_v23, %s2775_s27  ;;  %1196 = vrot.lane.b32.xlu0 %v3027_v0, %s2777_s8  ;;  %v1940_v0 = vld [vmem:[%s4235_s1 + $0x8] sm:$0xff] }
  0xd8   : > { %2675 = vmatprep.subr.mxu0 %v1941_v19  ;;  %2731 = vmatprep.subr.mxu1 %v1941_v19 }
  0xd9   : > { %v3265_v59 = vpop.permute.xlu1 %742  ;;  %v3270_v63 = vpop.permute.xlu0 %812  ;;  %2676 = vmatpush3.msra.mxu0 %v1941_v19  ;;  %2736 = vmatpush3.msra.mxu1 %v1941_v19 }
  0xda   : > { %4272 = vst [vmem:[#allocation30_spill] sm:$0xff] %v3265_v59  ;;  %2677 = vmatprep.subr.mxu0 %v1940_v0  ;;  %2732 = vmatprep.subr.mxu1 %v1940_v0 }
  0xdb   : > { %1070 = vrot.lane.b32.xlu1 %v2945_v27, %s2776_s28  ;;  %1324 = vrot.lane.b32.xlu0 %v3127_v54, %s2778_s13 }
  0xdc   : > { %2678 = vmatpush3.msra.mxu0 %v1940_v0  ;;  %2737 = vmatpush3.msra.mxu1 %v1940_v0 }
  0xdd   : > { %v3279_v59 = vpop.permute.xlu1 %746  ;;  %v3284_v27 = vpop.permute.xlu0 %816  ;;  %2679 = vmatprep.subr.mxu0 %v1939_v53  ;;  %2733 = vmatprep.subr.mxu1 %v1939_v53 }
  0xde   : > { %4273 = vst [vmem:[#allocation31_spill] sm:$0xff] %v3279_v59  ;;  %2680 = vmatpush3.msra.mxu0 %v1939_v53  ;;  %2738 = vmatpush3.msra.mxu1 %v1939_v53 }
  0xdf   : > { %1198 = vrot.lane.b32.xlu1 %v3035_v3, %s2777_s8  ;;  %1452 = vrot.lane.b32.xlu0 %v2938_v26, %s2779_s16 }
  0xe1   : > { %v3290_v59 = vpop.permute.xlu1 %814  ;;  %v3292_v23 = vpop.permute.xlu0 %820 }
  0xe3   : > { %1326 = vrot.lane.b32.xlu1 %v3145_v60, %s2778_s13  ;;  %1454 = vrot.lane.b32.xlu0 %v2957_v31, %s2779_s16 }
  0xe5   : > { %v3298_v3 = vpop.permute.xlu1 %818  ;;  %v3300_v25 = vpop.permute.xlu0 %824 }
  0xe7   : > { %1072 = vrot.lane.b32.xlu1 %v2938_v26, %s2776_s28  ;;  %1074 = vrot.lane.b32.xlu0 %v2957_v31, %s2776_s28 }
  0xe9   : > { %v3306_v19 = vpop.permute.xlu1 %822  ;;  %v3308_v55 = vpop.permute.xlu0 %828 }
  0xea   : > { %4274 = vst [vmem:[#allocation32_spill] sm:$0xff] %v3308_v55 }
  0xeb   : > { %1580 = vrot.lane.b32.xlu1 %v3032_v2, %s2780_s17  ;;  %1582 = vrot.lane.b32.xlu0 %v3043_v5, %s2780_s17 }
  0xed   : > { %v3314_v0 = vpop.permute.xlu1 %826  ;;  %v3316_v53 = vpop.permute.xlu0 %832 }
  0xee   : > { %4275 = vst [vmem:[#allocation33_spill] sm:$0xff] %v3314_v0  ;;  %4276 = vst [vmem:[#allocation34_spill] sm:$0xff] %v3316_v53 }
  0xef   : > { %1200 = vrot.lane.b32.xlu1 %v3032_v2, %s2777_s8  ;;  %1328 = vrot.lane.b32.xlu0 %v3139_v58, %s2778_s13 }
  0xf1   : > { %v3322_v26 = vpop.permute.xlu1 %830  ;;  %v3324_v31 = vpop.permute.xlu0 %836 }
  0xf2   : > { %4277 = vst [vmem:[#allocation35_spill] sm:$0xff] %v3324_v31 }
  0xf3   : > { %1202 = vrot.lane.b32.xlu1 %v3043_v5, %s2777_s8  ;;  %1456 = vrot.lane.b32.xlu0 %v2953_v30, %s2779_s16 }
  0xf5   : > { %v3330_v55 = vpop.permute.xlu1 %834  ;;  %v3332_v0 = vpop.permute.xlu0 %840 }
  0xf6   : > { %4278 = vst [vmem:[#allocation36_spill] sm:$0xff] %v3332_v0 }
  0xf7   : > { %1330 = vrot.lane.b32.xlu1 %v3157_v1, %s2778_s13  ;;  %1458 = vrot.lane.b32.xlu0 %v2973_v38, %s2779_s16 }
  0xf9   : > { %v3338_v2 = vpop.permute.xlu1 %838  ;;  %v3340_v53 = vpop.permute.xlu0 %844 }
  0xfa   : > { %4279 = vst [vmem:[#allocation37_spill] sm:$0xff] %v3338_v2  ;;  %4280 = vst [vmem:[#allocation38_spill] sm:$0xff] %v3340_v53 }
  0xfb   : > { %1076 = vrot.lane.b32.xlu1 %v2953_v30, %s2776_s28  ;;  %1078 = vrot.lane.b32.xlu0 %v2973_v38, %s2776_s28 }
  0xfd   : > { %v3346_v5 = vpop.permute.xlu1 %842  ;;  %v3348_v31 = vpop.permute.xlu0 %848 }
  0xfe   : > { %4281 = vst [vmem:[#allocation39_spill] sm:$0xff] %v3346_v5  ;;  %4282 = vst [vmem:[#allocation40_spill] sm:$0xff] %v3348_v31 }
  0xff   : > { %1584 = vrot.lane.b32.xlu1 %v3039_v4, %s2780_s17  ;;  %1586 = vrot.lane.b32.xlu0 %v3051_v7, %s2780_s17 }
 0x101   : > { %v3354_v0 = vpop.permute.xlu1 %846  ;;  %v3356_v2 = vpop.permute.xlu0 %852 }
 0x102   : > { %4283 = vst [vmem:[#allocation41_spill] sm:$0xff] %v3354_v0  ;;  %4284 = vst [vmem:[#allocation42_spill] sm:$0xff] %v3356_v2 }
 0x103   : > { %1204 = vrot.lane.b32.xlu1 %v3039_v4, %s2777_s8  ;;  %1332 = vrot.lane.b32.xlu0 %v3151_v62, %s2778_s13 }
 0x105   : > { %v3362_v30 = vpop.permute.xlu1 %850  ;;  %v3364_v38 = vpop.permute.xlu0 %856 }
 0x106   : > { %4285 = vst [vmem:[#allocation43_spill] sm:$0xff] %v3362_v30  ;;  %4286 = vst [vmem:[#allocation44_spill] sm:$0xff] %v3364_v38 }
 0x107   : > { %1206 = vrot.lane.b32.xlu1 %v3051_v7, %s2777_s8  ;;  %1460 = vrot.lane.b32.xlu0 %v2961_v32, %s2779_s16 }
 0x109   : > { %v3370_v31 = vpop.permute.xlu1 %854  ;;  %v3372_v0 = vpop.permute.xlu0 %860 }
 0x10a   : > { %4287 = vst [vmem:[#allocation45_spill] sm:$0xff] %v3370_v31  ;;  %4288 = vst [vmem:[#allocation46_spill] sm:$0xff] %v3372_v0 }
 0x10b   : > { %1334 = vrot.lane.b32.xlu1 %v3169_v20, %s2778_s13  ;;  %1462 = vrot.lane.b32.xlu0 %v2985_v41, %s2779_s16 }
 0x10d   : > { %v3378_v4 = vpop.permute.xlu1 %858  ;;  %v3380_v2 = vpop.permute.xlu0 %864 }
 0x10e   : > { %4289 = vst [vmem:[#allocation47_spill] sm:$0xff] %v3378_v4  ;;  %4290 = vst [vmem:[#allocation48_spill] sm:$0xff] %v3380_v2 }
 0x10f   : > { %1080 = vrot.lane.b32.xlu1 %v2961_v32, %s2776_s28  ;;  %1082 = vrot.lane.b32.xlu0 %v2985_v41, %s2776_s28 }
 0x111   : > { %v3386_v7 = vpop.permute.xlu1 %862  ;;  %v3388_v38 = vpop.permute.xlu0 %868 }
 0x112   : > { %4291 = vst [vmem:[#allocation49_spill] sm:$0xff] %v3386_v7  ;;  %4292 = vst [vmem:[#allocation50_spill] sm:$0xff] %v3388_v38 }
 0x113   : > { %1588 = vrot.lane.b32.xlu1 %v3047_v6, %s2780_s17  ;;  %1590 = vrot.lane.b32.xlu0 %v3059_v9, %s2780_s17 }
 0x115   : > { %v3394_v0 = vpop.permute.xlu1 %866  ;;  %v3396_v4 = vpop.permute.xlu0 %872 }
 0x116   : > { %4293 = vst [vmem:[#allocation51_spill] sm:$0xff] %v3394_v0  ;;  %4294 = vst [vmem:[#allocation52_spill] sm:$0xff] %v3396_v4 }
 0x117   : > { %1208 = vrot.lane.b32.xlu1 %v3047_v6, %s2777_s8  ;;  %1336 = vrot.lane.b32.xlu0 %v3163_v18, %s2778_s13 }
 0x119   : > { %v3402_v32 = vpop.permute.xlu1 %870  ;;  %v3404_v41 = vpop.permute.xlu0 %940 }
 0x11a   : > { %4295 = vst [vmem:[#allocation53_spill] sm:$0xff] %v3402_v32 }
 0x11b   : > { %1210 = vrot.lane.b32.xlu1 %v3059_v9, %s2777_s8  ;;  %1464 = vrot.lane.b32.xlu0 %v2981_v40, %s2779_s16 }
 0x11d   : > { %v3410_v38 = vpop.permute.xlu1 %874  ;;  %v3412_v0 = vpop.permute.xlu0 %944 }
 0x11e   : > { %4296 = vst [vmem:[#allocation54_spill] sm:$0xff] %v3410_v38 }
 0x11f   : > { %1338 = vrot.lane.b32.xlu1 %v3181_v24, %s2778_s13  ;;  %1466 = vrot.lane.b32.xlu0 %v2993_v43, %s2779_s16 }
 0x121   : > { %v3418_v6 = vpop.permute.xlu1 %942  ;;  %v3420_v4 = vpop.permute.xlu0 %948 }
 0x123   : > { %1084 = vrot.lane.b32.xlu1 %v2981_v40, %s2776_s28  ;;  %1086 = vrot.lane.b32.xlu0 %v2993_v43, %s2776_s28 }
 0x125   : > { %v3426_v9 = vpop.permute.xlu1 %946  ;;  %v3428_v38 = vpop.permute.xlu0 %952 }
 0x127   : > { %1592 = vrot.lane.b32.xlu1 %v3055_v8, %s2780_s17  ;;  %1594 = vrot.lane.b32.xlu0 %v3067_v11, %s2780_s17 }
 0x129   : > { %v3434_v32 = vpop.permute.xlu1 %950  ;;  %v3436_v2 = vpop.permute.xlu0 %956 }
 0x12b   : > { %1212 = vrot.lane.b32.xlu1 %v3055_v8, %s2777_s8  ;;  %1340 = vrot.lane.b32.xlu0 %v3175_v22, %s2778_s13 }
 0x12d   : > { %v3442_v40 = vpop.permute.xlu1 %954  ;;  %v3444_v43 = vpop.permute.xlu0 %960 }
 0x12f   : > { %1214 = vrot.lane.b32.xlu1 %v3067_v11, %s2777_s8  ;;  %1468 = vrot.lane.b32.xlu0 %v2989_v42, %s2779_s16 }
 0x131   : > { %v3450_v7 = vpop.permute.xlu1 %958  ;;  %v3452_v31 = vpop.permute.xlu0 %964 }
 0x132   : > { %4297 = vst [vmem:[#allocation55_spill] sm:$0xff] %v3452_v31 }
 0x133   : > { %1342 = vrot.lane.b32.xlu1 %v3193_v37, %s2778_s13  ;;  %1470 = vrot.lane.b32.xlu0 %v3001_v45, %s2779_s16 }
 0x135   : > { %v3458_v8 = vpop.permute.xlu1 %962  ;;  %v3460_v30 = vpop.permute.xlu0 %968 }
 0x136   : > { %4298 = vst [vmem:[#allocation56_spill] sm:$0xff] %v3460_v30  ;;  %v364_v30 = vld [vmem:[#allocation2 + $0x8] sm:$0xff] }
 0x137   : > { %1088 = vrot.lane.b32.xlu1 %v2989_v42, %s2776_s28  ;;  %1090 = vrot.lane.b32.xlu0 %v3001_v45, %s2776_s28 }
 0x139   : > { %v3466_v11 = vpop.permute.xlu1 %966  ;;  %v3468_v53 = vpop.permute.xlu0 %972 }
 0x13a   : > { %4299 = vst [vmem:[#allocation57_spill] sm:$0xff] %v3466_v11  ;;  %4300 = vst [vmem:[#allocation58_spill] sm:$0xff] %v3468_v53 }
 0x13b   : > { %1596 = vrot.lane.b32.xlu1 %v3063_v10, %s2780_s17  ;;  %1598 = vrot.lane.b32.xlu0 %v3075_v13, %s2780_s17 }
 0x13d   : > { %v3474_v5 = vpop.permute.xlu1 %970  ;;  %v3476_v31 = vpop.permute.xlu0 %976 }
 0x13e   : > { %4301 = vst [vmem:[#allocation59_spill] sm:$0xff] %v3474_v5  ;;  %4302 = vst [vmem:[#allocation60_spill] sm:$0xff] %v3476_v31 }
 0x13f   : > { %1216 = vrot.lane.b32.xlu1 %v3063_v10, %s2777_s8  ;;  %1344 = vrot.lane.b32.xlu0 %v3187_v33, %s2778_s13  ;;  %v503_v10 = vld [vmem:[#allocation2 + $0xa9] sm:$0xff]  ;;  %v1677_v33 = vsel %vm242_vm0, %v364_v30, %v3103_v34 }
 0x141   : > { %v3482_v42 = vpop.permute.xlu1 %974  ;;  %v3484_v45 = vpop.permute.xlu0 %980 }
 0x142   : > { %4303 = vst [vmem:[#allocation61_spill] sm:$0xff] %v3482_v42  ;;  %4304 = vst [vmem:[#allocation62_spill] sm:$0xff] %v3484_v45 }
 0x143   : > { %1218 = vrot.lane.b32.xlu1 %v3075_v13, %s2777_s8  ;;  %1472 = vrot.lane.b32.xlu0 %v2997_v44, %s2779_s16 }
 0x145   : > { %v3490_v53 = vpop.permute.xlu1 %978  ;;  %v1069_v5 = vpop.permute.xlu0 %1068 }
 0x146   : > { %4305 = vst [vmem:[#allocation63_spill] sm:$0xff] %v3490_v53 }
 0x147   : > { %1346 = vrot.lane.b32.xlu1 %v3205_v21, %s2778_s13  ;;  %1474 = vrot.lane.b32.xlu0 %v3007_v47, %s2779_s16 }
 0x149   : > { %v3496_v31 = vpop.permute.xlu1 %982  ;;  %v1197_v42 = vpop.permute.xlu0 %1196 }
 0x14a   : > { %4306 = vst [vmem:[#allocation64_spill] sm:$0xff] %v3496_v31  ;;  %v363_v31 = vld [vmem:[#allocation2] sm:$0xff] }
 0x14b   : > { %1092 = vrot.lane.b32.xlu1 %v503_v10, %s2776_s28  ;;  %1094 = vrot.lane.b32.xlu0 %v3007_v47, %s2776_s28  ;;  %v600_v10 = vld [vmem:[#allocation2 + $0xc1] sm:$0xff]  ;;  %v1676_v21 = vsel %vm242_vm0, %v363_v31, %v3099_v28 }
 0x14d   : > { %v1071_v13 = vpop.permute.xlu1 %1070  ;;  %v1325_v44 = vpop.permute.xlu0 %1324 }
 0x14f   : > { %1600 = vrot.lane.b32.xlu1 %v3071_v12, %s2780_s17  ;;  %1602 = vrot.lane.b32.xlu0 %v3083_v15, %s2780_s17 }
 0x151   : > { %v1199_v45 = vpop.permute.xlu1 %1198  ;;  %v1453_v53 = vpop.permute.xlu0 %1452 }
 0x153   : > { %1220 = vrot.lane.b32.xlu1 %v3071_v12, %s2777_s8  ;;  %1348 = vrot.lane.b32.xlu0 %v3199_v51, %s2778_s13  ;;  %v1709_v12 = vsel %vm1708_vm3, %v1676_v21, %v3270_v63  ;;  %v1710_v51 = vsel %vm1708_vm3, %v1677_v33, %v3290_v59  ;;  %v601_v63 = vld [vmem:[#allocation2 + $0xc9] sm:$0xff] }
 0x154   : > { %v1742_v37 = vsel %vm1741_vm4, %v1709_v12, %v3404_v41  ;;  %v1743_v28 = vsel %vm1741_vm4, %v1710_v51, %v3418_v6  ;;  %v602_v51 = vld [vmem:[#allocation2 + $0xd9] sm:$0xff] }
 0x155   : > { %v1327_v47 = vpop.permute.xlu1 %1326  ;;  %v1455_v11 = vpop.permute.xlu0 %1454  ;;  %v1775_v31 = vsel %vm1774_vm5, %v1742_v37, %v1069_v5 }
 0x156   : > { %v1808_v21 = vsel %vm1807_vm6, %v1775_v31, %v1197_v42 }
 0x157   : > { %1222 = vrot.lane.b32.xlu1 %v3083_v15, %s2777_s8  ;;  %1476 = vrot.lane.b32.xlu0 %v600_v10, %s2779_s16  ;;  %v1776_v15 = vsel %vm1774_vm5, %v1743_v28, %v1071_v13  ;;  %v1841_v30 = vsel %vm1840_vm7, %v1808_v21, %v1325_v44  ;;  %v1679_v28 = vsel %vm242_vm0, %v3133_v56, %v3113_v48 }
 0x158   : > { %v1809_v59 = vsel %vm1807_vm6, %v1776_v15, %v1199_v45  ;;  %v1874_v37 = vsel %vm1873_vm8, %v1841_v30, %v1453_v53  ;;  %v634_v30 = vld [vmem:[#allocation2 + $0xda] sm:$0xff] }
 0x159   : > { %v1073_v34 = vpop.permute.xlu1 %1072  ;;  %v1075_v33 = vpop.permute.xlu0 %1074  ;;  %v1842_v41 = vsel %vm1840_vm7, %v1809_v59, %v1327_v47  ;;  %v1678_v47 = vsel %vm242_vm0, %v3118_v50, %v3107_v36  ;;  %v1712_v36 = vsel %vm1708_vm3, %v1679_v28, %v3298_v3 }
 0x15a   : > { %v1875_v42 = vsel %vm1873_vm8, %v1842_v41, %v1455_v11  ;;  %v1711_v12 = vsel %vm1708_vm3, %v1678_v47, %v3284_v27 }
 0x15b   : > { %1350 = vrot.lane.b32.xlu1 %v3217_v16, %s2778_s13  ;;  %1478 = vrot.lane.b32.xlu0 %v601_v63, %s2779_s16  ;;  %v1744_v31 = vsel %vm1741_vm4, %v1711_v12, %v3412_v0  ;;  %v603_v0 = vld [vmem:[#allocation2 + $0xe1] sm:$0xff] }
 0x15c   : > { %v1777_v50 = vsel %vm1774_vm5, %v1744_v31, %v1073_v34 }
 0x15d   : > { %v1581_v5 = vpop.permute.xlu1 %1580  ;;  %v1583_v45 = vpop.permute.xlu0 %1582 }
 0x15e   : > { %v1907_v6 = vsel %vm1906_vm9, %v1874_v37, %v1581_v5  ;;  %v1908_v16 = vsel %vm1906_vm9, %v1875_v42, %v1583_v45  ;;  %v635_v37 = vld [vmem:[#allocation2 + $0xe2] sm:$0xff]  ;;  %v328_v45 = vld [vmem:[%s2891_s24 + $0xf0] sm:$0xff] }
 0x15f   : > { %1096 = vrot.lane.b32.xlu1 %v600_v10, %s2776_s28  ;;  %2681 = vmatprep.mubr.msk.f32.mxu0 %vm1951_vm10, %v1907_v6  ;;  %361 = vst.msk [vmem:[#allocation2 + $0x181] sm:$0xff] %vm242_vm0, %v328_v45 }
 0x160   : > { %1098 = vrot.lane.b32.xlu0 %v601_v63, %s2776_s28  ;;  %2682 = vmatmul.mubr.msk.f32.vlgmr.msra.gmra.mxu0 %vm1951_vm10, %v1908_v16  ;;  %v1680_v16 = vsel %vm242_vm0, %v3127_v54, %v3109_v39 }
 0x161   : > { %v1201_v13 = vpop.permute.xlu1 %1200  ;;  %v1329_v53 = vpop.permute.xlu0 %1328 }
 0x162   : > { %v1810_v27 = vsel %vm1807_vm6, %v1777_v50, %v1201_v13 }
 0x163   : > { %1604 = vrot.lane.b32.xlu1 %v3079_v14, %s2780_s17 }
 0x164   : > { %1606 = vrot.lane.b32.xlu0 %v3089_v17, %s2780_s17 }
 0x165   : > { %v1203_v11 = vpop.permute.xlu1 %1202  ;;  %v1457_v44 = vpop.permute.xlu0 %1456 }
 0x167   : > { %1224 = vrot.lane.b32.xlu1 %v3079_v14, %s2777_s8 }
 0x168   : > { %1352 = vrot.lane.b32.xlu0 %v3211_v35, %s2778_s13  ;;  %v1745_v35 = vsel %vm1741_vm4, %v1712_v36, %v3426_v9 }
 0x169   : > { %v1331_v10 = vpop.permute.xlu1 %1330  ;;  %v1459_v14 = vpop.permute.xlu0 %1458  ;;  %v1778_v56 = vsel %vm1774_vm5, %v1745_v35, %v1075_v33 }
 0x16a   : > { %v1811_v15 = vsel %vm1807_vm6, %v1778_v56, %v1203_v11  ;;  %v604_v11 = vld [vmem:[#allocation2 + $0xf1] sm:$0xff]  ;;  %v637_v56 = vld [vmem:[#allocation2 + $0xfa] sm:$0xff] }
 0x16b   : > { %1226 = vrot.lane.b32.xlu1 %v3089_v17, %s2777_s8  ;;  %v1843_v17 = vsel %vm1840_vm7, %v1810_v27, %v1329_v53  ;;  %v1844_v3 = vsel %vm1840_vm7, %v1811_v15, %v1331_v10  ;;  %v1713_v53 = vsel %vm1708_vm3, %v1680_v16, %v3292_v23  ;;  %v636_v27 = vld [vmem:[#allocation2 + $0xf2] sm:$0xff] }
 0x16c   : > { %1480 = vrot.lane.b32.xlu0 %v602_v51, %s2779_s16  ;;  %v1876_v9 = vsel %vm1873_vm8, %v1843_v17, %v1457_v44  ;;  %v1877_v59 = vsel %vm1873_vm8, %v1844_v3, %v1459_v14  ;;  %v1681_v44 = vsel %vm242_vm0, %v3145_v60, %v3122_v52  ;;  %v1746_v47 = vsel %vm1741_vm4, %v1713_v53, %v3420_v4  ;;  %v605_v4 = vld [vmem:[#allocation2 + $0xf9] sm:$0xff] }
 0x16d   : > { %v1077_v48 = vpop.permute.xlu1 %1076  ;;  %v1079_v63 = vpop.permute.xlu0 %1078  ;;  %v1714_v39 = vsel %vm1708_vm3, %v1681_v44, %v3306_v19  ;;  %v1682_v17 = vsel %vm242_vm0, %v3139_v58, %v3115_v49 }
 0x16e   : > { %v1779_v54 = vsel %vm1774_vm5, %v1746_v47, %v1077_v48  ;;  %v1747_v23 = vsel %vm1741_vm4, %v1714_v39, %v3434_v32  ;;  %v638_v47 = vld [vmem:[#allocation2 + $0x10a] sm:$0xff]  ;;  %v639_v39 = vld [vmem:[#allocation2 + $0x112] sm:$0xff] }
 0x16f   : > { %1354 = vrot.lane.b32.xlu1 %v3229_v61, %s2778_s13  ;;  %v1780_v60 = vsel %vm1774_vm5, %v1747_v23, %v1079_v63 }
 0x170   : > { %1482 = vrot.lane.b32.xlu0 %v603_v0, %s2779_s16 }
 0x171   : > { %v1585_v34 = vpop.permute.xlu1 %1584  ;;  %v1587_v33 = vpop.permute.xlu0 %1586 }
 0x172   : > { %v1909_v21 = vsel %vm1906_vm9, %v1876_v9, %v1585_v34  ;;  %v1910_v61 = vsel %vm1906_vm9, %v1877_v59, %v1587_v33  ;;  %v1715_v9 = vsel %vm1708_vm3, %v1682_v17, %v3300_v25  ;;  %v606_v34 = vld [vmem:[#allocation2 + $0x109] sm:$0xff] }
 0x173   : > { %1100 = vrot.lane.b32.xlu1 %v602_v51, %s2776_s28  ;;  %2684 = vmatprep.mubr.msk.f32.mxu0 %vm1951_vm10, %v1909_v21  ;;  %v4307_v21 = vld [vmem:[#allocation4_spill] sm:$0xff]  ;;  %v1748_v33 = vsel %vm1741_vm4, %v1715_v9, %v3428_v38  ;;  %v609_v17 = vld [vmem:[#allocation2 + $0x129] sm:$0xff] }
 0x174   : > { %1102 = vrot.lane.b32.xlu0 %v603_v0, %s2776_s28  ;;  %2685 = vmatmul.mubr.msk.f32.gmra.mxu0 %vm1951_vm10, %v1910_v61  ;;  %v1683_v59 = vsel %vm242_vm0, %v3157_v1, %v4307_v21 }
 0x175   : > { %v1205_v41 = vpop.permute.xlu1 %1204  ;;  %v1333_v5 = vpop.permute.xlu0 %1332 }
 0x176   : > { %v1812_v12 = vsel %vm1807_vm6, %v1779_v54, %v1205_v41 }
 0x177   : > { %1608 = vrot.lane.b32.xlu1 %v634_v30, %s2780_s17  ;;  %v1845_v19 = vsel %vm1840_vm7, %v1812_v12, %v1333_v5  ;;  %v3666_v12 = vld [vmem:[#allocation2 + $0x120] sm:$0xff] }
 0x178   : > { %1610 = vrot.lane.b32.xlu0 %v635_v37, %s2780_s17 }
 0x179   : > { %v1207_v6 = vpop.permute.xlu1 %1206  ;;  %v1461_v42 = vpop.permute.xlu0 %1460 }
 0x17a   : > { %v1813_v51 = vsel %vm1807_vm6, %v1780_v60, %v1207_v6  ;;  %v1878_v31 = vsel %vm1873_vm8, %v1845_v19, %v1461_v42  ;;  %v4309_v6 = vld [vmem:[#allocation28_spill] sm:$0xff]  ;;  %v4312_v19 = vld [vmem:[#allocation6_spill] sm:$0xff] }
 0x17b   : > { %1228 = vrot.lane.b32.xlu1 %v634_v30, %s2777_s8  ;;  %v4308_v30 = vld [vmem:[#allocation33_spill] sm:$0xff] }
 0x17c   : > { %1356 = vrot.lane.b32.xlu0 %v3223_v29, %s2778_s13  ;;  %v329_v29 = vld [vmem:[%s2891_s24 + $0xf8] sm:$0xff]  ;;  %v1716_v49 = vsel %vm1708_vm3, %v1683_v59, %v4308_v30  ;;  %v641_v30 = vld [vmem:[#allocation2 + $0x12a] sm:$0xff] }
 0x17d   : > { %v1335_v13 = vpop.permute.xlu1 %1334  ;;  %v1463_v10 = vpop.permute.xlu0 %1462  ;;  %362 = vst.msk [vmem:[#allocation2 + $0x189] sm:$0xff] %vm242_vm0, %v329_v29 }
 0x17e   : > { %v1846_v32 = vsel %vm1840_vm7, %v1813_v51, %v1335_v13  ;;  %v4311_v51 = vld [vmem:[#allocation32_spill] sm:$0xff] }
 0x17f   : > { %1230 = vrot.lane.b32.xlu1 %v635_v37, %s2777_s8  ;;  %v1879_v50 = vsel %vm1873_vm8, %v1846_v32, %v1463_v10  ;;  %v607_v37 = vld [vmem:[#allocation2 + $0x111] sm:$0xff]  ;;  %v1685_v32 = vsel %vm242_vm0, %v3169_v20, %v4312_v19 }
 0x180   : > { %1484 = vrot.lane.b32.xlu0 %v604_v11, %s2779_s16 }
 0x181   : > { %v1081_v52 = vpop.permute.xlu1 %1080  ;;  %v1083_v28 = vpop.permute.xlu0 %1082 }
 0x182   : > { %v1781_v58 = vsel %vm1774_vm5, %v1748_v33, %v1081_v52  ;;  %v4310_v52 = vld [vmem:[#allocation3_spill] sm:$0xff]  ;;  %v640_v33 = vld [vmem:[#allocation2 + $0x122] sm:$0xff] }
 0x183   : > { %1358 = vrot.lane.b32.xlu1 %v3241_v57, %s2778_s13  ;;  %v1684_v60 = vsel %vm242_vm0, %v3151_v62, %v4310_v52  ;;  %v1718_v62 = vsel %vm1708_vm3, %v1685_v32, %v3322_v26  ;;  %v610_v52 = vld [vmem:[#allocation2 + $0x139] sm:$0xff] }
 0x184   : > { %1486 = vrot.lane.b32.xlu0 %v605_v4, %s2779_s16  ;;  %v642_v32 = vld [vmem:[#allocation2 + $0x13a] sm:$0xff] }
 0x185   : > { %v1589_v14 = vpop.permute.xlu1 %1588  ;;  %v1591_v35 = vpop.permute.xlu0 %1590 }
 0x186   : > { %v1911_v36 = vsel %vm1906_vm9, %v1878_v31, %v1589_v14  ;;  %v1912_v57 = vsel %vm1906_vm9, %v1879_v50, %v1591_v35  ;;  %v1751_v35 = vsel %vm1741_vm4, %v1718_v62, %v3450_v7 }
 0x187   : > { %1104 = vrot.lane.b32.xlu1 %v604_v11, %s2776_s28  ;;  %2687 = vmatprep.mubr.msk.f32.mxu0 %vm1951_vm10, %v1911_v36  ;;  %v3681_v36 = vld [vmem:[#allocation2 + $0x128] sm:$0xff] }
 0x188   : > { %1106 = vrot.lane.b32.xlu0 %v605_v4, %s2776_s28  ;;  %2688 = vmatmul.mubr.msk.f32.gmra.mxu0 %vm1951_vm10, %v1912_v57 }
 0x189   : > { %v1209_v48 = vpop.permute.xlu1 %1208  ;;  %v1337_v0 = vpop.permute.xlu0 %1336 }
 0x18a   : > { %v1814_v25 = vsel %vm1807_vm6, %v1781_v58, %v1209_v48  ;;  %v4313_v58 = vld [vmem:[#allocation5_spill] sm:$0xff] }
 0x18b   : > { %1612 = vrot.lane.b32.xlu1 %v636_v27, %s2780_s17  ;;  %v1847_v42 = vsel %vm1840_vm7, %v1814_v25, %v1337_v0  ;;  %v608_v0 = vld [vmem:[#allocation2 + $0x121] sm:$0xff] }
 0x18c   : > { %1614 = vrot.lane.b32.xlu0 %v637_v56, %s2780_s17 }
 0x18d   : > { %v1211_v15 = vpop.permute.xlu1 %1210  ;;  %v1465_v63 = vpop.permute.xlu0 %1464 }
 0x18f   : > { %1232 = vrot.lane.b32.xlu1 %v636_v27, %s2777_s8 }
 0x190   : > { %1360 = vrot.lane.b32.xlu0 %v3235_v46, %s2778_s13  ;;  %v1749_v46 = vsel %vm1741_vm4, %v1716_v49, %v3442_v40  ;;  %v1880_v40 = vsel %vm1873_vm8, %v1847_v42, %v1465_v63 }
 0x191   : > { %v1339_v3 = vpop.permute.xlu1 %1338  ;;  %v1467_v61 = vpop.permute.xlu0 %1466  ;;  %v1782_v1 = vsel %vm1774_vm5, %v1749_v46, %v1083_v28  ;;  %v1717_v28 = vsel %vm1708_vm3, %v1684_v60, %v4311_v51  ;;  %v1686_v46 = vsel %vm242_vm0, %v3163_v18, %v4313_v58 }
 0x192   : > { %v1815_v38 = vsel %vm1807_vm6, %v1782_v1, %v1211_v15  ;;  %v1750_v31 = vsel %vm1741_vm4, %v1717_v28, %v3436_v2 }
 0x193   : > { %1234 = vrot.lane.b32.xlu1 %v637_v56, %s2777_s8  ;;  %v1848_v45 = vsel %vm1840_vm7, %v1815_v38, %v1339_v3  ;;  %v4315_v38 = vld [vmem:[#allocation8_spill] sm:$0xff] }
 0x194   : > { %1488 = vrot.lane.b32.xlu0 %v606_v34, %s2779_s16  ;;  %v1881_v53 = vsel %vm1873_vm8, %v1848_v45, %v1467_v61 }
 0x195   : > { %v1085_v41 = vpop.permute.xlu1 %1084  ;;  %v1087_v5 = vpop.permute.xlu0 %1086 }
 0x196   : > { %v1783_v50 = vsel %vm1774_vm5, %v1750_v31, %v1085_v41  ;;  %v1784_v2 = vsel %vm1774_vm5, %v1751_v35, %v1087_v5  ;;  %v4314_v41 = vld [vmem:[#allocation34_spill] sm:$0xff]  ;;  %v1687_v5 = vsel %vm242_vm0, %v3181_v24, %v4315_v38  ;;  %v4316_v31 = vld [vmem:[#allocation7_spill] sm:$0xff] }
 0x197   : > { %1362 = vrot.lane.b32.xlu1 %v4309_v6, %s2778_s13  ;;  %v1719_v1 = vsel %vm1708_vm3, %v1686_v46, %v4314_v41  ;;  %v1720_v18 = vsel %vm1708_vm3, %v1687_v5, %v3330_v55  ;;  %v581_v46 = vld [vmem:[#allocation2 + $0x158] sm:$0xff] }
 0x198   : > { %1490 = vrot.lane.b32.xlu0 %v607_v37, %s2779_s16  ;;  %v1752_v6 = vsel %vm1741_vm4, %v1719_v1, %v3444_v43  ;;  %v612_v5 = vld [vmem:[#allocation2 + $0x151] sm:$0xff] }
 0x199   : > { %v1593_v16 = vpop.permute.xlu1 %1592  ;;  %v1595_v11 = vpop.permute.xlu0 %1594 }
 0x19a   : > { %v1913_v13 = vsel %vm1906_vm9, %v1880_v40, %v1593_v16  ;;  %v1914_v44 = vsel %vm1906_vm9, %v1881_v53, %v1595_v11  ;;  %v1753_v40 = vsel %vm1741_vm4, %v1720_v18, %v3458_v8  ;;  %v3732_v11 = vld [vmem:[#allocation2 + $0x140] sm:$0xff] }
 0x19b   : > { %1108 = vrot.lane.b32.xlu1 %v606_v34, %s2776_s28  ;;  %2690 = vmatprep.mubr.msk.f32.mxu0 %vm1951_vm10, %v1913_v13 }
 0x19c   : > { %1110 = vrot.lane.b32.xlu0 %v607_v37, %s2776_s28  ;;  %2691 = vmatmul.mubr.msk.f32.gmra.mxu0 %vm1951_vm10, %v1914_v44  ;;  %v578_v37 = vld [vmem:[#allocation2 + $0x138] sm:$0xff] }
 0x19d   : > { %v1213_v10 = vpop.permute.xlu1 %1212  ;;  %v1341_v54 = vpop.permute.xlu0 %1340 }
 0x19e   : > { %v1816_v57 = vsel %vm1807_vm6, %v1783_v50, %v1213_v10  ;;  %v4317_v50 = vld [vmem:[#allocation35_spill] sm:$0xff] }
 0x19f   : > { %1616 = vrot.lane.b32.xlu1 %v638_v47, %s2780_s17  ;;  %v1849_v26 = vsel %vm1840_vm7, %v1816_v57, %v1341_v54  ;;  %v643_v57 = vld [vmem:[#allocation2 + $0x142] sm:$0xff] }
 0x1a0   : > { %1618 = vrot.lane.b32.xlu0 %v639_v39, %s2780_s17 }
 0x1a1   : > { %v1215_v29 = vpop.permute.xlu1 %1214  ;;  %v1469_v23 = vpop.permute.xlu0 %1468 }
 0x1a2   : > { %v1817_v27 = vsel %vm1807_vm6, %v1784_v2, %v1215_v29  ;;  %v1882_v7 = vsel %vm1873_vm8, %v1849_v26, %v1469_v23  ;;  %v4319_v2 = vld [vmem:[#allocation16_spill] sm:$0xff] }
 0x1a3   : > { %1236 = vrot.lane.b32.xlu1 %v638_v47, %s2777_s8 }
 0x1a4   : > { %1364 = vrot.lane.b32.xlu0 %v3666_v12, %s2778_s13 }
 0x1a5   : > { %v1343_v4 = vpop.permute.xlu1 %1342  ;;  %v1471_v14 = vpop.permute.xlu0 %1470 }
 0x1a6   : > { %v1850_v56 = vsel %vm1840_vm7, %v1817_v27, %v1343_v4  ;;  %v611_v4 = vld [vmem:[#allocation2 + $0x141] sm:$0xff] }
 0x1a7   : > { %1238 = vrot.lane.b32.xlu1 %v639_v39, %s2777_s8  ;;  %v1883_v3 = vsel %vm1873_vm8, %v1850_v56, %v1471_v14  ;;  %v484_v39 = vld [vmem:[#allocation2 + $0x140] sm:$0xff]  ;;  %v1688_v14 = vsel %vm242_vm0, %v3175_v22, %v4316_v31 }
 0x1a8   : > { %1366 = vrot.lane.b32.xlu0 %v3681_v36, %s2778_s13  ;;  %v1721_v35 = vsel %vm1708_vm3, %v1688_v14, %v4317_v50 }
 0x1a9   : > { %v1089_v20 = vpop.permute.xlu1 %1088  ;;  %v1091_v48 = vpop.permute.xlu0 %1090 }
 0x1aa   : > { %v1785_v45 = vsel %vm1774_vm5, %v1752_v6, %v1089_v20  ;;  %v1786_v24 = vsel %vm1774_vm5, %v1753_v40, %v1091_v48  ;;  %v4318_v20 = vld [vmem:[#allocation10_spill] sm:$0xff]  ;;  %v4320_v48 = vld [vmem:[#allocation55_spill] sm:$0xff] }
 0x1ab   : > { %984 = vrot.lane.b32.xlu1 %v3666_v12, %s2775_s27  ;;  %v1689_v27 = vsel %vm242_vm0, %v4319_v2, %v4318_v20  ;;  %v1754_v26 = vsel %vm1741_vm4, %v1721_v35, %v4320_v48  ;;  %v4324_v40 = vld [vmem:[#allocation14_spill] sm:$0xff] }
 0x1ac   : > { %986 = vrot.lane.b32.xlu0 %v3681_v36, %s2775_s27  ;;  %v582_v20 = vld [vmem:[#allocation2 + $0x168] sm:$0xff] }
 0x1ad   : > { %v1597_v15 = vpop.permute.xlu1 %1596  ;;  %v1599_v9 = vpop.permute.xlu0 %1598 }
 0x1ae   : > { %v1915_v63 = vsel %vm1906_vm9, %v1882_v7, %v1597_v15  ;;  %v1916_v34 = vsel %vm1906_vm9, %v1883_v3, %v1599_v9  ;;  %v4322_v15 = vld [vmem:[#allocation57_spill] sm:$0xff] }
 0x1af   : > { %1492 = vrot.lane.b32.xlu1 %v608_v0, %s2779_s16  ;;  %2693 = vmatprep.mubr.msk.f32.mxu0 %vm1951_vm10, %v1915_v63 }
 0x1b0   : > { %1494 = vrot.lane.b32.xlu0 %v609_v17, %s2779_s16  ;;  %2694 = vmatmul.mubr.msk.f32.gmra.mxu0 %vm1951_vm10, %v1916_v34  ;;  %v580_v34 = vld [vmem:[#allocation2 + $0x150] sm:$0xff] }
 0x1b1   : > { %v1217_v21 = vpop.permute.xlu1 %1216  ;;  %v1345_v59 = vpop.permute.xlu0 %1344 }
 0x1b2   : > { %v1818_v16 = vsel %vm1807_vm6, %v1785_v45, %v1217_v21  ;;  %v4323_v45 = vld [vmem:[#allocation9_spill] sm:$0xff] }
 0x1b3   : > { %1112 = vrot.lane.b32.xlu1 %v608_v0, %s2776_s28  ;;  %v1851_v55 = vsel %vm1840_vm7, %v1818_v16, %v1345_v59  ;;  %v4321_v0 = vld [vmem:[#allocation37_spill] sm:$0xff]  ;;  %v1690_v16 = vsel %vm242_vm0, %v4324_v40, %v4323_v45 }
 0x1b4   : > { %1114 = vrot.lane.b32.xlu0 %v609_v17, %s2776_s28  ;;  %v1722_v22 = vsel %vm1708_vm3, %v1689_v27, %v4321_v0 }
 0x1b5   : > { %v1219_v61 = vpop.permute.xlu1 %1218  ;;  %v1473_v49 = vpop.permute.xlu0 %1472  ;;  %v1755_v63 = vsel %vm1741_vm4, %v1722_v22, %v4322_v15  ;;  %v614_v15 = vld [vmem:[#allocation2 + $0x169] sm:$0xff] }
 0x1b6   : > { %v1819_v43 = vsel %vm1807_vm6, %v1786_v24, %v1219_v61  ;;  %v1884_v8 = vsel %vm1873_vm8, %v1851_v55, %v1473_v49  ;;  %v4325_v24 = vld [vmem:[#allocation36_spill] sm:$0xff]  ;;  %v4327_v55 = vld [vmem:[#allocation19_spill] sm:$0xff] }
 0x1b7   : > { %1620 = vrot.lane.b32.xlu1 %v640_v33, %s2780_s17 }
 0x1b8   : > { %1622 = vrot.lane.b32.xlu0 %v641_v30, %s2780_s17 }
 0x1b9   : > { %v1347_v25 = vpop.permute.xlu1 %1346  ;;  %v1475_v42 = vpop.permute.xlu0 %1474 }
 0x1ba   : > { %v1852_v44 = vsel %vm1840_vm7, %v1819_v43, %v1347_v25  ;;  %v1723_v43 = vsel %vm1708_vm3, %v1690_v16, %v4325_v24 }
 0x1bb   : > { %1240 = vrot.lane.b32.xlu1 %v640_v33, %s2777_s8  ;;  %v1885_v54 = vsel %vm1873_vm8, %v1852_v44, %v1475_v42  ;;  %v613_v42 = vld [vmem:[#allocation2 + $0x159] sm:$0xff] }
 0x1bc   : > { %1368 = vrot.lane.b32.xlu0 %v578_v37, %s2778_s13 }
 0x1bd   : > { %v1093_v13 = vpop.permute.xlu1 %1092  ;;  %v1095_v53 = vpop.permute.xlu0 %1094 }
 0x1be   : > { %v1787_v7 = vsel %vm1774_vm5, %v1754_v26, %v1093_v13  ;;  %v1788_v9 = vsel %vm1774_vm5, %v1755_v63, %v1095_v53  ;;  %v4326_v53 = vld [vmem:[#allocation12_spill] sm:$0xff]  ;;  %v2756_v63 = vld [vmem:[#allocation2 + $0xc0] sm:$0xff] }
 0x1bf   : > { %1242 = vrot.lane.b32.xlu1 %v641_v30, %s2777_s8  ;;  %v1691_v44 = vsel %vm242_vm0, %v4327_v55, %v4326_v53  ;;  %v647_v55 = vld [vmem:[#allocation2 + $0x172] sm:$0xff] }
 0x1c0   : > { %1370 = vrot.lane.b32.xlu0 %v3732_v11, %s2778_s13 }
 0x1c1   : > { %v1601_v47 = vpop.permute.xlu1 %1600  ;;  %v1603_v29 = vpop.permute.xlu0 %1602 }
 0x1c2   : > { %v1917_v10 = vsel %vm1906_vm9, %v1884_v8, %v1601_v47  ;;  %v1918_v23 = vsel %vm1906_vm9, %v1885_v54, %v1603_v29  ;;  %v4328_v8 = vld [vmem:[#allocation56_spill] sm:$0xff] }
 0x1c3   : > { %988 = vrot.lane.b32.xlu1 %v578_v37, %s2775_s27  ;;  %2696 = vmatprep.mubr.msk.f32.mxu0 %vm1951_vm10, %v1917_v10  ;;  %v1756_v47 = vsel %vm1741_vm4, %v1723_v43, %v4328_v8 }
 0x1c4   : > { %990 = vrot.lane.b32.xlu0 %v484_v39, %s2775_s27  ;;  %2697 = vmatmul.mubr.msk.f32.gmra.mxu0 %vm1951_vm10, %v1918_v23  ;;  %v4329_v39 = vld [vmem:[#allocation39_spill] sm:$0xff] }
 0x1c5   : > { %v1221_v60 = vpop.permute.xlu1 %1220  ;;  %v1349_v51 = vpop.permute.xlu0 %1348  ;;  %v1724_v54 = vsel %vm1708_vm3, %v1691_v44, %v4329_v39  ;;  %v644_v23 = vld [vmem:[#allocation2 + $0x152] sm:$0xff]  ;;  %v584_v39 = vld [vmem:[#allocation2 + $0x180] sm:$0xff] }
 0x1c6   : > { %v1820_v17 = vsel %vm1807_vm6, %v1787_v7, %v1221_v60 }
 0x1c7   : > { %1496 = vrot.lane.b32.xlu1 %v610_v52, %s2779_s16  ;;  %v1853_v33 = vsel %vm1840_vm7, %v1820_v17, %v1349_v51  ;;  %v4331_v17 = vld [vmem:[#allocation11_spill] sm:$0xff] }
 0x1c8   : > { %1498 = vrot.lane.b32.xlu0 %v611_v4, %s2779_s16 }
 0x1c9   : > { %v1223_v28 = vpop.permute.xlu1 %1222  ;;  %v1477_v19 = vpop.permute.xlu0 %1476 }
 0x1ca   : > { %v1821_v21 = vsel %vm1807_vm6, %v1788_v9, %v1223_v28  ;;  %v1886_v30 = vsel %vm1873_vm8, %v1853_v33, %v1477_v19  ;;  %v645_v19 = vld [vmem:[#allocation2 + $0x15a] sm:$0xff]  ;;  %v2757_v33 = vld [vmem:[#allocation2 + $0xc8] sm:$0xff] }
 0x1cb   : > { %1116 = vrot.lane.b32.xlu1 %v610_v52, %s2776_s28  ;;  %v4330_v52 = vld [vmem:[#allocation59_spill] sm:$0xff] }
 0x1cc   : > { %1118 = vrot.lane.b32.xlu0 %v611_v4, %s2776_s28  ;;  %v1757_v60 = vsel %vm1741_vm4, %v1724_v54, %v4330_v52 }
 0x1cd   : > { %v1351_v62 = vpop.permute.xlu1 %1350  ;;  %v1479_v56 = vpop.permute.xlu0 %1478 }
 0x1ce   : > { %v1854_v61 = vsel %vm1840_vm7, %v1821_v21, %v1351_v62 }
 0x1cf   : > { %1624 = vrot.lane.b32.xlu1 %v642_v32, %s2780_s17  ;;  %v1887_v25 = vsel %vm1873_vm8, %v1854_v61, %v1479_v56  ;;  %v583_v56 = vld [vmem:[#allocation2 + $0x170] sm:$0xff] }
 0x1d0   : > { %1626 = vrot.lane.b32.xlu0 %v643_v57, %s2780_s17  ;;  %v4333_v61 = vld [vmem:[#allocation15_spill] sm:$0xff] }
 0x1d1   : > { %v1097_v3 = vpop.permute.xlu1 %1096 }
 0x1d2   : > { %v1099_v59 = vpop.permute.xlu0 %1098  ;;  %v1789_v29 = vsel %vm1774_vm5, %v1756_v47, %v1097_v3  ;;  %v1692_v3 = vsel %vm242_vm0, %v2756_v63, %v4331_v17 }
 0x1d3   : > { %1244 = vrot.lane.b32.xlu1 %v642_v32, %s2777_s8  ;;  %v1790_v28 = vsel %vm1774_vm5, %v1757_v60, %v1099_v59  ;;  %v615_v59 = vld [vmem:[#allocation2 + $0x171] sm:$0xff] }
 0x1d4   : > { %1372 = vrot.lane.b32.xlu0 %v580_v34, %s2778_s13  ;;  %v2758_v60 = vld [vmem:[#allocation2 + $0xd8] sm:$0xff] }
 0x1d5   : > { %v1605_v49 = vpop.permute.xlu1 %1604 }
 0x1d6   : > { %v1919_v58 = vsel %vm1906_vm9, %v1886_v30, %v1605_v49  ;;  %v1607_v41 = vpop.permute.xlu0 %1606  ;;  %v1693_v30 = vsel %vm242_vm0, %v2757_v33, %v4333_v61  ;;  %v4334_v49 = vld [vmem:[#allocation58_spill] sm:$0xff] }
 0x1d7   : > { %1246 = vrot.lane.b32.xlu1 %v643_v57, %s2777_s8  ;;  %2699 = vmatprep.mubr.msk.f32.mxu0 %vm1951_vm10, %v1919_v58  ;;  %v1920_v1 = vsel %vm1906_vm9, %v1887_v25, %v1607_v41  ;;  %v4335_v25 = vld [vmem:[#allocation41_spill] sm:$0xff] }
 0x1d8   : > { %1374 = vrot.lane.b32.xlu0 %v581_v46, %s2778_s13  ;;  %2700 = vmatmul.mubr.msk.f32.gmra.mxu0 %vm1951_vm10, %v1920_v1  ;;  %v1726_v41 = vsel %vm1708_vm3, %v1693_v30, %v4335_v25 }
 0x1d9   : > { %v1225_v37 = vpop.permute.xlu1 %1224 }
 0x1da   : > { %v1353_v38 = vpop.permute.xlu0 %1352  ;;  %v1822_v4 = vsel %vm1807_vm6, %v1789_v29, %v1225_v37  ;;  %v4336_v37 = vld [vmem:[#allocation61_spill] sm:$0xff] }
 0x1db   : > { %992 = vrot.lane.b32.xlu1 %v580_v34, %s2775_s27  ;;  %v1855_v14 = vsel %vm1840_vm7, %v1822_v4, %v1353_v38  ;;  %v4332_v34 = vld [vmem:[#allocation38_spill] sm:$0xff]  ;;  %v1759_v38 = vsel %vm1741_vm4, %v1726_v41, %v4336_v37  ;;  %v4337_v4 = vld [vmem:[#allocation13_spill] sm:$0xff] }
 0x1dc   : > { %994 = vrot.lane.b32.xlu0 %v581_v46, %s2775_s27  ;;  %v1725_v21 = vsel %vm1708_vm3, %v1692_v3, %v4332_v34 }
 0x1dd   : > { %v1227_v6 = vpop.permute.xlu1 %1226  ;;  %v1758_v58 = vsel %vm1741_vm4, %v1725_v21, %v4334_v49  ;;  %v648_v49 = vld [vmem:[#allocation2 + $0x182] sm:$0xff] }
 0x1de   : > { %v1481_v18 = vpop.permute.xlu0 %1480  ;;  %v1823_v32 = vsel %vm1807_vm6, %v1790_v28, %v1227_v6 }
 0x1df   : > { %1500 = vrot.lane.b32.xlu1 %v612_v5, %s2779_s16  ;;  %v1888_v50 = vsel %vm1873_vm8, %v1855_v14, %v1481_v18  ;;  %v4339_v14 = vld [vmem:[#allocation18_spill] sm:$0xff] }
 0x1e0   : > { %1502 = vrot.lane.b32.xlu0 %v613_v42, %s2779_s16 }
 0x1e1   : > { %v1355_v13 = vpop.permute.xlu1 %1354 }
 0x1e2   : > { %v1483_v10 = vpop.permute.xlu0 %1482  ;;  %v1856_v62 = vsel %vm1840_vm7, %v1823_v32, %v1355_v13  ;;  %v646_v13 = vld [vmem:[#allocation2 + $0x16a] sm:$0xff] }
 0x1e3   : > { %1120 = vrot.lane.b32.xlu1 %v612_v5, %s2776_s28  ;;  %v1889_v2 = vsel %vm1873_vm8, %v1856_v62, %v1483_v10 }
 0x1e4   : > { %1122 = vrot.lane.b32.xlu0 %v613_v42, %s2776_s28 }
 0x1e5   : > { %v1101_v51 = vpop.permute.xlu1 %1100 }
 0x1e6   : > { %v1103_v31 = vpop.permute.xlu0 %1102  ;;  %v1791_v1 = vsel %vm1774_vm5, %v1758_v58, %v1101_v51  ;;  %v1694_v51 = vsel %vm242_vm0, %v2758_v60, %v4337_v4 }
 0x1e7   : > { %1628 = vrot.lane.b32.xlu1 %v644_v23, %s2780_s17  ;;  %v1792_v42 = vsel %vm1774_vm5, %v1759_v38, %v1103_v31  ;;  %v2759_v31 = vld [vmem:[#allocation2 + $0xe0] sm:$0xff] }
 0x1e8   : > { %1630 = vrot.lane.b32.xlu0 %v645_v19, %s2780_s17  ;;  %v1695_v62 = vsel %vm242_vm0, %v2759_v31, %v4339_v14 }
 0x1e9   : > { %v1609_v35 = vpop.permute.xlu1 %1608 }
 0x1ea   : > { %v1921_v57 = vsel %vm1906_vm9, %v1888_v50, %v1609_v35  ;;  %v1611_v27 = vpop.permute.xlu0 %1610  ;;  %v4340_v50 = vld [vmem:[#allocation60_spill] sm:$0xff] }
 0x1eb   : > { %1248 = vrot.lane.b32.xlu1 %v644_v23, %s2777_s8  ;;  %2702 = vmatprep.mubr.msk.f32.mxu0 %vm1951_vm10, %v1921_v57  ;;  %v1922_v48 = vsel %vm1906_vm9, %v1889_v2, %v1611_v27  ;;  %v585_v23 = vld [vmem:[#allocation2 + $0x188] sm:$0xff] }
 0x1ec   : > { %1376 = vrot.lane.b32.xlu0 %v582_v20, %s2778_s13  ;;  %2703 = vmatmul.mubr.msk.f32.gmra.mxu0 %vm1951_vm10, %v1922_v48  ;;  %v616_v48 = vld [vmem:[#allocation2 + $0x181] sm:$0xff] }
 0x1ed   : > { %v1229_v26 = vpop.permute.xlu1 %1228 }
 0x1ee   : > { %v1357_v0 = vpop.permute.xlu0 %1356  ;;  %v1824_v5 = vsel %vm1807_vm6, %v1791_v1, %v1229_v26  ;;  %v4342_v26 = vld [vmem:[#allocation63_spill] sm:$0xff]  ;;  %v586_v1 = vld [vmem:[#allocation2 + $0x198] sm:$0xff] }
 0x1ef   : > { %1250 = vrot.lane.b32.xlu1 %v645_v19, %s2777_s8  ;;  %v1857_v40 = vsel %vm1840_vm7, %v1824_v5, %v1357_v0  ;;  %v4338_v19 = vld [vmem:[#allocation40_spill] sm:$0xff] }
 0x1f0   : > { %1378 = vrot.lane.b32.xlu0 %v583_v56, %s2778_s13  ;;  %v1727_v32 = vsel %vm1708_vm3, %v1694_v51, %v4338_v19  ;;  %v618_v5 = vld [vmem:[#allocation2 + $0x199] sm:$0xff]  ;;  %v619_v19 = vld [vmem:[#allocation2 + $0x1a1] sm:$0xff] }
 0x1f1   : > { %v1231_v22 = vpop.permute.xlu1 %1230  ;;  %v1760_v35 = vsel %vm1741_vm4, %v1727_v32, %v4340_v50  ;;  %v4348_v32 = vld [vmem:[#allocation64_spill] sm:$0xff] }
 0x1f2   : > { %v1485_v7 = vpop.permute.xlu0 %1484  ;;  %v1825_v18 = vsel %vm1807_vm6, %v1792_v42, %v1231_v22  ;;  %v3898_v42 = vld [vmem:[%s4236_s2] ss:$0 sm:$0xff] }
 0x1f3   : > { %996 = vrot.lane.b32.xlu1 %v582_v20, %s2775_s27  ;;  %v1890_v24 = vsel %vm1873_vm8, %v1857_v40, %v1485_v7  ;;  %v4341_v20 = vld [vmem:[#allocation43_spill] sm:$0xff]  ;;  %v4343_v40 = vld [vmem:[#allocation17_spill] sm:$0xff] }
 0x1f4   : > { %998 = vrot.lane.b32.xlu0 %v583_v56, %s2775_s27  ;;  %v1728_v2 = vsel %vm1708_vm3, %v1695_v62, %v4341_v20 }
 0x1f5   : > { %v1359_v9 = vpop.permute.xlu1 %1358  ;;  %v1761_v56 = vsel %vm1741_vm4, %v1728_v2, %v4342_v26 }
 0x1f6   : > { %v1487_v46 = vpop.permute.xlu0 %1486  ;;  %v1858_v16 = vsel %vm1840_vm7, %v1825_v18, %v1359_v9  ;;  %v587_v18 = vld [vmem:[#allocation2 + $0x1a0] sm:$0xff] }
 0x1f7   : > { %1504 = vrot.lane.b32.xlu1 %v614_v15, %s2779_s16  ;;  %v1891_v44 = vsel %vm1873_vm8, %v1858_v16, %v1487_v46  ;;  %v649_v46 = vld [vmem:[#allocation2 + $0x18a] sm:$0xff] }
 0x1f8   : > { %1506 = vrot.lane.b32.xlu0 %v615_v59, %s2779_s16 }
 0x1f9   : > { %v1105_v6 = vpop.permute.xlu1 %1104 }
 0x1fa   : > { %v1107_v45 = vpop.permute.xlu0 %1106  ;;  %v1793_v27 = vsel %vm1774_vm5, %v1760_v35, %v1105_v6 }
 0x1fb   : > { %1124 = vrot.lane.b32.xlu1 %v614_v15, %s2776_s28  ;;  %v1794_v7 = vsel %vm1774_vm5, %v1761_v56, %v1107_v45  ;;  %v617_v15 = vld [vmem:[#allocation2 + $0x189] sm:$0xff] }
 0x1fc   : > { %1126 = vrot.lane.b32.xlu0 %v615_v59, %s2776_s28  ;;  %v2760_v45 = vld [vmem:[#allocation2 + $0xf0] sm:$0xff] }
 0x1fd   : > { %v1613_v43 = vpop.permute.xlu1 %1612  ;;  %v1696_v16 = vsel %vm242_vm0, %v2760_v45, %v4343_v40  ;;  %v4350_v40 = vld [vmem:[#allocation44_spill] sm:$0xff] }
 0x1fe   : > { %v1923_v53 = vsel %vm1906_vm9, %v1890_v24, %v1613_v43  ;;  %v1615_v8 = vpop.permute.xlu0 %1614  ;;  %v4344_v43 = vld [vmem:[#allocation42_spill] sm:$0xff] }
 0x1ff   : > { %1632 = vrot.lane.b32.xlu1 %v646_v13, %s2780_s17  ;;  %2705 = vmatprep.mubr.msk.f32.mxu1 %vm1951_vm10, %v1923_v53  ;;  %v1924_v47 = vsel %vm1906_vm9, %v1891_v44, %v1615_v8  ;;  %v1729_v53 = vsel %vm1708_vm3, %v1696_v16, %v4344_v43  ;;  %v650_v44 = vld [vmem:[#allocation2 + $0x19a] sm:$0xff] }
 0x200   : > { %1634 = vrot.lane.b32.xlu0 %v647_v55, %s2780_s17  ;;  %2706 = vmatmul.mubr.msk.f32.vlgmr.msra.gmra.mxu1 %vm1951_vm10, %v1924_v47  ;;  %v2761_v8 = vld [vmem:[#allocation2 + $0xf8] sm:$0xff]  ;;  %v4345_v47 = vld [vmem:[#allocation21_spill] sm:$0xff] }
 0x201   : > { %v1233_v10 = vpop.permute.xlu1 %1232 }
 0x202   : > { %v1361_v54 = vpop.permute.xlu0 %1360  ;;  %v1826_v0 = vsel %vm1807_vm6, %v1793_v27, %v1233_v10  ;;  %v1697_v10 = vsel %vm242_vm0, %v2761_v8, %v4345_v47 }
 0x203   : > { %1252 = vrot.lane.b32.xlu1 %v646_v13, %s2777_s8  ;;  %v1859_v3 = vsel %vm1840_vm7, %v1826_v0, %v1361_v54 }
 0x204   : > { %1380 = vrot.lane.b32.xlu0 %v584_v39, %s2778_s13 }
 0x205   : > { %v1235_v29 = vpop.permute.xlu1 %1234 }
 0x206   : > { %v1489_v52 = vpop.permute.xlu0 %1488  ;;  %v1827_v63 = vsel %vm1807_vm6, %v1794_v7, %v1235_v29 }
 0x207   : > { %1254 = vrot.lane.b32.xlu1 %v647_v55, %s2777_s8  ;;  %v1892_v34 = vsel %vm1873_vm8, %v1859_v3, %v1489_v52  ;;  %v4347_v52 = vld [vmem:[#allocation45_spill] sm:$0xff] }
 0x208   : > { %1382 = vrot.lane.b32.xlu0 %v585_v23, %s2778_s13  ;;  %v1730_v60 = vsel %vm1708_vm3, %v1697_v10, %v4347_v52 }
 0x209   : > { %v1363_v28 = vpop.permute.xlu1 %1362  ;;  %v1763_v31 = vsel %vm1741_vm4, %v1730_v60, %v4348_v32 }
 0x20a   : > { %v1491_v57 = vpop.permute.xlu0 %1490  ;;  %v1860_v9 = vsel %vm1840_vm7, %v1827_v63, %v1363_v28 }
 0x20b   : > { %1000 = vrot.lane.b32.xlu1 %v584_v39, %s2775_s27  ;;  %v1893_v33 = vsel %vm1873_vm8, %v1860_v9, %v1491_v57  ;;  %v4346_v39 = vld [vmem:[#allocation62_spill] sm:$0xff] }
 0x20c   : > { %1002 = vrot.lane.b32.xlu0 %v585_v23, %s2775_s27  ;;  %v1762_v54 = vsel %vm1741_vm4, %v1729_v53, %v4346_v39  ;;  %v2763_v53 = vld [vmem:[#allocation2 + $0x110] sm:$0xff]  ;;  %s238_s27 = scalar_lea.vmem %s4238_s4, %s4370_s19 }
 0x20d   : > { %v1109_v22 = vpop.permute.xlu1 %1108  ;;  %v4352_v39 = vld [vmem:[#allocation47_spill] sm:$0xff] }
 0x20e   : > { %v1111_v17 = vpop.permute.xlu0 %1110  ;;  %v1795_v4 = vsel %vm1774_vm5, %v1762_v54, %v1109_v22  ;;  %v651_v22 = vld [vmem:[#allocation2 + $0x1a2] sm:$0xff] }
 0x20f   : > { %1508 = vrot.lane.b32.xlu1 %v616_v48, %s2779_s16  ;;  %v1796_v50 = vsel %vm1774_vm5, %v1763_v31, %v1111_v17 }
 0x210   : > { %1510 = vrot.lane.b32.xlu0 %v617_v15, %s2779_s16 }
 0x211   : > { %v1617_v21 = vpop.permute.xlu1 %1616 }
 0x212   : > { %v1925_v59 = vsel %vm1906_vm9, %v1892_v34, %v1617_v21  ;;  %v1619_v61 = vpop.permute.xlu0 %1618 }
 0x213   : > { %1128 = vrot.lane.b32.xlu1 %v616_v48, %s2776_s28  ;;  %2708 = vmatprep.mubr.msk.f32.mxu1 %vm1951_vm10, %v1925_v59  ;;  %v1926_v30 = vsel %vm1906_vm9, %v1893_v33, %v1619_v61 }
 0x214   : > { %1130 = vrot.lane.b32.xlu0 %v617_v15, %s2776_s28  ;;  %2709 = vmatmul.mubr.msk.f32.gmra.mxu1 %vm1951_vm10, %v1926_v30 }
 0x215   : > { %v1237_v58 = vpop.permute.xlu1 %1236 }
 0x216   : > { %v1365_v25 = vpop.permute.xlu0 %1364  ;;  %v1828_v14 = vsel %vm1807_vm6, %v1795_v4, %v1237_v58 }
 0x217   : > { %1636 = vrot.lane.b32.xlu1 %v648_v49, %s2780_s17  ;;  %v1861_v26 = vsel %vm1840_vm7, %v1828_v14, %v1365_v25 }
 0x218   : > { %1638 = vrot.lane.b32.xlu0 %v649_v46, %s2780_s17 }
 0x219   : > { %v1239_v41 = vpop.permute.xlu1 %1238 }
 0x21a   : > { %v1367_v37 = vpop.permute.xlu0 %1366  ;;  %v1829_v2 = vsel %vm1807_vm6, %v1796_v50, %v1239_v41 }
 0x21b   : > { %1256 = vrot.lane.b32.xlu1 %v648_v49, %s2777_s8  ;;  %v1862_v17 = vsel %vm1840_vm7, %v1829_v2, %v1367_v37  ;;  %v2762_v37 = vld [vmem:[#allocation2 + $0x108] sm:$0xff] }
 0x21c   : > { %1384 = vrot.lane.b32.xlu0 %v586_v1, %s2778_s13 }
 0x21d   : > { %v3890_v38 = vpop.permute.xlu1 %984 }
 0x21e   : > { %v3892_v6 = vpop.permute.xlu0 %986 }
 0x21f   : > { %1258 = vrot.lane.b32.xlu1 %v649_v46, %s2777_s8 }
 0x220   : > { %1512 = vrot.lane.b32.xlu0 %v618_v5, %s2779_s16  ;;  %v2683_v13 = vpop.f32.mrf.mxu0  ;;  %v4349_v5 = vld [vmem:[#allocation20_spill] sm:$0xff] }
 0x221   : > { %v1493_v24 = vpop.permute.xlu1 %1492  ;;  %v2124_v55 = vadd.f32 %v2683_v13, %v3898_v42 }
 0x222   : > { %v1495_v29 = vpop.permute.xlu0 %1494  ;;  %v2118_v23 = vpop.f32.mrf.mxu0  ;;  %v1894_v7 = vsel %vm1873_vm8, %v1861_v26, %v1493_v24 }
 0x223   : > { %1386 = vrot.lane.b32.xlu1 %v587_v18, %s2778_s13  ;;  %2278 = vst.msk [vmem:[%s3908_s25 + $0x8] sm:$0xff] %vm1708_vm3, %v2124_v55  ;;  %v2381_v51 = vmul.f32 %v2124_v55, %v2124_v55  ;;  %v2119_v28 = vadd.f32 %v3898_v42, %v2118_v23  ;;  %v2310_v35 = vsel %vm1708_vm3, %v2124_v55, 0.0  ;;  %v1895_v9 = vsel %vm1873_vm8, %v1862_v17, %v1495_v29  ;;  %v4351_v55 = vld [vmem:[#allocation23_spill] sm:$0xff] }
 0x224   : > { %1640 = vrot.lane.b32.xlu0 %v650_v44, %s2780_s17  ;;  %v1698_v18 = vsel %vm242_vm0, %v2762_v37, %v4349_v5  ;;  %v1699_v44 = vsel %vm242_vm0, %v2763_v53, %v4351_v55  ;;  %v4354_v5 = vld [vmem:[#allocation46_spill] sm:$0xff]  ;;  %v4356_v53 = vld [vmem:[#allocation49_spill] sm:$0xff] }
 0x225   : > { %v1113_v62 = vpop.permute.xlu1 %1112  ;;  %2277 = vst.msk [vmem:[%s3908_s25] sm:$0xff] %vm1708_vm3, %v2119_v28  ;;  %v2309_v57 = vsel %vm1708_vm3, %v2119_v28, 0.0  ;;  %v2380_v20 = vmul.f32 %v2119_v28, %v2119_v28  ;;  %v2413_v56 = vsel %vm1708_vm3, %v2381_v51, 0.0  ;;  %v1731_v16 = vsel %vm1708_vm3, %v1698_v18, %v4350_v40  ;;  %v4355_v40 = vld [vmem:[#allocation25_spill] sm:$0xff] }
 0x226   : > { %v2311_v27 = vadd.f32 %v2310_v35, %v2309_v57  ;;  %v1115_v48 = vpop.permute.xlu0 %1114  ;;  %v1764_v8 = vsel %vm1741_vm4, %v1731_v16, %v3890_v38  ;;  %v1732_v54 = vsel %vm1708_vm3, %v1699_v44, %v4352_v39  ;;  %v1701_v16 = vsel %vm242_vm0, %v3681_v36, %v4355_v40 }
 0x227   : > { %1514 = vrot.lane.b32.xlu1 %v619_v19, %s2779_s16  ;;  %v2412_v0 = vsel %vm1708_vm3, %v2380_v20, 0.0  ;;  %v1797_v29 = vsel %vm1774_vm5, %v1764_v8, %v1113_v62  ;;  %v1765_v60 = vsel %vm1741_vm4, %v1732_v54, %v3892_v6 }
 0x228   : > { %v2414_v15 = vadd.f32 %v2413_v56, %v2412_v0  ;;  %v1798_v38 = vsel %vm1774_vm5, %v1765_v60, %v1115_v48 }
 0x229   : > { %v1621_v63 = vpop.permute.xlu1 %1620 }
 0x22a   : > { %v1927_v3 = vsel %vm1906_vm9, %v1894_v7, %v1621_v63  ;;  %v1623_v34 = vpop.permute.xlu0 %1622 }
 0x22b   : > { %1642 = vrot.lane.b32.xlu1 %v651_v22, %s2780_s17  ;;  %2711 = vmatprep.mubr.msk.f32.mxu1 %vm1951_vm10, %v1927_v3  ;;  %v1928_v21 = vsel %vm1906_vm9, %v1895_v9, %v1623_v34 }
 0x22c   : > { %2712 = vmatmul.mubr.msk.f32.gmra.mxu1 %vm1951_vm10, %v1928_v21 }
 0x22d   : > { %v1241_v59 = vpop.permute.xlu1 %1240 }
 0x22e   : > { %v1369_v33 = vpop.permute.xlu0 %1368  ;;  %v1830_v4 = vsel %vm1807_vm6, %v1797_v29, %v1241_v59 }
 0x22f   : > { %v1863_v50 = vsel %vm1840_vm7, %v1830_v4, %v1369_v33 }
 0x231   : > { %v1243_v61 = vpop.permute.xlu1 %1242 }
 0x232   : > { %v1371_v30 = vpop.permute.xlu0 %1370  ;;  %v1831_v31 = vsel %vm1807_vm6, %v1798_v38, %v1243_v61 }
 0x233   : > { %v1864_v6 = vsel %vm1840_vm7, %v1831_v31, %v1371_v30 }
 0x234   : > { %v2686_v58 = vpop.f32.mrf.mxu0 }
 0x235   : > { %v3946_v49 = vpop.permute.xlu1 %988  ;;  %v2134_v46 = vadd.f32 %v2686_v58, %v3898_v42  ;;  %v4353_v58 = vld [vmem:[#allocation22_spill] sm:$0xff] }
 0x236   : > { %v3949_v25 = vpop.permute.xlu0 %990  ;;  %v2128_v41 = vpop.f32.mrf.mxu0 }
 0x237   : > { %2280 = vst.msk [vmem:[%s3908_s25 + $0x18] sm:$0xff] %vm1708_vm3, %v2134_v46  ;;  %v2129_v1 = vadd.f32 %v3898_v42, %v2128_v41  ;;  %v2383_v13 = vmul.f32 %v2134_v46, %v2134_v46  ;;  %v2314_v23 = vsel %vm1708_vm3, %v2134_v46, 0.0  ;;  %v1700_v46 = vsel %vm242_vm0, %v3666_v12, %v4353_v58  ;;  %v4360_v58 = vld [vmem:[#allocation51_spill] sm:$0xff] }
 0x238   : > { %v1733_v18 = vsel %vm1708_vm3, %v1700_v46, %v4354_v5  ;;  %v1734_v12 = vsel %vm1708_vm3, %v1701_v16, %v4356_v53 }
 0x239   : > { %v1497_v45 = vpop.permute.xlu1 %1496  ;;  %2279 = vst.msk [vmem:[%s3908_s25 + $0x10] sm:$0xff] %vm1708_vm3, %v2129_v1  ;;  %v2312_v24 = vsel %vm1708_vm3, %v2129_v1, 0.0  ;;  %v2382_v43 = vmul.f32 %v2129_v1, %v2129_v1  ;;  %v2417_v32 = vsel %vm1708_vm3, %v2383_v13, 0.0  ;;  %v1766_v13 = vsel %vm1741_vm4, %v1733_v18, %v3946_v49 }
 0x23a   : > { %v2313_v47 = vadd.f32 %v2312_v24, %v2311_v27  ;;  %v1499_v10 = vpop.permute.xlu0 %1498  ;;  %v1896_v35 = vsel %vm1873_vm8, %v1863_v50, %v1497_v45  ;;  %v1767_v44 = vsel %vm1741_vm4, %v1734_v12, %v3949_v25 }
 0x23b   : > { %v2415_v52 = vsel %vm1708_vm3, %v2382_v43, 0.0  ;;  %v1897_v2 = vsel %vm1873_vm8, %v1864_v6, %v1499_v10 }
 0x23c   : > { %v2416_v51 = vadd.f32 %v2415_v52, %v2414_v15  ;;  %v2315_v19 = vadd.f32 %v2314_v23, %v2313_v47 }
 0x23d   : > { %v1117_v28 = vpop.permute.xlu1 %1116 }
 0x23e   : > { %v1119_v14 = vpop.permute.xlu0 %1118  ;;  %v2418_v62 = vadd.f32 %v2417_v32, %v2416_v51  ;;  %v1799_v55 = vsel %vm1774_vm5, %v1766_v13, %v1117_v28 }
 0x23f   : > { %v1800_v10 = vsel %vm1774_vm5, %v1767_v44, %v1119_v14 }
 0x241   : > { %v1625_v57 = vpop.permute.xlu1 %1624 }
 0x242   : > { %v1929_v20 = vsel %vm1906_vm9, %v1896_v35, %v1625_v57  ;;  %v1627_v27 = vpop.permute.xlu0 %1626 }
 0x243   : > { %2714 = vmatprep.mubr.msk.f32.mxu1 %vm1951_vm10, %v1929_v20  ;;  %v1930_v48 = vsel %vm1906_vm9, %v1897_v2, %v1627_v27 }
 0x244   : > { %2715 = vmatmul.mubr.msk.f32.gmra.mxu1 %vm1951_vm10, %v1930_v48 }
 0x245   : > { %v1245_v26 = vpop.permute.xlu1 %1244 }
 0x246   : > { %v1373_v56 = vpop.permute.xlu0 %1372  ;;  %v1832_v8 = vsel %vm1807_vm6, %v1799_v55, %v1245_v26 }
 0x247   : > { %v1865_v49 = vsel %vm1840_vm7, %v1832_v8, %v1373_v56  ;;  %v389_v56 = vld [vmem:[#allocation2 + $0x138] sm:$0xff] }
 0x248   : > { %v2689_v22 = vpop.f32.mrf.mxu0 }
 0x249   : > { %v1247_v0 = vpop.permute.xlu1 %1246  ;;  %v2144_v7 = vadd.f32 %v2689_v22, %v3898_v42 }
 0x24a   : > { %v1375_v15 = vpop.permute.xlu0 %1374  ;;  %v2138_v63 = vpop.f32.mrf.mxu0  ;;  %v1833_v36 = vsel %vm1807_vm6, %v1800_v10, %v1247_v0 }
 0x24b   : > { %2282 = vst.msk [vmem:[%s3908_s25 + $0x28] sm:$0xff] %vm1708_vm3, %v2144_v7  ;;  %v2139_v17 = vadd.f32 %v3898_v42, %v2138_v63  ;;  %v2385_v9 = vmul.f32 %v2144_v7, %v2144_v7  ;;  %v2318_v61 = vsel %vm1708_vm3, %v2144_v7, 0.0  ;;  %v1866_v23 = vsel %vm1840_vm7, %v1833_v36, %v1375_v15  ;;  %v4357_v15 = vld [vmem:[#allocation24_spill] sm:$0xff] }
 0x24c   : > { %v1702_v63 = vsel %vm242_vm0, %v389_v56, %v4357_v15 }
 0x24d   : > { %v3988_v3 = vpop.permute.xlu1 %992  ;;  %2281 = vst.msk [vmem:[%s3908_s25 + $0x20] sm:$0xff] %vm1708_vm3, %v2139_v17  ;;  %v2316_v34 = vsel %vm1708_vm3, %v2139_v17, 0.0  ;;  %v2384_v21 = vmul.f32 %v2139_v17, %v2139_v17  ;;  %v2421_v45 = vsel %vm1708_vm3, %v2385_v9, 0.0  ;;  %v4358_v9 = vld [vmem:[#allocation48_spill] sm:$0xff] }
 0x24e   : > { %v2317_v59 = vadd.f32 %v2316_v34, %v2315_v19  ;;  %v3993_v33 = vpop.permute.xlu0 %994  ;;  %v1735_v34 = vsel %vm1708_vm3, %v1702_v63, %v4358_v9 }
 0x24f   : > { %v2419_v30 = vsel %vm1708_vm3, %v2384_v21, 0.0  ;;  %v4359_v21 = vld [vmem:[#allocation27_spill] sm:$0xff] }
 0x250   : > { %v2420_v41 = vadd.f32 %v2419_v30, %v2418_v62  ;;  %v2319_v37 = vadd.f32 %v2318_v61, %v2317_v59  ;;  %v1703_v59 = vsel %vm242_vm0, %v3732_v11, %v4359_v21  ;;  %v1768_v61 = vsel %vm1741_vm4, %v1735_v34, %v3988_v3 }
 0x251   : > { %v1501_v1 = vpop.permute.xlu1 %1500  ;;  %v1736_v46 = vsel %vm1708_vm3, %v1703_v59, %v4360_v58 }
 0x252   : > { %v1503_v24 = vpop.permute.xlu0 %1502  ;;  %v2422_v43 = vadd.f32 %v2421_v45, %v2420_v41  ;;  %v1898_v54 = vsel %vm1873_vm8, %v1865_v49, %v1501_v1  ;;  %v1769_v1 = vsel %vm1741_vm4, %v1736_v46, %v3993_v33 }
 0x253   : > { %v1899_v25 = vsel %vm1873_vm8, %v1866_v23, %v1503_v24 }
 0x255   : > { %v1121_v47 = vpop.permute.xlu1 %1120 }
 0x256   : > { %v1123_v39 = vpop.permute.xlu0 %1122  ;;  %v1801_v41 = vsel %vm1774_vm5, %v1768_v61, %v1121_v47 }
 0x257   : > { %v1802_v18 = vsel %vm1774_vm5, %v1769_v1, %v1123_v39 }
 0x259   : > { %v1629_v29 = vpop.permute.xlu1 %1628 }
 0x25a   : > { %v1931_v52 = vsel %vm1906_vm9, %v1898_v54, %v1629_v29  ;;  %v1631_v60 = vpop.permute.xlu0 %1630 }
 0x25b   : > { %2717 = vmatprep.mubr.msk.f32.mxu1 %vm1951_vm10, %v1931_v52  ;;  %v1932_v4 = vsel %vm1906_vm9, %v1899_v25, %v1631_v60 }
 0x25c   : > { %2718 = vmatmul.mubr.msk.f32.gmra.mxu1 %vm1951_vm10, %v1932_v4  ;;  %v2692_v28 = vpop.f32.mrf.mxu0 }
 0x25d   : > { %v1249_v51 = vpop.permute.xlu1 %1248  ;;  %v2154_v19 = vadd.f32 %v2692_v28, %v3898_v42 }
 0x25e   : > { %v1377_v38 = vpop.permute.xlu0 %1376  ;;  %v2148_v32 = vpop.f32.mrf.mxu0 }
 0x25f   : > { %2284 = vst.msk [vmem:[%s3908_s25 + $0x38] sm:$0xff] %vm1708_vm3, %v2154_v19  ;;  %v2149_v31 = vadd.f32 %v3898_v42, %v2148_v32  ;;  %v2387_v62 = vmul.f32 %v2154_v19, %v2154_v19  ;;  %v2322_v20 = vsel %vm1708_vm3, %v2154_v19, 0.0  ;;  %v392_v32 = vld [vmem:[#allocation2 + $0x158] sm:$0xff] }
 0x261   : > { %v1251_v14 = vpop.permute.xlu1 %1250  ;;  %2283 = vst.msk [vmem:[%s3908_s25 + $0x30] sm:$0xff] %vm1708_vm3, %v2149_v31  ;;  %v2320_v50 = vsel %vm1708_vm3, %v2149_v31, 0.0  ;;  %v2386_v35 = vmul.f32 %v2149_v31, %v2149_v31  ;;  %v2425_v0 = vsel %vm1708_vm3, %v2387_v62, 0.0 }
 0x262   : > { %v2321_v57 = vadd.f32 %v2320_v50, %v2319_v37  ;;  %v1379_v6 = vpop.permute.xlu0 %1378  ;;  %v1834_v37 = vsel %vm1807_vm6, %v1801_v41, %v1249_v51  ;;  %v1835_v11 = vsel %vm1807_vm6, %v1802_v18, %v1251_v14  ;;  %v4361_v14 = vld [vmem:[#allocation26_spill] sm:$0xff] }
 0x263   : > { %v2423_v2 = vsel %vm1708_vm3, %v2386_v35, 0.0  ;;  %v1867_v3 = vsel %vm1840_vm7, %v1834_v37, %v1377_v38  ;;  %v1868_v24 = vsel %vm1840_vm7, %v1835_v11, %v1379_v6  ;;  %v391_v38 = vld [vmem:[#allocation2 + $0x150] sm:$0xff]  ;;  %v4362_v35 = vld [vmem:[#allocation30_spill] sm:$0xff] }
 0x264   : > { %v2424_v27 = vadd.f32 %v2423_v2, %v2422_v43  ;;  %v2323_v26 = vadd.f32 %v2322_v20, %v2321_v57  ;;  %v1704_v62 = vsel %vm242_vm0, %v391_v38, %v4361_v14  ;;  %v1705_v57 = vsel %vm242_vm0, %v392_v32, %v4362_v35  ;;  %v4363_v6 = vld [vmem:[#allocation50_spill] sm:$0xff]  ;;  %v4364_v2 = vld [vmem:[#allocation53_spill] sm:$0xff] }
 0x265   : > { %v997_v48 = vpop.permute.xlu1 %996  ;;  %v1737_v20 = vsel %vm1708_vm3, %v1704_v62, %v4363_v6  ;;  %v4368_v38 = vld [vmem:[#allocation54_spill] sm:$0xff] }
 0x266   : > { %v999_v22 = vpop.permute.xlu0 %998  ;;  %v2426_v7 = vadd.f32 %v2425_v0, %v2424_v27  ;;  %v1738_v27 = vsel %vm1708_vm3, %v1705_v57, %v4364_v2 }
 0x267   : > { %v1771_v0 = vsel %vm1741_vm4, %v1738_v27, %v999_v22 }
 0x269   : > { %v1505_v17 = vpop.permute.xlu1 %1504 }
 0x26a   : > { %v1507_v30 = vpop.permute.xlu0 %1506  ;;  %v1900_v40 = vsel %vm1873_vm8, %v1867_v3, %v1505_v17  ;;  %v393_v3 = vld [vmem:[#allocation2 + $0x168] sm:$0xff] }
 0x26b   : > { %v1901_v53 = vsel %vm1873_vm8, %v1868_v24, %v1507_v30 }
 0x26d   : > { %v1125_v5 = vpop.permute.xlu1 %1124 }
 0x26e   : > { %v1127_v45 = vpop.permute.xlu0 %1126 }
 0x26f   : > { %v1804_v15 = vsel %vm1774_vm5, %v1771_v0, %v1127_v45 }
 0x270   : > { %v2695_v13 = vpop.f32.mrf.mxu0 }
 0x271   : > { %v1633_v16 = vpop.permute.xlu1 %1632  ;;  %v2164_v43 = vadd.f32 %v2695_v13, %v3898_v42 }
 0x272   : > { %v1933_v33 = vsel %vm1906_vm9, %v1900_v40, %v1633_v16  ;;  %v1635_v12 = vpop.permute.xlu0 %1634  ;;  %v2158_v55 = vpop.f32.mrf.mxu0 }
 0x273   : > { %2720 = vmatprep.mubr.msk.f32.mxu1 %vm1951_vm10, %v1933_v33  ;;  %2286 = vst.msk [vmem:[%s3908_s25 + $0x48] sm:$0xff] %vm1708_vm3, %v2164_v43  ;;  %v1934_v44 = vsel %vm1906_vm9, %v1901_v53, %v1635_v12  ;;  %v2159_v8 = vadd.f32 %v3898_v42, %v2158_v55  ;;  %v2389_v10 = vmul.f32 %v2164_v43, %v2164_v43  ;;  %v2326_v29 = vsel %vm1708_vm3, %v2164_v43, 0.0  ;;  %v4365_v12 = vld [vmem:[#allocation29_spill] sm:$0xff] }
 0x274   : > { %2721 = vmatmul.mubr.msk.f32.gmra.mxu1 %vm1951_vm10, %v1934_v44  ;;  %v1706_v55 = vsel %vm242_vm0, %v393_v3, %v4365_v12 }
 0x275   : > { %v1253_v47 = vpop.permute.xlu1 %1252  ;;  %2285 = vst.msk [vmem:[%s3908_s25 + $0x40] sm:$0xff] %vm1708_vm3, %v2159_v8  ;;  %v2324_v36 = vsel %vm1708_vm3, %v2159_v8, 0.0  ;;  %v2388_v39 = vmul.f32 %v2159_v8, %v2159_v8  ;;  %v2429_v4 = vsel %vm1708_vm3, %v2389_v10, 0.0 }
 0x276   : > { %v2325_v49 = vadd.f32 %v2324_v36, %v2323_v26  ;;  %v1381_v54 = vpop.permute.xlu0 %1380  ;;  %v1770_v26 = vsel %vm1741_vm4, %v1737_v20, %v997_v48 }
 0x277   : > { %v2427_v23 = vsel %vm1708_vm3, %v2388_v39, 0.0 }
 0x278   : > { %v2428_v52 = vadd.f32 %v2427_v23, %v2426_v7  ;;  %v2327_v60 = vadd.f32 %v2326_v29, %v2325_v49  ;;  %v1803_v7 = vsel %vm1774_vm5, %v1770_v26, %v1125_v5  ;;  %v394_v23 = vld [vmem:[#allocation2 + $0x170] sm:$0xff] }
 0x279   : > { %v1255_v25 = vpop.permute.xlu1 %1254  ;;  %v1836_v63 = vsel %vm1807_vm6, %v1803_v7, %v1253_v47  ;;  %v4366_v47 = vld [vmem:[#allocation52_spill] sm:$0xff] }
 0x27a   : > { %v1383_v51 = vpop.permute.xlu0 %1382  ;;  %v2430_v28 = vadd.f32 %v2429_v4, %v2428_v52  ;;  %v1837_v34 = vsel %vm1807_vm6, %v1804_v15, %v1255_v25  ;;  %v1869_v48 = vsel %vm1840_vm7, %v1836_v63, %v1381_v54  ;;  %v1739_v10 = vsel %vm1708_vm3, %v1706_v55, %v4366_v47 }
 0x27b   : > { %v1870_v30 = vsel %vm1840_vm7, %v1837_v34, %v1383_v51 }
 0x27d   : > { %v1001_v19 = vpop.permute.xlu1 %1000 }
 0x27e   : > { %v1003_v31 = vpop.permute.xlu0 %1002  ;;  %v1772_v36 = vsel %vm1741_vm4, %v1739_v10, %v1001_v19 }
 0x281   : > { %v1509_v50 = vpop.permute.xlu1 %1508 }
 0x282   : > { %v1511_v56 = vpop.permute.xlu0 %1510  ;;  %v1902_v58 = vsel %vm1873_vm8, %v1869_v48, %v1509_v50 }
 0x283   : > { %v1903_v18 = vsel %vm1873_vm8, %v1870_v30, %v1511_v56 }
 0x284   : > { %v2698_v9 = vpop.f32.mrf.mxu0 }
 0x285   : > { %v1129_v17 = vpop.permute.xlu1 %1128  ;;  %v2174_v21 = vadd.f32 %v2698_v9, %v3898_v42 }
 0x286   : > { %v1131_v59 = vpop.permute.xlu0 %1130  ;;  %v2168_v61 = vpop.f32.mrf.mxu0  ;;  %v1805_v49 = vsel %vm1774_vm5, %v1772_v36, %v1129_v17 }
 0x287   : > { %2288 = vst.msk [vmem:[%s3908_s25 + $0x58] sm:$0xff] %vm1708_vm3, %v2174_v21  ;;  %v2169_v22 = vadd.f32 %v3898_v42, %v2168_v61  ;;  %v2391_v41 = vmul.f32 %v2174_v21, %v2174_v21  ;;  %v2330_v40 = vsel %vm1708_vm3, %v2174_v21, 0.0 }
 0x289   : > { %v1637_v46 = vpop.permute.xlu1 %1636  ;;  %2287 = vst.msk [vmem:[%s3908_s25 + $0x50] sm:$0xff] %vm1708_vm3, %v2169_v22  ;;  %v2328_v1 = vsel %vm1708_vm3, %v2169_v22, 0.0  ;;  %v2390_v37 = vmul.f32 %v2169_v22, %v2169_v22  ;;  %v2433_v53 = vsel %vm1708_vm3, %v2391_v41, 0.0 }
 0x28a   : > { %v1935_v5 = vsel %vm1906_vm9, %v1902_v58, %v1637_v46  ;;  %v2329_v11 = vadd.f32 %v2328_v1, %v2327_v60  ;;  %v1639_v45 = vpop.permute.xlu0 %1638  ;;  %v4367_v60 = vld [vmem:[#allocation31_spill] sm:$0xff] }
 0x28b   : > { %2723 = vmatprep.mubr.msk.f32.mxu1 %vm1951_vm10, %v1935_v5  ;;  %v2431_v16 = vsel %vm1708_vm3, %v2390_v37, 0.0  ;;  %v1936_v13 = vsel %vm1906_vm9, %v1903_v18, %v1639_v45  ;;  %v1707_v4 = vsel %vm242_vm0, %v394_v23, %v4367_v60 }
 0x28c   : > { %v2432_v24 = vadd.f32 %v2431_v16, %v2430_v28  ;;  %2724 = vmatmul.mubr.msk.f32.gmra.mxu1 %vm1951_vm10, %v1936_v13  ;;  %v2331_v43 = vadd.f32 %v2330_v40, %v2329_v11  ;;  %v1740_v19 = vsel %vm1708_vm3, %v1707_v4, %v4368_v38 }
 0x28d   : > { %v1257_v33 = vpop.permute.xlu1 %1256  ;;  %v1773_v14 = vsel %vm1741_vm4, %v1740_v19, %v1003_v31 }
 0x28e   : > { %v1385_v44 = vpop.permute.xlu0 %1384  ;;  %v2434_v8 = vadd.f32 %v2433_v53, %v2432_v24  ;;  %v1838_v54 = vsel %vm1807_vm6, %v1805_v49, %v1257_v33  ;;  %v1806_v35 = vsel %vm1774_vm5, %v1773_v14, %v1131_v59 }
 0x28f   : > { %v1871_v25 = vsel %vm1840_vm7, %v1838_v54, %v1385_v44 }
 0x291   : > { %v1259_v39 = vpop.permute.xlu1 %1258 }
 0x292   : > { %v1513_v29 = vpop.permute.xlu0 %1512  ;;  %v1839_v6 = vsel %vm1807_vm6, %v1806_v35, %v1259_v39 }
 0x293   : > { %v1904_v51 = vsel %vm1873_vm8, %v1871_v25, %v1513_v29 }
 0x295   : > { %v1387_v52 = vpop.permute.xlu1 %1386 }
 0x296   : > { %v1641_v28 = vpop.permute.xlu0 %1640  ;;  %v1872_v2 = vsel %vm1840_vm7, %v1839_v6, %v1387_v52 }
 0x297   : > { %v1937_v32 = vsel %vm1906_vm9, %v1904_v51, %v1641_v28 }
 0x298   : > { %2726 = vmatprep.mubr.msk.f32.mxu1 %vm1951_vm10, %v1937_v32  ;;  %v2701_v50 = vpop.f32.mrf.mxu0 }
 0x299   : > { %v1515_v62 = vpop.permute.xlu1 %1514  ;;  %v2184_v57 = vadd.f32 %v2701_v50, %v3898_v42 }
 0x29a   : > { %v2178_v20 = vpop.f32.mrf.mxu0  ;;  %v1905_v26 = vsel %vm1873_vm8, %v1872_v2, %v1515_v62 }
 0x29b   : > { %2290 = vst.msk [vmem:[%s3908_s25 + $0x68] sm:$0xff] %vm1708_vm3, %v2184_v57  ;;  %v2179_v27 = vadd.f32 %v3898_v42, %v2178_v20  ;;  %v2393_v56 = vmul.f32 %v2184_v57, %v2184_v57  ;;  %v2334_v17 = vsel %vm1708_vm3, %v2184_v57, 0.0 }
 0x29d   : > { %v1643_v31 = vpop.permute.xlu1 %1642  ;;  %2289 = vst.msk [vmem:[%s3908_s25 + $0x60] sm:$0xff] %vm1708_vm3, %v2179_v27  ;;  %v2332_v0 = vsel %vm1708_vm3, %v2179_v27, 0.0  ;;  %v2392_v7 = vmul.f32 %v2179_v27, %v2179_v27  ;;  %v2437_v59 = vsel %vm1708_vm3, %v2393_v56, 0.0 }
 0x29e   : > { %v1938_v15 = vsel %vm1906_vm9, %v1905_v26, %v1643_v31  ;;  %v2333_v63 = vadd.f32 %v2332_v0, %v2331_v43 }
 0x29f   : > { %2727 = vmatmul.mubr.msk.f32.gmra.mxu1 %vm1951_vm10, %v1938_v15  ;;  %v2435_v9 = vsel %vm1708_vm3, %v2392_v7, 0.0 }
 0x2a0   : > { %v2436_v34 = vadd.f32 %v2435_v9, %v2434_v8  ;;  %v2335_v21 = vadd.f32 %v2334_v17, %v2333_v63 }
 0x2a2   : > { %v2438_v61 = vadd.f32 %v2437_v59, %v2436_v34 }
 0x2ac   : > { %v2704_v48 = vpop.f32.mrf.mxu0 }
 0x2ad   : > { %v2194_v22 = vadd.f32 %v2704_v48, %v3898_v42 }
 0x2ae   : > { %v2188_v30 = vpop.f32.mrf.mxu0 }
 0x2af   : > { %2292 = vst.msk [vmem:[%s3908_s25 + $0x78] sm:$0xff] %vm1708_vm3, %v2194_v22  ;;  %v2189_v58 = vadd.f32 %v3898_v42, %v2188_v30  ;;  %v2395_v46 = vmul.f32 %v2194_v22, %v2194_v22  ;;  %v2338_v5 = vsel %vm1708_vm3, %v2194_v22, 0.0 }
 0x2b1   : > { %2291 = vst.msk [vmem:[%s3908_s25 + $0x70] sm:$0xff] %vm1708_vm3, %v2189_v58  ;;  %v2336_v41 = vsel %vm1708_vm3, %v2189_v58, 0.0  ;;  %v2394_v1 = vmul.f32 %v2189_v58, %v2189_v58  ;;  %v2441_v3 = vsel %vm1708_vm3, %v2395_v46, 0.0 }
 0x2b2   : > { %v2337_v37 = vadd.f32 %v2336_v41, %v2335_v21 }
 0x2b3   : > { %v2439_v18 = vsel %vm1708_vm3, %v2394_v1, 0.0 }
 0x2b4   : > { %v2440_v11 = vadd.f32 %v2439_v18, %v2438_v61  ;;  %v2339_v45 = vadd.f32 %v2338_v5, %v2337_v37 }
 0x2b6   : > { %v2442_v40 = vadd.f32 %v2441_v3, %v2440_v11 }
 0x2c0   : > { %v2707_v16 = vpop.f32.mrf.mxu1 }
 0x2c1   : > { %v2204_v13 = vadd.f32 %v2707_v16, %v3898_v42 }
 0x2c2   : > { %v2198_v24 = vpop.f32.mrf.mxu1 }
 0x2c3   : > { %2294 = vst.msk [vmem:[%s3908_s25 + $0x88] sm:$0xff] %vm1708_vm3, %v2204_v13  ;;  %v2199_v33 = vadd.f32 %v3898_v42, %v2198_v24  ;;  %v2397_v43 = vmul.f32 %v2204_v13, %v2204_v13  ;;  %v2342_v44 = vsel %vm1708_vm3, %v2204_v13, 0.0 }
 0x2c5   : > { %2293 = vst.msk [vmem:[%s3908_s25 + $0x80] sm:$0xff] %vm1708_vm3, %v2199_v33  ;;  %v2340_v53 = vsel %vm1708_vm3, %v2199_v33, 0.0  ;;  %v2396_v12 = vmul.f32 %v2199_v33, %v2199_v33  ;;  %v2445_v36 = vsel %vm1708_vm3, %v2397_v43, 0.0 }
 0x2c6   : > { %v2341_v55 = vadd.f32 %v2340_v53, %v2339_v45 }
 0x2c7   : > { %v2443_v8 = vsel %vm1708_vm3, %v2396_v12, 0.0 }
 0x2c8   : > { %v2444_v47 = vadd.f32 %v2443_v8, %v2442_v40  ;;  %v2343_v10 = vadd.f32 %v2342_v44, %v2341_v55 }
 0x2ca   : > { %v2446_v39 = vadd.f32 %v2445_v36, %v2444_v47 }
 0x2d4   : > { %v2710_v49 = vpop.f32.mrf.mxu1 }
 0x2d5   : > { %v2214_v54 = vadd.f32 %v2710_v49, %v3898_v42 }
 0x2d6   : > { %v2208_v29 = vpop.f32.mrf.mxu1 }
 0x2d7   : > { %2296 = vst.msk [vmem:[%s3908_s25 + $0x98] sm:$0xff] %vm1708_vm3, %v2214_v54  ;;  %v2209_v23 = vadd.f32 %v3898_v42, %v2208_v29  ;;  %v2399_v52 = vmul.f32 %v2214_v54, %v2214_v54  ;;  %v2346_v51 = vsel %vm1708_vm3, %v2214_v54, 0.0 }
 0x2d9   : > { %2295 = vst.msk [vmem:[%s3908_s25 + $0x90] sm:$0xff] %vm1708_vm3, %v2209_v23  ;;  %v2344_v25 = vsel %vm1708_vm3, %v2209_v23, 0.0  ;;  %v2398_v60 = vmul.f32 %v2209_v23, %v2209_v23  ;;  %v2449_v32 = vsel %vm1708_vm3, %v2399_v52, 0.0 }
 0x2da   : > { %v2345_v4 = vadd.f32 %v2344_v25, %v2343_v10 }
 0x2db   : > { %v2447_v28 = vsel %vm1708_vm3, %v2398_v60, 0.0 }
 0x2dc   : > { %v2448_v38 = vadd.f32 %v2447_v28, %v2446_v39  ;;  %v2347_v19 = vadd.f32 %v2346_v51, %v2345_v4 }
 0x2de   : > { %v2450_v14 = vadd.f32 %v2449_v32, %v2448_v38 }
 0x2ec   : > { %v2713_v62 = vpop.f32.mrf.mxu1 }
 0x2ed   : > { %v2224_v50 = vadd.f32 %v2713_v62, %v3898_v42 }
 0x2ee   : > { %v2218_v35 = vpop.f32.mrf.mxu1 }
 0x2ef   : > { %2298 = vst.msk [vmem:[%s3908_s25 + $0xa8] sm:$0xff] %vm1708_vm3, %v2224_v50  ;;  %v2219_v57 = vadd.f32 %v3898_v42, %v2218_v35  ;;  %v2401_v6 = vmul.f32 %v2224_v50, %v2224_v50  ;;  %v2350_v26 = vsel %vm1708_vm3, %v2224_v50, 0.0 }
 0x2f1   : > { %2297 = vst.msk [vmem:[%s3908_s25 + $0xa0] sm:$0xff] %vm1708_vm3, %v2219_v57  ;;  %v2348_v20 = vsel %vm1708_vm3, %v2219_v57, 0.0  ;;  %v2400_v2 = vmul.f32 %v2219_v57, %v2219_v57  ;;  %v2453_v7 = vsel %vm1708_vm3, %v2401_v6, 0.0 }
 0x2f2   : > { %v2349_v27 = vadd.f32 %v2348_v20, %v2347_v19 }
 0x2f3   : > { %v2451_v31 = vsel %vm1708_vm3, %v2400_v2, 0.0 }
 0x2f4   : > { %v2452_v56 = vadd.f32 %v2451_v31, %v2450_v14  ;;  %v2351_v0 = vadd.f32 %v2350_v26, %v2349_v27 }
 0x2f6   : > { %v2454_v15 = vadd.f32 %v2453_v7, %v2452_v56 }
 0x304   : > { %v2716_v63 = vpop.f32.mrf.mxu1 }
 0x305   : > { %v2234_v17 = vadd.f32 %v2716_v63, %v3898_v42 }
 0x306   : > { %v2228_v9 = vpop.f32.mrf.mxu1 }
 0x307   : > { %2300 = vst.msk [vmem:[%s3908_s25 + $0xb8] sm:$0xff] %vm1708_vm3, %v2234_v17  ;;  %v2229_v34 = vadd.f32 %v3898_v42, %v2228_v9  ;;  %v2403_v21 = vmul.f32 %v2234_v17, %v2234_v17  ;;  %v2354_v22 = vsel %vm1708_vm3, %v2234_v17, 0.0 }
 0x309   : > { %2299 = vst.msk [vmem:[%s3908_s25 + $0xb0] sm:$0xff] %vm1708_vm3, %v2229_v34  ;;  %v2352_v59 = vsel %vm1708_vm3, %v2229_v34, 0.0  ;;  %v2402_v61 = vmul.f32 %v2229_v34, %v2229_v34  ;;  %v2457_v41 = vsel %vm1708_vm3, %v2403_v21, 0.0 }
 0x30a   : > { %v2353_v48 = vadd.f32 %v2352_v59, %v2351_v0 }
 0x30b   : > { %v2455_v30 = vsel %vm1708_vm3, %v2402_v61, 0.0 }
 0x30c   : > { %v2456_v58 = vadd.f32 %v2455_v30, %v2454_v15  ;;  %v2355_v46 = vadd.f32 %v2354_v22, %v2353_v48 }
 0x30e   : > { %v2458_v1 = vadd.f32 %v2457_v41, %v2456_v58 }
 0x31c   : > { %v2719_v37 = vpop.f32.mrf.mxu1 }
 0x31d   : > { %v2244_v5 = vadd.f32 %v2719_v37, %v3898_v42 }
 0x31e   : > { %v2238_v18 = vpop.f32.mrf.mxu1 }
 0x31f   : > { %2302 = vst.msk [vmem:[%s3908_s25 + $0xc8] sm:$0xff] %vm1708_vm3, %v2244_v5  ;;  %v2239_v11 = vadd.f32 %v3898_v42, %v2238_v18  ;;  %v2405_v8 = vmul.f32 %v2244_v5, %v2244_v5  ;;  %v2358_v36 = vsel %vm1708_vm3, %v2244_v5, 0.0 }
 0x321   : > { %2301 = vst.msk [vmem:[%s3908_s25 + $0xc0] sm:$0xff] %vm1708_vm3, %v2239_v11  ;;  %v2404_v24 = vmul.f32 %v2239_v11, %v2239_v11  ;;  %v2356_v53 = vsel %vm1708_vm3, %v2239_v11, 0.0  ;;  %v2461_v54 = vsel %vm1708_vm3, %v2405_v8, 0.0 }
 0x322   : > { %v2357_v44 = vadd.f32 %v2356_v53, %v2355_v46 }
 0x323   : > { %v2459_v55 = vsel %vm1708_vm3, %v2404_v24, 0.0 }
 0x324   : > { %v2460_v10 = vadd.f32 %v2459_v55, %v2458_v1  ;;  %v2359_v49 = vadd.f32 %v2358_v36, %v2357_v44 }
 0x326   : > { %v2462_v52 = vadd.f32 %v2461_v54, %v2460_v10 }
 0x334   : > { %v2722_v45 = vpop.f32.mrf.mxu1 }
 0x335   : > { %v2254_v3 = vadd.f32 %v2722_v45, %v3898_v42 }
 0x336   : > { %v2248_v40 = vpop.f32.mrf.mxu1 }
 0x337   : > { %2304 = vst.msk [vmem:[%s3908_s25 + $0xd8] sm:$0xff] %vm1708_vm3, %v2254_v3  ;;  %v2249_v16 = vadd.f32 %v3898_v42, %v2248_v40  ;;  %v2407_v25 = vmul.f32 %v2254_v3, %v2254_v3  ;;  %v2362_v51 = vsel %vm1708_vm3, %v2254_v3, 0.0 }
 0x339   : > { %2303 = vst.msk [vmem:[%s3908_s25 + $0xd0] sm:$0xff] %vm1708_vm3, %v2249_v16  ;;  %v2406_v47 = vmul.f32 %v2249_v16, %v2249_v16  ;;  %v2360_v39 = vsel %vm1708_vm3, %v2249_v16, 0.0  ;;  %v2465_v19 = vsel %vm1708_vm3, %v2407_v25, 0.0 }
 0x33a   : > { %v2361_v23 = vadd.f32 %v2360_v39, %v2359_v49 }
 0x33b   : > { %v2463_v29 = vsel %vm1708_vm3, %v2406_v47, 0.0 }
 0x33c   : > { %v2464_v4 = vadd.f32 %v2463_v29, %v2462_v52  ;;  %v2363_v38 = vadd.f32 %v2362_v51, %v2361_v23 }
 0x33e   : > { %v2466_v62 = vadd.f32 %v2465_v19, %v2464_v4 }
 0x34c   : > { %v2725_v13 = vpop.f32.mrf.mxu1 }
 0x34d   : > { %v2264_v33 = vadd.f32 %v2725_v13, %v3898_v42 }
 0x34e   : > { %v2258_v43 = vpop.f32.mrf.mxu1 }
 0x34f   : > { %2306 = vst.msk [vmem:[%s3908_s25 + $0xe8] sm:$0xff] %vm1708_vm3, %v2264_v33  ;;  %v2259_v12 = vadd.f32 %v3898_v42, %v2258_v43  ;;  %v2409_v35 = vmul.f32 %v2264_v33, %v2264_v33  ;;  %v2366_v2 = vsel %vm1708_vm3, %v2264_v33, 0.0 }
 0x351   : > { %2305 = vst.msk [vmem:[%s3908_s25 + $0xe0] sm:$0xff] %vm1708_vm3, %v2259_v12  ;;  %v2408_v60 = vmul.f32 %v2259_v12, %v2259_v12  ;;  %v2364_v28 = vsel %vm1708_vm3, %v2259_v12, 0.0  ;;  %v2469_v31 = vsel %vm1708_vm3, %v2409_v35, 0.0 }
 0x352   : > { %v2365_v14 = vadd.f32 %v2364_v28, %v2363_v38 }
 0x353   : > { %v2467_v32 = vsel %vm1708_vm3, %v2408_v60, 0.0 }
 0x354   : > { %v2468_v6 = vadd.f32 %v2467_v32, %v2466_v62  ;;  %v2367_v26 = vadd.f32 %v2366_v2, %v2365_v14 }
 0x356   : > { %v2470_v63 = vadd.f32 %v2469_v31, %v2468_v6 }
 0x35f   : > { %v2728_v50 = vpop.f32.mrf.mxu1 }
 0x360   : > { %v2274_v57 = vadd.f32 %v2728_v50, %v3898_v42 }
 0x361   : > { %v2268_v20 = vpop.f32.mrf.mxu1 }
 0x362   : > { %2308 = vst.msk [vmem:[%s3908_s25 + $0xf8] sm:$0xff] %vm1708_vm3, %v2274_v57  ;;  %v2269_v27 = vadd.f32 %v3898_v42, %v2268_v20  ;;  %v2411_v56 = vmul.f32 %v2274_v57, %v2274_v57  ;;  %v2370_v17 = vsel %vm1708_vm3, %v2274_v57, 0.0 }
 0x364   : > { %2307 = vst.msk [vmem:[%s3908_s25 + $0xf0] sm:$0xff] %vm1708_vm3, %v2269_v27  ;;  %v2368_v0 = vsel %vm1708_vm3, %v2269_v27, 0.0  ;;  %v2410_v7 = vmul.f32 %v2269_v27, %v2269_v27  ;;  %v2473_v42 = vsel %vm1708_vm3, %v2411_v56, 0.0 }
 0x365   : > { %v2369_v15 = vadd.f32 %v2368_v0, %v2367_v26 }
 0x366   : > { %v2471_v9 = vsel %vm1708_vm3, %v2410_v7, 0.0 }
 0x367   : > { %v2371_v34 = vadd.f32 %v2370_v17, %v2369_v15  ;;  %v2472_v21 = vadd.f32 %v2471_v9, %v2470_v63 }
 0x369   : > { %v2372_v59 = vrot.slane %v2371_v34, 4  ;;  %v2474_v61 = vadd.f32 %v2473_v42, %v2472_v21 }
 0x36b   : > { %v2373_v48 = vadd.f32 %v2372_v59, %v2371_v34  ;;  %v2475_v22 = vrot.slane %v2474_v61, 4 }
 0x36d   : > { %v2374_v30 = vrot.slane %v2373_v48, 2  ;;  %v2476_v58 = vadd.f32 %v2475_v22, %v2474_v61 }
 0x36f   : > { %v2375_v46 = vadd.f32 %v2374_v30, %v2373_v48  ;;  %v2477_v41 = vrot.slane %v2476_v58, 2 }
 0x371   : > { %v2376_v1 = vrot.slane %v2375_v46, 1  ;;  %v2478_v37 = vadd.f32 %v2477_v41, %v2476_v58 }
 0x373   : > { %v2377_v5 = vadd.f32 %v2376_v1, %v2375_v46  ;;  %v2479_v18 = vrot.slane %v2478_v37, 1 }
 0x375   : > { %2379 = vst.msk [vmem:[%s238_s27] sm:$0x1] %vm2378_vm11, %v2377_v5  ;;  %v2480_v11 = vadd.f32 %v2479_v18, %v2478_v37 }
 0x377   : > { %2481 = vst.msk [vmem:[%s241_s30] sm:$0x1] %vm2378_vm11, %v2480_v11 }
 0x378 PF: > { %s16_s18 = sadd.s32 1, %s2770_s18  }
 0x379   : > { %p13_p4 = scmp.ge.s32.totalorder %s16_s18, 4  }
 0x37b   :  { %15 = sbr.rel (!%p13_p4) target bundleno = 1 (0x1), region = 88 }

</bundles_post_ra>
